<compile_context>
chip_gen: v5e
topology: v5e:2x2
jax: 0.10.0
libtpu: 0.0.40
codegen_flags: <defaults>
</compile_context>

<pallas_src>
import math

import jax
import jax.numpy as jnp
from jax.experimental import pallas as pl
from jax.experimental.pallas import tpu as pltpu

# ----------------------------- configuration --------------------------------
D_MODEL = 32          # d_model
NHEAD = 4             # nhead
HEAD_DIM = D_MODEL // NHEAD
N_LAYERS = 2          # n_layers
LN_EPS = 1e-5         # nn.LayerNorm default eps
ATTN_EPS = 1e-6       # LinearAttention eps


# ----------------------------- Pallas kernel ---------------------------------
def _phi(x):
    # elu(x) + 1  ==  x + 1 (x > 0)  ;  exp(x) (x <= 0).
    # min() keeps the dead exp branch from overflowing to inf.
    return jnp.where(x > 0, x + 1.0, jnp.exp(jnp.minimum(x, 0.0)))


def _layer_norm(x, gamma, beta):
    mu = jnp.mean(x, axis=-1, keepdims=True)
    var = jnp.mean((x - mu) ** 2, axis=-1, keepdims=True)
    return (x - mu) * jax.lax.rsqrt(var + LN_EPS) * gamma + beta


def msa_stack_kernel(feat_ref, mask_ref, wqkv_ref, wm_ref,
                     w1x_ref, w1a_ref, w2_ref, ln_ref, out_ref):
    """Full N_LAYERS MSA stack for a single batch element.

    feat_ref : [1, L, C]           input features for this batch element
    mask_ref : [C, C]              0/1 block-diagonal head mask
    wqkv_ref : [NL, C, 3C]         fused q/k/v projection weights ([in, out])
    wm_ref   : [NL, C, C]          merge projection
    w1x_ref  : [NL, C, 2C]         MLP first layer, rows multiplying x
    w1a_ref  : [NL, C, 2C]         MLP first layer, rows multiplying attended
    w2_ref   : [NL, 2C, C]         MLP second layer
    ln_ref   : [NL, 4, C]          [gamma1, beta1, gamma2, beta2]
    out_ref  : [1, L, C]
    """
    x = feat_ref[0]                                 # [L, C]
    head_mask = mask_ref[...]                       # [C, C]

    for l in range(N_LAYERS):
        # --- fused q/k/v projection: one [L,C] @ [C,3C] matmul ----------------
        qkv = jnp.dot(x, wqkv_ref[l], preferred_element_type=jnp.float32)
        q = _phi(qkv[:, :D_MODEL])                  # phi(Q)  [L, C]
        k = _phi(qkv[:, D_MODEL:2 * D_MODEL])       # phi(K)  [L, C]
        v = qkv[:, 2 * D_MODEL:]                    # V       [L, C]

        # --- linear attention, all heads at once ------------------------------
        # KV[c, c'] = sum_s phi(K)[s, c] * V[s, c'], masked to block-diagonal so
        # only same-head (c, c') pairs survive.
        kv = jax.lax.dot_general(k, v, (((0,), (0,)), ((), ())),
                                 preferred_element_type=jnp.float32)   # [C, C]
        kv = kv * head_mask
        ksum = jnp.sum(k, axis=0, keepdims=True)                       # [1, C]
        num = jnp.dot(q, kv, preferred_element_type=jnp.float32)       # [L, C]
        denom = jnp.dot(q * ksum, head_mask,
                        preferred_element_type=jnp.float32)            # [L, C]
        # (V/L pre-scale and *L post-scale of the reference cancel exactly.)
        message = num / (denom + ATTN_EPS)

        # --- merge projection + LayerNorm 1 ------------------------------------
        merged = jnp.dot(message, wm_ref[l], preferred_element_type=jnp.float32)
        ln = ln_ref[l]                                                  # [4, C]
        attended = _layer_norm(merged, ln[0:1, :], ln[1:2, :])

        # --- MLP on concat([x, attended]) without the concat --------------------
        h1 = (jnp.dot(x, w1x_ref[l], preferred_element_type=jnp.float32)
              + jnp.dot(attended, w1a_ref[l], preferred_element_type=jnp.float32))
        h1 = jnp.maximum(h1, 0.0)                                       # ReLU
        h2 = jnp.dot(h1, w2_ref[l], preferred_element_type=jnp.float32)

        # --- LayerNorm 2 + residual ---------------------------------------------
        h2 = _layer_norm(h2, ln[2:3, :], ln[3:4, :])
        x = x + h2

    out_ref[0] = x


def msa_stack(features, packed_params):
    """Apply all MSA layers to features [N, L, C] with a single Pallas kernel."""
    N, L, C = features.shape
    mask, wqkv, wm, w1x, w1a, w2, ln = packed_params

    def const_spec(arr):
        zeros = (0,) * arr.ndim
        return pl.BlockSpec(arr.shape, lambda b, _z=zeros: _z)

    return pl.pallas_call(
        msa_stack_kernel,
        out_shape=jax.ShapeDtypeStruct((N, L, C), jnp.float32),
        grid_spec=pltpu.PrefetchScalarGridSpec(
            num_scalar_prefetch=0,
            grid=(N,),
            in_specs=[
                pl.BlockSpec((1, L, C), lambda b: (b, 0, 0)),   # features
                const_spec(mask),                                # head mask
                const_spec(wqkv),                                # fused q/k/v
                const_spec(wm),                                  # merge
                const_spec(w1x),                                 # mlp w1 (x part)
                const_spec(w1a),                                 # mlp w1 (attn part)
                const_spec(w2),                                  # mlp w2
                const_spec(ln),                                  # layernorm params
            ],
            out_specs=pl.BlockSpec((1, L, C), lambda b: (b, 0, 0)),
        ),
        compiler_params=pltpu.CompilerParams(
            dimension_semantics=("parallel",)),
    )(features, mask, wqkv, wm, w1x, w1a, w2, ln)


# ----------------------------- plain-JAX glue --------------------------------
def position_encoding_sine(d_model, H, W):
    """LoFTR PositionEncodingSine (temp_bug_fix=True) pe of shape [C, H, W]."""
    ones = jnp.ones((H, W), jnp.float32)
    y_pos = jnp.cumsum(ones, axis=0)[None]                  # [1, H, W]
    x_pos = jnp.cumsum(ones, axis=1)[None]                  # [1, H, W]
    div_term = jnp.exp(
        jnp.arange(0, d_model // 2, 2, dtype=jnp.float32)
        * (-math.log(10000.0) / (d_model // 2)))
    div_term = div_term[:, None, None]                      # [C//4, 1, 1]
    pe = jnp.zeros((d_model, H, W), jnp.float32)
    pe = pe.at[0::4].set(jnp.sin(x_pos * div_term))
    pe = pe.at[1::4].set(jnp.cos(x_pos * div_term))
    pe = pe.at[2::4].set(jnp.sin(y_pos * div_term))
    pe = pe.at[3::4].set(jnp.cos(y_pos * div_term))
    return pe


def init_and_pack_params(key, d_model, n_layers, nhead):
    """Deterministic synthetic parameters, packed for the fused kernel."""
    wqkv_l, wm_l, w1x_l, w1a_l, w2_l, ln_l = [], [], [], [], [], []
    for i in range(n_layers):
        ks = jax.random.split(jax.random.fold_in(key, i), 6)
        s1 = 1.0 / math.sqrt(d_model)
        s2 = 1.0 / math.sqrt(2 * d_model)
        wq = jax.random.normal(ks[0], (d_model, d_model), jnp.float32) * s1
        wk = jax.random.normal(ks[1], (d_model, d_model), jnp.float32) * s1
        wv = jax.random.normal(ks[2], (d_model, d_model), jnp.float32) * s1
        wm = jax.random.normal(ks[3], (d_model, d_model), jnp.float32) * s1
        w1 = jax.random.normal(ks[4], (2 * d_model, 2 * d_model), jnp.float32) * s2
        w2 = jax.random.normal(ks[5], (2 * d_model, d_model), jnp.float32) * s2
        g1 = jnp.ones((d_model,), jnp.float32)
        b1 = jnp.zeros((d_model,), jnp.float32)
        g2 = jnp.ones((d_model,), jnp.float32)
        b2 = jnp.zeros((d_model,), jnp.float32)

        wqkv_l.append(jnp.concatenate([wq, wk, wv], axis=1))   # [C, 3C]
        wm_l.append(wm)
        w1x_l.append(w1[:d_model])                             # rows hitting x
        w1a_l.append(w1[d_model:])                             # rows hitting attended
        w2_l.append(w2)
        ln_l.append(jnp.stack([g1, b1, g2, b2]))               # [4, C]

    head_idx = jnp.arange(d_model) // (d_model // nhead)
    head_mask = (head_idx[:, None] == head_idx[None, :]).astype(jnp.float32)

    return (head_mask,
            jnp.stack(wqkv_l), jnp.stack(wm_l),
            jnp.stack(w1x_l), jnp.stack(w1a_l), jnp.stack(w2_l),
            jnp.stack(ln_l))


def msa_forward(x, packed_params):
    """Full MSA forward: x [N, C, H, W] -> [N, C, H, W]."""
    N, C, H, W = x.shape
    pe = position_encoding_sine(C, H, W)
    # x + pe, then rearrange 'n c h w -> n (h w) c'
    x_pos = (x + pe[None]).transpose(0, 2, 3, 1).reshape(N, H * W, C)
    x_pos = msa_stack(x_pos, packed_params)
    # matches torch's x_pos.reshape(x.size()) (raw reshape, no transpose)
    return x_pos.reshape(N, C, H, W)


# ------------------------------------ main ------------------------------------
if __name__ == "__main__":
    key = jax.random.PRNGKey(0)
    N, C, H, W = 2, D_MODEL, 8, 8

    x = jax.random.normal(jax.random.fold_in(key, 123), (N, C, H, W), jnp.float32)
    params = init_and_pack_params(key, D_MODEL, N_LAYERS, NHEAD)

    out = msa_forward(x, params)
    jax.block_until_ready(out)
    assert out.shape == (N, C, H, W)
    assert bool(jnp.all(jnp.isfinite(out)))
    print("KERNEL_OK")
</pallas_src>

<mosaic_0001>
module attributes {stable_mosaic.version = 11 : i64} {
  func.func @msa_stack_kernel(%arg0: i32, %arg1: memref<1x64x32xf32, #tpu.memory_space<vmem>>, %arg2: memref<32x32xf32, #tpu.memory_space<vmem>>, %arg3: memref<2x32x96xf32, #tpu.memory_space<vmem>>, %arg4: memref<2x32x32xf32, #tpu.memory_space<vmem>>, %arg5: memref<2x32x64xf32, #tpu.memory_space<vmem>>, %arg6: memref<2x32x64xf32, #tpu.memory_space<vmem>>, %arg7: memref<2x64x32xf32, #tpu.memory_space<vmem>>, %arg8: memref<2x4x32xf32, #tpu.memory_space<vmem>>, %arg9: memref<1x64x32xf32, #tpu.memory_space<vmem>>) attributes {dimension_semantics = [#tpu.dimension_semantics<parallel>], iteration_bounds = array<i64: 2>, scalar_prefetch = 0 : i64, scratch_operands = 0 : i64, tpu.core_type = #tpu.core_type<tc>, window_params = [{transform_indices = @transform_0, window_bounds = array<i64: 1, 64, 32>}, {pipeline_mode = #tpu.pipeline_mode<synchronous>, transform_indices = @transform_1, window_bounds = array<i64: 32, 32>}, {pipeline_mode = #tpu.pipeline_mode<synchronous>, transform_indices = @transform_2, window_bounds = array<i64: 2, 32, 96>}, {pipeline_mode = #tpu.pipeline_mode<synchronous>, transform_indices = @transform_3, window_bounds = array<i64: 2, 32, 32>}, {pipeline_mode = #tpu.pipeline_mode<synchronous>, transform_indices = @transform_4, window_bounds = array<i64: 2, 32, 64>}, {pipeline_mode = #tpu.pipeline_mode<synchronous>, transform_indices = @transform_5, window_bounds = array<i64: 2, 32, 64>}, {pipeline_mode = #tpu.pipeline_mode<synchronous>, transform_indices = @transform_6, window_bounds = array<i64: 2, 64, 32>}, {pipeline_mode = #tpu.pipeline_mode<synchronous>, transform_indices = @transform_7, window_bounds = array<i64: 2, 4, 32>}, {transform_indices = @transform_8, window_bounds = array<i64: 1, 64, 32>}]} {
    %c0 = arith.constant 0 : index
    %c0_0 = arith.constant 0 : index
    %c0_1 = arith.constant 0 : index
    %0 = vector.load %arg1[%c0, %c0_0, %c0_1] : memref<1x64x32xf32, #tpu.memory_space<vmem>>, vector<1x64x32xf32>
    %1 = vector.shape_cast %0 : vector<1x64x32xf32> to vector<64x32xf32>
    %c0_2 = arith.constant 0 : index
    %c0_3 = arith.constant 0 : index
    %2 = vector.load %arg2[%c0_2, %c0_3] : memref<32x32xf32, #tpu.memory_space<vmem>>, vector<32x32xf32>
    %c0_4 = arith.constant 0 : index
    %c0_5 = arith.constant 0 : index
    %c0_6 = arith.constant 0 : index
    %3 = vector.load %arg3[%c0_4, %c0_5, %c0_6] : memref<2x32x96xf32, #tpu.memory_space<vmem>>, vector<1x32x96xf32>
    %4 = vector.shape_cast %3 : vector<1x32x96xf32> to vector<32x96xf32>
    %cst = arith.constant dense<0.000000e+00> : vector<64x96xf32>
    %5 = tpu.matmul %1, %4, %cst {dimension_numbers = #tpu.dot_dimension_numbers<[1], [0], [0], [1], [0, 0, 1, 1], [], []>} : vector<64x32xf32>, vector<32x96xf32>, vector<64x96xf32> -> vector<64x96xf32>
    %6 = vector.extract_strided_slice %5 {offsets = [0, 0], sizes = [64, 32], strides = [1, 1]} : vector<64x96xf32> to vector<64x32xf32>
    %cst_7 = arith.constant 0.000000e+00 : f32
    %7 = vector.broadcast %cst_7 : f32 to vector<64x32xf32>
    %8 = arith.cmpf ogt, %6, %7 : vector<64x32xf32>
    %cst_8 = arith.constant 1.000000e+00 : f32
    %9 = vector.broadcast %cst_8 : f32 to vector<64x32xf32>
    %10 = arith.addf %6, %9 : vector<64x32xf32>
    %cst_9 = arith.constant 0.000000e+00 : f32
    %11 = vector.broadcast %cst_9 : f32 to vector<64x32xf32>
    %12 = arith.minimumf %6, %11 : vector<64x32xf32>
    %13 = math.exp %12 : vector<64x32xf32>
    %14 = arith.select %8, %10, %13 : vector<64x32xi1>, vector<64x32xf32>
    %15 = vector.extract_strided_slice %5 {offsets = [0, 32], sizes = [64, 32], strides = [1, 1]} : vector<64x96xf32> to vector<64x32xf32>
    %cst_10 = arith.constant 0.000000e+00 : f32
    %16 = vector.broadcast %cst_10 : f32 to vector<64x32xf32>
    %17 = arith.cmpf ogt, %15, %16 : vector<64x32xf32>
    %cst_11 = arith.constant 1.000000e+00 : f32
    %18 = vector.broadcast %cst_11 : f32 to vector<64x32xf32>
    %19 = arith.addf %15, %18 : vector<64x32xf32>
    %cst_12 = arith.constant 0.000000e+00 : f32
    %20 = vector.broadcast %cst_12 : f32 to vector<64x32xf32>
    %21 = arith.minimumf %15, %20 : vector<64x32xf32>
    %22 = math.exp %21 : vector<64x32xf32>
    %23 = arith.select %17, %19, %22 : vector<64x32xi1>, vector<64x32xf32>
    %24 = vector.extract_strided_slice %5 {offsets = [0, 64], sizes = [64, 32], strides = [1, 1]} : vector<64x96xf32> to vector<64x32xf32>
    %cst_13 = arith.constant dense<0.000000e+00> : vector<32x32xf32>
    %25 = tpu.matmul %23, %24, %cst_13 {dimension_numbers = #tpu.dot_dimension_numbers<[0], [0], [1], [1], [0, 1, 1, 1], [], []>} : vector<64x32xf32>, vector<64x32xf32>, vector<32x32xf32> -> vector<32x32xf32>
    %26 = arith.mulf %25, %2 : vector<32x32xf32>
    %cst_14 = arith.constant dense<0.000000e+00> : vector<32xf32>
    %27 = vector.multi_reduction <add>, %23, %cst_14 [0] : vector<64x32xf32> to vector<32xf32>
    %28 = vector.shape_cast %27 : vector<32xf32> to vector<1x32xf32>
    %cst_15 = arith.constant dense<0.000000e+00> : vector<64x32xf32>
    %29 = tpu.matmul %14, %26, %cst_15 {dimension_numbers = #tpu.dot_dimension_numbers<[1], [0], [0], [1], [0, 0, 1, 1], [], []>} : vector<64x32xf32>, vector<32x32xf32>, vector<64x32xf32> -> vector<64x32xf32>
    %30 = vector.broadcast %28 : vector<1x32xf32> to vector<64x32xf32>
    %31 = arith.mulf %14, %30 : vector<64x32xf32>
    %cst_16 = arith.constant dense<0.000000e+00> : vector<64x32xf32>
    %32 = tpu.matmul %31, %2, %cst_16 {dimension_numbers = #tpu.dot_dimension_numbers<[1], [0], [0], [1], [0, 0, 1, 1], [], []>} : vector<64x32xf32>, vector<32x32xf32>, vector<64x32xf32> -> vector<64x32xf32>
    %cst_17 = arith.constant 9.99999997E-7 : f32
    %33 = vector.broadcast %cst_17 : f32 to vector<64x32xf32>
    %34 = arith.addf %32, %33 : vector<64x32xf32>
    %35 = arith.divf %29, %34 : vector<64x32xf32>
    %c0_18 = arith.constant 0 : index
    %c0_19 = arith.constant 0 : index
    %c0_20 = arith.constant 0 : index
    %36 = vector.load %arg4[%c0_18, %c0_19, %c0_20] : memref<2x32x32xf32, #tpu.memory_space<vmem>>, vector<1x32x32xf32>
    %37 = vector.shape_cast %36 : vector<1x32x32xf32> to vector<32x32xf32>
    %cst_21 = arith.constant dense<0.000000e+00> : vector<64x32xf32>
    %38 = tpu.matmul %35, %37, %cst_21 {dimension_numbers = #tpu.dot_dimension_numbers<[1], [0], [0], [1], [0, 0, 1, 1], [], []>} : vector<64x32xf32>, vector<32x32xf32>, vector<64x32xf32> -> vector<64x32xf32>
    %c0_22 = arith.constant 0 : index
    %c0_23 = arith.constant 0 : index
    %c0_24 = arith.constant 0 : index
    %39 = vector.load %arg8[%c0_22, %c0_23, %c0_24] : memref<2x4x32xf32, #tpu.memory_space<vmem>>, vector<1x4x32xf32>
    %40 = vector.shape_cast %39 : vector<1x4x32xf32> to vector<4x32xf32>
    %41 = vector.extract_strided_slice %40 {offsets = [0, 0], sizes = [1, 32], strides = [1, 1]} : vector<4x32xf32> to vector<1x32xf32>
    %42 = vector.extract_strided_slice %40 {offsets = [1, 0], sizes = [1, 32], strides = [1, 1]} : vector<4x32xf32> to vector<1x32xf32>
    %cst_25 = arith.constant dense<0.000000e+00> : vector<64xf32>
    %43 = vector.multi_reduction <add>, %38, %cst_25 [1] : vector<64x32xf32> to vector<64xf32>
    %44 = vector.shape_cast %43 : vector<64xf32> to vector<64x1xf32>
    %cst_26 = arith.constant 3.200000e+01 : f32
    %45 = vector.broadcast %cst_26 : f32 to vector<64x1xf32>
    %46 = arith.divf %44, %45 : vector<64x1xf32>
    %47 = vector.broadcast %46 : vector<64x1xf32> to vector<64x32xf32>
    %48 = arith.subf %38, %47 : vector<64x32xf32>
    %49 = arith.mulf %48, %48 : vector<64x32xf32>
    %cst_27 = arith.constant dense<0.000000e+00> : vector<64xf32>
    %50 = vector.multi_reduction <add>, %49, %cst_27 [1] : vector<64x32xf32> to vector<64xf32>
    %51 = vector.shape_cast %50 : vector<64xf32> to vector<64x1xf32>
    %cst_28 = arith.constant 3.200000e+01 : f32
    %52 = vector.broadcast %cst_28 : f32 to vector<64x1xf32>
    %53 = arith.divf %51, %52 : vector<64x1xf32>
    %54 = vector.broadcast %46 : vector<64x1xf32> to vector<64x32xf32>
    %55 = arith.subf %38, %54 : vector<64x32xf32>
    %cst_29 = arith.constant 9.99999974E-6 : f32
    %56 = vector.broadcast %cst_29 : f32 to vector<64x1xf32>
    %57 = arith.addf %53, %56 : vector<64x1xf32>
    %58 = math.rsqrt %57 : vector<64x1xf32>
    %59 = vector.broadcast %58 : vector<64x1xf32> to vector<64x32xf32>
    %60 = arith.mulf %55, %59 : vector<64x32xf32>
    %61 = vector.broadcast %41 : vector<1x32xf32> to vector<64x32xf32>
    %62 = arith.mulf %60, %61 : vector<64x32xf32>
    %63 = vector.broadcast %42 : vector<1x32xf32> to vector<64x32xf32>
    %64 = arith.addf %62, %63 : vector<64x32xf32>
    %c0_30 = arith.constant 0 : index
    %c0_31 = arith.constant 0 : index
    %c0_32 = arith.constant 0 : index
    %65 = vector.load %arg5[%c0_30, %c0_31, %c0_32] : memref<2x32x64xf32, #tpu.memory_space<vmem>>, vector<1x32x64xf32>
    %66 = vector.shape_cast %65 : vector<1x32x64xf32> to vector<32x64xf32>
    %cst_33 = arith.constant dense<0.000000e+00> : vector<64x64xf32>
    %67 = tpu.matmul %1, %66, %cst_33 {dimension_numbers = #tpu.dot_dimension_numbers<[1], [0], [0], [1], [0, 0, 1, 1], [], []>} : vector<64x32xf32>, vector<32x64xf32>, vector<64x64xf32> -> vector<64x64xf32>
    %c0_34 = arith.constant 0 : index
    %c0_35 = arith.constant 0 : index
    %c0_36 = arith.constant 0 : index
    %68 = vector.load %arg6[%c0_34, %c0_35, %c0_36] : memref<2x32x64xf32, #tpu.memory_space<vmem>>, vector<1x32x64xf32>
    %69 = vector.shape_cast %68 : vector<1x32x64xf32> to vector<32x64xf32>
    %cst_37 = arith.constant dense<0.000000e+00> : vector<64x64xf32>
    %70 = tpu.matmul %64, %69, %cst_37 {dimension_numbers = #tpu.dot_dimension_numbers<[1], [0], [0], [1], [0, 0, 1, 1], [], []>} : vector<64x32xf32>, vector<32x64xf32>, vector<64x64xf32> -> vector<64x64xf32>
    %71 = arith.addf %67, %70 : vector<64x64xf32>
    %cst_38 = arith.constant 0.000000e+00 : f32
    %72 = vector.broadcast %cst_38 : f32 to vector<64x64xf32>
    %73 = arith.maximumf %71, %72 : vector<64x64xf32>
    %c0_39 = arith.constant 0 : index
    %c0_40 = arith.constant 0 : index
    %c0_41 = arith.constant 0 : index
    %74 = vector.load %arg7[%c0_39, %c0_40, %c0_41] : memref<2x64x32xf32, #tpu.memory_space<vmem>>, vector<1x64x32xf32>
    %75 = vector.shape_cast %74 : vector<1x64x32xf32> to vector<64x32xf32>
    %cst_42 = arith.constant dense<0.000000e+00> : vector<64x32xf32>
    %76 = tpu.matmul %73, %75, %cst_42 {dimension_numbers = #tpu.dot_dimension_numbers<[1], [0], [0], [1], [0, 0, 1, 1], [], []>} : vector<64x64xf32>, vector<64x32xf32>, vector<64x32xf32> -> vector<64x32xf32>
    %77 = vector.extract_strided_slice %40 {offsets = [2, 0], sizes = [1, 32], strides = [1, 1]} : vector<4x32xf32> to vector<1x32xf32>
    %78 = vector.extract_strided_slice %40 {offsets = [3, 0], sizes = [1, 32], strides = [1, 1]} : vector<4x32xf32> to vector<1x32xf32>
    %cst_43 = arith.constant dense<0.000000e+00> : vector<64xf32>
    %79 = vector.multi_reduction <add>, %76, %cst_43 [1] : vector<64x32xf32> to vector<64xf32>
    %80 = vector.shape_cast %79 : vector<64xf32> to vector<64x1xf32>
    %cst_44 = arith.constant 3.200000e+01 : f32
    %81 = vector.broadcast %cst_44 : f32 to vector<64x1xf32>
    %82 = arith.divf %80, %81 : vector<64x1xf32>
    %83 = vector.broadcast %82 : vector<64x1xf32> to vector<64x32xf32>
    %84 = arith.subf %76, %83 : vector<64x32xf32>
    %85 = arith.mulf %84, %84 : vector<64x32xf32>
    %cst_45 = arith.constant dense<0.000000e+00> : vector<64xf32>
    %86 = vector.multi_reduction <add>, %85, %cst_45 [1] : vector<64x32xf32> to vector<64xf32>
    %87 = vector.shape_cast %86 : vector<64xf32> to vector<64x1xf32>
    %cst_46 = arith.constant 3.200000e+01 : f32
    %88 = vector.broadcast %cst_46 : f32 to vector<64x1xf32>
    %89 = arith.divf %87, %88 : vector<64x1xf32>
    %90 = vector.broadcast %82 : vector<64x1xf32> to vector<64x32xf32>
    %91 = arith.subf %76, %90 : vector<64x32xf32>
    %cst_47 = arith.constant 9.99999974E-6 : f32
    %92 = vector.broadcast %cst_47 : f32 to vector<64x1xf32>
    %93 = arith.addf %89, %92 : vector<64x1xf32>
    %94 = math.rsqrt %93 : vector<64x1xf32>
    %95 = vector.broadcast %94 : vector<64x1xf32> to vector<64x32xf32>
    %96 = arith.mulf %91, %95 : vector<64x32xf32>
    %97 = vector.broadcast %77 : vector<1x32xf32> to vector<64x32xf32>
    %98 = arith.mulf %96, %97 : vector<64x32xf32>
    %99 = vector.broadcast %78 : vector<1x32xf32> to vector<64x32xf32>
    %100 = arith.addf %98, %99 : vector<64x32xf32>
    %101 = arith.addf %1, %100 : vector<64x32xf32>
    %c1 = arith.constant 1 : index
    %c0_48 = arith.constant 0 : index
    %c0_49 = arith.constant 0 : index
    %102 = vector.load %arg3[%c1, %c0_48, %c0_49] : memref<2x32x96xf32, #tpu.memory_space<vmem>>, vector<1x32x96xf32>
    %103 = vector.shape_cast %102 : vector<1x32x96xf32> to vector<32x96xf32>
    %cst_50 = arith.constant dense<0.000000e+00> : vector<64x96xf32>
    %104 = tpu.matmul %101, %103, %cst_50 {dimension_numbers = #tpu.dot_dimension_numbers<[1], [0], [0], [1], [0, 0, 1, 1], [], []>} : vector<64x32xf32>, vector<32x96xf32>, vector<64x96xf32> -> vector<64x96xf32>
    %105 = vector.extract_strided_slice %104 {offsets = [0, 0], sizes = [64, 32], strides = [1, 1]} : vector<64x96xf32> to vector<64x32xf32>
    %cst_51 = arith.constant 0.000000e+00 : f32
    %106 = vector.broadcast %cst_51 : f32 to vector<64x32xf32>
    %107 = arith.cmpf ogt, %105, %106 : vector<64x32xf32>
    %cst_52 = arith.constant 1.000000e+00 : f32
    %108 = vector.broadcast %cst_52 : f32 to vector<64x32xf32>
    %109 = arith.addf %105, %108 : vector<64x32xf32>
    %cst_53 = arith.constant 0.000000e+00 : f32
    %110 = vector.broadcast %cst_53 : f32 to vector<64x32xf32>
    %111 = arith.minimumf %105, %110 : vector<64x32xf32>
    %112 = math.exp %111 : vector<64x32xf32>
    %113 = arith.select %107, %109, %112 : vector<64x32xi1>, vector<64x32xf32>
    %114 = vector.extract_strided_slice %104 {offsets = [0, 32], sizes = [64, 32], strides = [1, 1]} : vector<64x96xf32> to vector<64x32xf32>
    %cst_54 = arith.constant 0.000000e+00 : f32
    %115 = vector.broadcast %cst_54 : f32 to vector<64x32xf32>
    %116 = arith.cmpf ogt, %114, %115 : vector<64x32xf32>
    %cst_55 = arith.constant 1.000000e+00 : f32
    %117 = vector.broadcast %cst_55 : f32 to vector<64x32xf32>
    %118 = arith.addf %114, %117 : vector<64x32xf32>
    %cst_56 = arith.constant 0.000000e+00 : f32
    %119 = vector.broadcast %cst_56 : f32 to vector<64x32xf32>
    %120 = arith.minimumf %114, %119 : vector<64x32xf32>
    %121 = math.exp %120 : vector<64x32xf32>
    %122 = arith.select %116, %118, %121 : vector<64x32xi1>, vector<64x32xf32>
    %123 = vector.extract_strided_slice %104 {offsets = [0, 64], sizes = [64, 32], strides = [1, 1]} : vector<64x96xf32> to vector<64x32xf32>
    %cst_57 = arith.constant dense<0.000000e+00> : vector<32x32xf32>
    %124 = tpu.matmul %122, %123, %cst_57 {dimension_numbers = #tpu.dot_dimension_numbers<[0], [0], [1], [1], [0, 1, 1, 1], [], []>} : vector<64x32xf32>, vector<64x32xf32>, vector<32x32xf32> -> vector<32x32xf32>
    %125 = arith.mulf %124, %2 : vector<32x32xf32>
    %cst_58 = arith.constant dense<0.000000e+00> : vector<32xf32>
    %126 = vector.multi_reduction <add>, %122, %cst_58 [0] : vector<64x32xf32> to vector<32xf32>
    %127 = vector.shape_cast %126 : vector<32xf32> to vector<1x32xf32>
    %cst_59 = arith.constant dense<0.000000e+00> : vector<64x32xf32>
    %128 = tpu.matmul %113, %125, %cst_59 {dimension_numbers = #tpu.dot_dimension_numbers<[1], [0], [0], [1], [0, 0, 1, 1], [], []>} : vector<64x32xf32>, vector<32x32xf32>, vector<64x32xf32> -> vector<64x32xf32>
    %129 = vector.broadcast %127 : vector<1x32xf32> to vector<64x32xf32>
    %130 = arith.mulf %113, %129 : vector<64x32xf32>
    %cst_60 = arith.constant dense<0.000000e+00> : vector<64x32xf32>
    %131 = tpu.matmul %130, %2, %cst_60 {dimension_numbers = #tpu.dot_dimension_numbers<[1], [0], [0], [1], [0, 0, 1, 1], [], []>} : vector<64x32xf32>, vector<32x32xf32>, vector<64x32xf32> -> vector<64x32xf32>
    %cst_61 = arith.constant 9.99999997E-7 : f32
    %132 = vector.broadcast %cst_61 : f32 to vector<64x32xf32>
    %133 = arith.addf %131, %132 : vector<64x32xf32>
    %134 = arith.divf %128, %133 : vector<64x32xf32>
    %c1_62 = arith.constant 1 : index
    %c0_63 = arith.constant 0 : index
    %c0_64 = arith.constant 0 : index
    %135 = vector.load %arg4[%c1_62, %c0_63, %c0_64] : memref<2x32x32xf32, #tpu.memory_space<vmem>>, vector<1x32x32xf32>
    %136 = vector.shape_cast %135 : vector<1x32x32xf32> to vector<32x32xf32>
    %cst_65 = arith.constant dense<0.000000e+00> : vector<64x32xf32>
    %137 = tpu.matmul %134, %136, %cst_65 {dimension_numbers = #tpu.dot_dimension_numbers<[1], [0], [0], [1], [0, 0, 1, 1], [], []>} : vector<64x32xf32>, vector<32x32xf32>, vector<64x32xf32> -> vector<64x32xf32>
    %c1_66 = arith.constant 1 : index
    %c0_67 = arith.constant 0 : index
    %c0_68 = arith.constant 0 : index
    %138 = vector.load %arg8[%c1_66, %c0_67, %c0_68] : memref<2x4x32xf32, #tpu.memory_space<vmem>>, vector<1x4x32xf32>
    %139 = vector.shape_cast %138 : vector<1x4x32xf32> to vector<4x32xf32>
    %140 = vector.extract_strided_slice %139 {offsets = [0, 0], sizes = [1, 32], strides = [1, 1]} : vector<4x32xf32> to vector<1x32xf32>
    %141 = vector.extract_strided_slice %139 {offsets = [1, 0], sizes = [1, 32], strides = [1, 1]} : vector<4x32xf32> to vector<1x32xf32>
    %cst_69 = arith.constant dense<0.000000e+00> : vector<64xf32>
    %142 = vector.multi_reduction <add>, %137, %cst_69 [1] : vector<64x32xf32> to vector<64xf32>
    %143 = vector.shape_cast %142 : vector<64xf32> to vector<64x1xf32>
    %cst_70 = arith.constant 3.200000e+01 : f32
    %144 = vector.broadcast %cst_70 : f32 to vector<64x1xf32>
    %145 = arith.divf %143, %144 : vector<64x1xf32>
    %146 = vector.broadcast %145 : vector<64x1xf32> to vector<64x32xf32>
    %147 = arith.subf %137, %146 : vector<64x32xf32>
    %148 = arith.mulf %147, %147 : vector<64x32xf32>
    %cst_71 = arith.constant dense<0.000000e+00> : vector<64xf32>
    %149 = vector.multi_reduction <add>, %148, %cst_71 [1] : vector<64x32xf32> to vector<64xf32>
    %150 = vector.shape_cast %149 : vector<64xf32> to vector<64x1xf32>
    %cst_72 = arith.constant 3.200000e+01 : f32
    %151 = vector.broadcast %cst_72 : f32 to vector<64x1xf32>
    %152 = arith.divf %150, %151 : vector<64x1xf32>
    %153 = vector.broadcast %145 : vector<64x1xf32> to vector<64x32xf32>
    %154 = arith.subf %137, %153 : vector<64x32xf32>
    %cst_73 = arith.constant 9.99999974E-6 : f32
    %155 = vector.broadcast %cst_73 : f32 to vector<64x1xf32>
    %156 = arith.addf %152, %155 : vector<64x1xf32>
    %157 = math.rsqrt %156 : vector<64x1xf32>
    %158 = vector.broadcast %157 : vector<64x1xf32> to vector<64x32xf32>
    %159 = arith.mulf %154, %158 : vector<64x32xf32>
    %160 = vector.broadcast %140 : vector<1x32xf32> to vector<64x32xf32>
    %161 = arith.mulf %159, %160 : vector<64x32xf32>
    %162 = vector.broadcast %141 : vector<1x32xf32> to vector<64x32xf32>
    %163 = arith.addf %161, %162 : vector<64x32xf32>
    %c1_74 = arith.constant 1 : index
    %c0_75 = arith.constant 0 : index
    %c0_76 = arith.constant 0 : index
    %164 = vector.load %arg5[%c1_74, %c0_75, %c0_76] : memref<2x32x64xf32, #tpu.memory_space<vmem>>, vector<1x32x64xf32>
    %165 = vector.shape_cast %164 : vector<1x32x64xf32> to vector<32x64xf32>
    %cst_77 = arith.constant dense<0.000000e+00> : vector<64x64xf32>
    %166 = tpu.matmul %101, %165, %cst_77 {dimension_numbers = #tpu.dot_dimension_numbers<[1], [0], [0], [1], [0, 0, 1, 1], [], []>} : vector<64x32xf32>, vector<32x64xf32>, vector<64x64xf32> -> vector<64x64xf32>
    %c1_78 = arith.constant 1 : index
    %c0_79 = arith.constant 0 : index
    %c0_80 = arith.constant 0 : index
    %167 = vector.load %arg6[%c1_78, %c0_79, %c0_80] : memref<2x32x64xf32, #tpu.memory_space<vmem>>, vector<1x32x64xf32>
    %168 = vector.shape_cast %167 : vector<1x32x64xf32> to vector<32x64xf32>
    %cst_81 = arith.constant dense<0.000000e+00> : vector<64x64xf32>
    %169 = tpu.matmul %163, %168, %cst_81 {dimension_numbers = #tpu.dot_dimension_numbers<[1], [0], [0], [1], [0, 0, 1, 1], [], []>} : vector<64x32xf32>, vector<32x64xf32>, vector<64x64xf32> -> vector<64x64xf32>
    %170 = arith.addf %166, %169 : vector<64x64xf32>
    %cst_82 = arith.constant 0.000000e+00 : f32
    %171 = vector.broadcast %cst_82 : f32 to vector<64x64xf32>
    %172 = arith.maximumf %170, %171 : vector<64x64xf32>
    %c1_83 = arith.constant 1 : index
    %c0_84 = arith.constant 0 : index
    %c0_85 = arith.constant 0 : index
    %173 = vector.load %arg7[%c1_83, %c0_84, %c0_85] : memref<2x64x32xf32, #tpu.memory_space<vmem>>, vector<1x64x32xf32>
    %174 = vector.shape_cast %173 : vector<1x64x32xf32> to vector<64x32xf32>
    %cst_86 = arith.constant dense<0.000000e+00> : vector<64x32xf32>
    %175 = tpu.matmul %172, %174, %cst_86 {dimension_numbers = #tpu.dot_dimension_numbers<[1], [0], [0], [1], [0, 0, 1, 1], [], []>} : vector<64x64xf32>, vector<64x32xf32>, vector<64x32xf32> -> vector<64x32xf32>
    %176 = vector.extract_strided_slice %139 {offsets = [2, 0], sizes = [1, 32], strides = [1, 1]} : vector<4x32xf32> to vector<1x32xf32>
    %177 = vector.extract_strided_slice %139 {offsets = [3, 0], sizes = [1, 32], strides = [1, 1]} : vector<4x32xf32> to vector<1x32xf32>
    %cst_87 = arith.constant dense<0.000000e+00> : vector<64xf32>
    %178 = vector.multi_reduction <add>, %175, %cst_87 [1] : vector<64x32xf32> to vector<64xf32>
    %179 = vector.shape_cast %178 : vector<64xf32> to vector<64x1xf32>
    %cst_88 = arith.constant 3.200000e+01 : f32
    %180 = vector.broadcast %cst_88 : f32 to vector<64x1xf32>
    %181 = arith.divf %179, %180 : vector<64x1xf32>
    %182 = vector.broadcast %181 : vector<64x1xf32> to vector<64x32xf32>
    %183 = arith.subf %175, %182 : vector<64x32xf32>
    %184 = arith.mulf %183, %183 : vector<64x32xf32>
    %cst_89 = arith.constant dense<0.000000e+00> : vector<64xf32>
    %185 = vector.multi_reduction <add>, %184, %cst_89 [1] : vector<64x32xf32> to vector<64xf32>
    %186 = vector.shape_cast %185 : vector<64xf32> to vector<64x1xf32>
    %cst_90 = arith.constant 3.200000e+01 : f32
    %187 = vector.broadcast %cst_90 : f32 to vector<64x1xf32>
    %188 = arith.divf %186, %187 : vector<64x1xf32>
    %189 = vector.broadcast %181 : vector<64x1xf32> to vector<64x32xf32>
    %190 = arith.subf %175, %189 : vector<64x32xf32>
    %cst_91 = arith.constant 9.99999974E-6 : f32
    %191 = vector.broadcast %cst_91 : f32 to vector<64x1xf32>
    %192 = arith.addf %188, %191 : vector<64x1xf32>
    %193 = math.rsqrt %192 : vector<64x1xf32>
    %194 = vector.broadcast %193 : vector<64x1xf32> to vector<64x32xf32>
    %195 = arith.mulf %190, %194 : vector<64x32xf32>
    %196 = vector.broadcast %176 : vector<1x32xf32> to vector<64x32xf32>
    %197 = arith.mulf %195, %196 : vector<64x32xf32>
    %198 = vector.broadcast %177 : vector<1x32xf32> to vector<64x32xf32>
    %199 = arith.addf %197, %198 : vector<64x32xf32>
    %200 = arith.addf %101, %199 : vector<64x32xf32>
    %c0_92 = arith.constant 0 : index
    %c0_93 = arith.constant 0 : index
    %c0_94 = arith.constant 0 : index
    %201 = vector.load %arg9[%c0_92, %c0_93, %c0_94] : memref<1x64x32xf32, #tpu.memory_space<vmem>>, vector<1x64x32xf32>
    %202 = vector.shape_cast %201 : vector<1x64x32xf32> to vector<64x32xf32>
    %203 = vector.shape_cast %200 : vector<64x32xf32> to vector<1x64x32xf32>
    tpu.vector_store %arg9[%c0_92, %c0_93, %c0_94], %203 {strides = array<i32>} : memref<1x64x32xf32, #tpu.memory_space<vmem>>, vector<1x64x32xf32>,
    return
  }
  func.func @transform_0(%arg0: i32) -> (i32, i32, i32) {
    %c0_i32 = arith.constant 0 : i32
    %c0_i32_0 = arith.constant 0 : i32
    %c0_i32_1 = arith.constant 0 : i32
    return %arg0, %c0_i32, %c0_i32_0 : i32, i32, i32
  }
  func.func @transform_1(%arg0: i32) -> (i32, i32) {
    %c0_i32 = arith.constant 0 : i32
    %c0_i32_0 = arith.constant 0 : i32
    %c0_i32_1 = arith.constant 0 : i32
    return %c0_i32, %c0_i32_0 : i32, i32
  }
  func.func @transform_2(%arg0: i32) -> (i32, i32, i32) {
    %c0_i32 = arith.constant 0 : i32
    %c0_i32_0 = arith.constant 0 : i32
    %c0_i32_1 = arith.constant 0 : i32
    %c0_i32_2 = arith.constant 0 : i32
    return %c0_i32, %c0_i32_0, %c0_i32_1 : i32, i32, i32
  }
  func.func @transform_3(%arg0: i32) -> (i32, i32, i32) {
    %c0_i32 = arith.constant 0 : i32
    %c0_i32_0 = arith.constant 0 : i32
    %c0_i32_1 = arith.constant 0 : i32
    %c0_i32_2 = arith.constant 0 : i32
    return %c0_i32, %c0_i32_0, %c0_i32_1 : i32, i32, i32
  }
  func.func @transform_4(%arg0: i32) -> (i32, i32, i32) {
    %c0_i32 = arith.constant 0 : i32
    %c0_i32_0 = arith.constant 0 : i32
    %c0_i32_1 = arith.constant 0 : i32
    %c0_i32_2 = arith.constant 0 : i32
    return %c0_i32, %c0_i32_0, %c0_i32_1 : i32, i32, i32
  }
  func.func @transform_5(%arg0: i32) -> (i32, i32, i32) {
    %c0_i32 = arith.constant 0 : i32
    %c0_i32_0 = arith.constant 0 : i32
    %c0_i32_1 = arith.constant 0 : i32
    %c0_i32_2 = arith.constant 0 : i32
    return %c0_i32, %c0_i32_0, %c0_i32_1 : i32, i32, i32
  }
  func.func @transform_6(%arg0: i32) -> (i32, i32, i32) {
    %c0_i32 = arith.constant 0 : i32
    %c0_i32_0 = arith.constant 0 : i32
    %c0_i32_1 = arith.constant 0 : i32
    %c0_i32_2 = arith.constant 0 : i32
    return %c0_i32, %c0_i32_0, %c0_i32_1 : i32, i32, i32
  }
  func.func @transform_7(%arg0: i32) -> (i32, i32, i32) {
    %c0_i32 = arith.constant 0 : i32
    %c0_i32_0 = arith.constant 0 : i32
    %c0_i32_1 = arith.constant 0 : i32
    %c0_i32_2 = arith.constant 0 : i32
    return %c0_i32, %c0_i32_0, %c0_i32_1 : i32, i32, i32
  }
  func.func @transform_8(%arg0: i32) -> (i32, i32, i32) {
    %c0_i32 = arith.constant 0 : i32
    %c0_i32_0 = arith.constant 0 : i32
    %c0_i32_1 = arith.constant 0 : i32
    return %arg0, %c0_i32, %c0_i32_0 : i32, i32, i32
  }
}

</mosaic_0001>

<bundles_post_ra>
// kernel: tpu_custom_call.1
= control target key start
LH: loop header
LB: loop body
LE: loop exit
PB: predicated region body
PF: predicated region fallthrough
CT: control target
= control target key end

     0   :  { %s3201_s27 = smov 0   ;;  %s4311_s0 = inlined_call_operand.vmem [shape: f32[2,64,32], index: 0, kind: input, shape index: {}]   ;;  %s4312_s1 = inlined_call_operand.vmem [shape: f32[32,32], index: 1, kind: input, shape index: {}]   ;;  %s4313_s2 = inlined_call_operand.vmem [shape: f32[2,32,96], index: 2, kind: input, shape index: {}]   ;;  %s4314_s3 = inlined_call_operand.vmem [shape: f32[2,32,32], index: 3, kind: input, shape index: {}]   ;;  %s4315_s4 = inlined_call_operand.vmem [shape: f32[2,32,64], index: 4, kind: input, shape index: {}]   ;;  %s4316_s5 = inlined_call_operand.vmem [shape: f32[2,32,64], index: 5, kind: input, shape index: {}]   ;;  %s4317_s6 = inlined_call_operand.vmem [shape: f32[2,64,32], index: 6, kind: input, shape index: {}]   ;;  %s4318_s7 = inlined_call_operand.vmem [shape: f32[2,4,32], index: 7, kind: input, shape index: {}]   ;;  %s4319_s8 = inlined_call_operand.vmem [shape: f32[2,64,32], index: 8, kind: output, shape index: {}]  }
   0x1 LB: > { %s2785_s28 = sadd.s32 4294967295, %s3151_s27   ;;  %p2789_p0 = scmp.ge.s32.totalorder %s3151_s27, 1  ;;  %s3151_s27 = sphi %s3201_s27, %s18_s27  }
   0x2   : > { %p262_p1 = scmp.lt.s32.totalorder %s3151_s27, 3 }
   0x4   : > { %p263_p2 = pnand %p2789_p0, %p262_p1 }
   0x5   : > { %p296_p3 = scmp.lt.s32.totalorder (!%p263_p2), %s2785_s28, 1  ;;  %s3153_s19 = smov (!%p263_p2), 96  }
   0x6   : > { %266 = sbr.rel (%p263_p2) target bundleno = 3373 (0xd2d), region = 52  ;;  %s3154_s20 = smov (!%p263_p2), 64  }
   0xb   : > { %v321_v0 = vld [vmem:[%s4313_s2 + $0x18] sm:$0xff]  ;;  %v320_v1 = vld [vmem:[%s4313_s2 + $0x10] sm:$0xff]  ;;  %v319_v2 = vld [vmem:[%s4313_s2 + $0x8] sm:$0xff]  ;;  %s4321_s28 = smov (!%p296_p3, %s2785_s28), 1  ;;  %vm322_vm0 = vcmask 261120   ;;  %vm578_vm7 = vcmask 523520  }
   0xc   : > { %359 = vmatpush.msra.mxu0 %v321_v0  ;;  %v318_v3 = vld [vmem:[%s4313_s2] sm:$0xff]  ;;  %s2941_s15 = sshll.u32 %s4321_s28, 6  ;;  %vm532_vm10 = vcmask 523264  }
   0xd   : > { %s3229_s18 = scalar_lea.vmem %s4311_s0, %s2941_s15  ;;  %s4257_s26 = scalar_lea.vmem %s4319_s8, %s2941_s15 }
   0xe   : > { %360 = vmatpush.msra.mxu0 %v320_v1  ;;  %v3232_v4 = vld [vmem:[%s3229_s18] sm:$0xff]  ;;  %v3237_v5 = vld [vmem:[%s3229_s18 + $0x8] sm:$0xff]  ;;  %v3242_v6 = vld [vmem:[%s3229_s18 + $0x10] sm:$0xff] }
   0xf   : > { %v3247_v7 = vld [vmem:[%s3229_s18 + $0x18] sm:$0xff]  ;;  %v3252_v8 = vld [vmem:[%s3229_s18 + $0x20] sm:$0xff]  ;;  %v311_v9 = vld [vmem:[%s3229_s18 + $0x28] sm:$0xff] }
  0x10   : > { %361 = vmatpush.msra.mxu0 %v319_v2  ;;  %v312_v10 = vld [vmem:[%s3229_s18 + $0x30] sm:$0xff]  ;;  %v313_v11 = vld [vmem:[%s3229_s18 + $0x38] sm:$0xff] }
  0x12   : > { %362 = vmatpush.msra.mxu0 %v318_v3 }
  0x13   : > { %2794 = vmatmul.msk.f32.vlgmr.msra.gmra.mxu0 %vm322_vm0, %v3232_v4 }
  0x1b   : > { %2795 = vmatmul.msk.f32.gmra.mxu0 %vm322_vm0, %v3237_v5 }
  0x23   : > { %2796 = vmatmul.msk.f32.gmra.mxu0 %vm322_vm0, %v3242_v6 }
  0x2b   : > { %2797 = vmatmul.msk.f32.gmra.mxu0 %vm322_vm0, %v3247_v7 }
  0x33   : > { %2798 = vmatmul.msk.f32.gmra.mxu0 %vm322_vm0, %v3252_v8 }
  0x3b   : > { %2799 = vmatmul.msk.f32.gmra.mxu0 %vm322_vm0, %v311_v9 }
  0x43   : > { %2800 = vmatmul.msk.f32.gmra.mxu0 %vm322_vm0, %v312_v10 }
  0x4b   : > { %2801 = vmatmul.msk.f32.gmra.mxu0 %vm322_vm0, %v313_v11 }
  0x90   : > { %v3262_v12 = vpop.f32.mrf.mxu0 }
  0x91   : > { %v404_v13 = vmin.f32 %v3262_v12, 0.0  ;;  %v396_v17 = vadd.f32 1.0, %v3262_v12  ;;  %vm388_vm1 = vcmp.gt.f32.partialorder %v3262_v12, 0.0 }
  0x93   : > { %v412_v14 = vmul.f32 1.442695, %v404_v13 }
  0x95   : > { %3003 = vpow2.f32 %v412_v14 }
  0x98   : > { %v3265_v15 = vpop.f32.mrf.mxu0 }
  0x99   : > { %v405_v16 = vmin.f32 %v3265_v15, 0.0  ;;  %v397_v23 = vadd.f32 1.0, %v3265_v15  ;;  %vm389_vm2 = vcmp.gt.f32.partialorder %v3265_v15, 0.0 }
  0x9b   : > { %v3004_v18 = vpop.eup %3003  ;;  %v414_v19 = vmul.f32 1.442695, %v405_v16  ;;  %v2978_v16 = vpack.i.bf16 %v3262_v12, %v3265_v15 }
  0x9c   : > { %v3270_v20 = vsel %vm388_vm1, %v396_v17, %v3004_v18 }
  0x9d   : > { %3005 = vpow2.f32 %v414_v19  ;;  %444 = vrot.lane.b32.xlu0 %v3270_v20, %s3153_s19  ;;  %v579_v53 = vsel %vm578_vm7, %v3270_v20, 0.0 }
  0xa0   : > { %v3274_v21 = vpop.f32.mrf.mxu0 }
  0xa1   : > { %v406_v22 = vmin.f32 %v3274_v21, 0.0  ;;  %v398_v29 = vadd.f32 1.0, %v3274_v21  ;;  %vm390_vm3 = vcmp.gt.f32.partialorder %v3274_v21, 0.0 }
  0xa3   : > { %v3006_v24 = vpop.eup %3005  ;;  %v416_v25 = vmul.f32 1.442695, %v406_v22 }
  0xa4   : > { %v3279_v26 = vsel %vm389_vm2, %v397_v23, %v3006_v24 }
  0xa5   : > { %3007 = vpow2.f32 %v416_v25  ;;  %446 = vrot.lane.b32.xlu0 %v3279_v26, %s3153_s19  ;;  %v580_v51 = vsel %vm578_vm7, %v3279_v26, 0.0 }
  0xa6   : > { %v581_v56 = vadd.f32 %v580_v51, %v579_v53 }
  0xa8   : > { %v3283_v27 = vpop.f32.mrf.mxu0 }
  0xa9   : > { %v407_v28 = vmin.f32 %v3283_v27, 0.0  ;;  %v399_v35 = vadd.f32 1.0, %v3283_v27  ;;  %vm391_vm4 = vcmp.gt.f32.partialorder %v3283_v27, 0.0  ;;  %v2973_v12 = vpack.i.bf16 %v3274_v21, %v3283_v27 }
  0xab   : > { %v3008_v30 = vpop.eup %3007  ;;  %v418_v31 = vmul.f32 1.442695, %v407_v28 }
  0xac   : > { %v3288_v32 = vsel %vm390_vm3, %v398_v29, %v3008_v30 }
  0xad   : > { %3009 = vpow2.f32 %v418_v31  ;;  %448 = vrot.lane.b32.xlu1 %v3288_v32, %s3153_s19  ;;  %v582_v54 = vsel %vm578_vm7, %v3288_v32, 0.0 }
  0xae   : > { %v583_v62 = vadd.f32 %v582_v54, %v581_v56 }
  0xb0   : > { %v376_v33 = vpop.f32.mrf.mxu0 }
  0xb1   : > { %v408_v34 = vmin.f32 %v376_v33, 0.0  ;;  %v400_v41 = vadd.f32 1.0, %v376_v33  ;;  %vm392_vm5 = vcmp.gt.f32.partialorder %v376_v33, 0.0 }
  0xb3   : > { %v3010_v36 = vpop.eup %3009  ;;  %v420_v37 = vmul.f32 1.442695, %v408_v34 }
  0xb4   : > { %v3294_v38 = vsel %vm391_vm4, %v399_v35, %v3010_v36 }
  0xb5   : > { %3011 = vpow2.f32 %v420_v37  ;;  %450 = vrot.lane.b32.xlu1 %v3294_v38, %s3153_s19  ;;  %v584_v59 = vsel %vm578_vm7, %v3294_v38, 0.0 }
  0xb6   : > { %v585_v1 = vadd.f32 %v584_v59, %v583_v62 }
  0xb8   : > { %v379_v39 = vpop.f32.mrf.mxu0 }
  0xb9   : > { %v409_v40 = vmin.f32 %v379_v39, 0.0  ;;  %v401_v47 = vadd.f32 1.0, %v379_v39  ;;  %vm393_vm6 = vcmp.gt.f32.partialorder %v379_v39, 0.0  ;;  %v2968_v14 = vpack.i.bf16 %v376_v33, %v379_v39  ;;  %v3342_v39 = vld [vmem:[%s4312_s1 + $0x18] sm:$0xff] }
  0xba   : > { %2947 = vmatpush.msra.mxu3 %v3342_v39 }
  0xbb   : > { %v3012_v42 = vpop.eup %3011  ;;  %v422_v43 = vmul.f32 1.442695, %v409_v40  ;;  %v3348_v40 = vld [vmem:[%s4312_s1 + $0x10] sm:$0xff] }
  0xbc   : > { %v3298_v44 = vsel %vm392_vm5, %v400_v41, %v3012_v42  ;;  %2948 = vmatpush.msra.mxu3 %v3348_v40  ;;  %v3354_v41 = vld [vmem:[%s4312_s1 + $0x8] sm:$0xff]  ;;  %v3360_v42 = vld [vmem:[%s4312_s1] sm:$0xff] }
  0xbd   : > { %3013 = vpow2.f32 %v422_v43  ;;  %452 = vrot.lane.b32.xlu2 %v3298_v44, %s3153_s19  ;;  %v586_v0 = vsel %vm578_vm7, %v3298_v44, 0.0 }
  0xbe   : > { %v587_v3 = vadd.f32 %v586_v0, %v585_v1  ;;  %2949 = vmatpush.msra.mxu3 %v3354_v41 }
  0xc0   : > { %v382_v45 = vpop.f32.mrf.mxu0  ;;  %2950 = vmatpush.msra.mxu3 %v3360_v42 }
  0xc1   : > { %v410_v46 = vmin.f32 %v382_v45, 0.0  ;;  %v402_v57 = vadd.f32 1.0, %v382_v45  ;;  %vm394_vm8 = vcmp.gt.f32.partialorder %v382_v45, 0.0 }
  0xc3   : > { %v3014_v48 = vpop.eup %3013  ;;  %v424_v49 = vmul.f32 1.442695, %v410_v46 }
  0xc4   : > { %v3302_v50 = vsel %vm393_vm6, %v401_v47, %v3014_v48 }
  0xc5   : > { %3015 = vpow2.f32 %v424_v49  ;;  %454 = vrot.lane.b32.xlu2 %v3302_v50, %s3153_s19  ;;  %v588_v2 = vsel %vm578_vm7, %v3302_v50, 0.0 }
  0xc6   : > { %v589_v10 = vadd.f32 %v588_v2, %v587_v3 }
  0xc8   : > { %v385_v52 = vpop.f32.mrf.mxu0 }
  0xc9   : > { %v411_v55 = vmin.f32 %v385_v52, 0.0  ;;  %v2963_v61 = vpack.i.bf16 %v382_v45, %v385_v52  ;;  %v403_v11 = vadd.f32 1.0, %v385_v52  ;;  %vm395_vm9 = vcmp.gt.f32.partialorder %v385_v52, 0.0 }
  0xcb   : > { %v3016_v58 = vpop.eup %3015  ;;  %v426_v60 = vmul.f32 1.442695, %v411_v55 }
  0xcc   : > { %v3314_v63 = vsel %vm394_vm8, %v402_v57, %v3016_v58 }
  0xcd   : > { %3017 = vpow2.f32 %v426_v60  ;;  %456 = vrot.lane.b32.xlu0 %v3314_v63, %s3153_s19  ;;  %2964 = vrot.lane.b32.xlu2 %v2963_v61, %s3154_s20  ;;  %v590_v9 = vsel %vm578_vm7, %v3314_v63, 0.0 }
  0xce   : > { %v591_v17 = vadd.f32 %v590_v9, %v589_v10 }
  0xd3   : > { %v3018_v13 = vpop.eup %3017 }
  0xd4   : > { %v3327_v18 = vsel %vm395_vm9, %v403_v11, %v3018_v13 }
  0xd5   : > { %2969 = vrot.lane.b32.xlu0 %v2968_v14, %s3154_s20  ;;  %2979 = vrot.lane.b32.xlu2 %v2978_v16, %s3154_s20  ;;  %v592_v19 = vsel %vm578_vm7, %v3327_v18, 0.0 }
  0xd6   : > { %458 = vrot.lane.b32.xlu1 %v3327_v18, %s3153_s19  ;;  %v593_v22 = vadd.f32 %v592_v19, %v591_v17 }
  0xd8   : > { %v594_v23 = vrot.slane %v593_v22, 4 }
  0xda   : > { %v595_v24 = vadd.f32 %v594_v23, %v593_v22 }
  0xdc   : > { %v596_v15 = vrot.slane %v595_v24, 2 }
  0xde   : > { %2974 = vrot.lane.b32.xlu1 %v2973_v12, %s3154_s20  ;;  %v597_v25 = vadd.f32 %v596_v15, %v595_v24 }
  0xe0   : > { %v598_v28 = vrot.slane %v597_v25, 1 }
  0xe2   : > { %v599_v29 = vadd.f32 %v598_v28, %v597_v25 }
  0xe6   : > { %658 = vrot.lane.b32.xlu1 %v599_v29, %s3153_s19 }
 0x10f   : > { %v445_v30 = vpop.permute.xlu0 %444 }
 0x110   : > { %468 = vxpose.xlu0.b32.start [1/8] (short) (narrow) %v445_v30, 32 }
 0x117   : > { %v447_v31 = vpop.permute.xlu0 %446  ;;  %v453_v33 = vpop.permute.xlu2 %452 }
 0x118   : > { %469 = vxpose.xlu0.b32.cont [2/8] (short) (narrow) %v447_v31, 32 }
 0x11f   : > { %v449_v34 = vpop.permute.xlu1 %448  ;;  %v455_v35 = vpop.permute.xlu2 %454 }
 0x120   : > { %470 = vxpose.xlu0.b32.cont [3/8] (short) (narrow) %v449_v34, 32 }
 0x127   : > { %v451_v36 = vpop.permute.xlu1 %450  ;;  %v2965_v37 = vpop.permute.xlu2 %2964 }
 0x128   : > { %471 = vxpose.xlu0.b32.cont [4/8] (short) (narrow) %v451_v36, 32  ;;  %v2966_v21 = vunpack.i.l.bf16 %v2965_v37  ;;  %v2967_v27 = vunpack.i.h.bf16 %v2965_v37 }
 0x12a   : > { %553 = vmatpush.msra.mxu1 %v2966_v21 }
 0x12c   : > { %554 = vmatpush.msra.mxu1 %v2967_v27 }
 0x12f   : > { %v2980_v52 = vpop.permute.xlu2 %2979 }
 0x130   : > { %472 = vxpose.xlu0.b32.cont [5/8] (short) (narrow) %v453_v33, 32  ;;  %v2981_v54 = vunpack.i.l.bf16 %v2980_v52  ;;  %v2982_v55 = vunpack.i.h.bf16 %v2980_v52 }
 0x138   : > { %473 = vxpose.xlu0.b32.cont [6/8] (short) (narrow) %v455_v35, 32 }
 0x13f   : > { %v457_v43 = vpop.permute.xlu0 %456 }
 0x140   : > { %474 = vxpose.xlu0.b32.cont [7/8] (short) (narrow) %v457_v43, 32 }
 0x147   : > { %v2970_v45 = vpop.permute.xlu0 %2969 }
 0x148   : > { %v459_v46 = vpop.permute.xlu1 %458  ;;  %v2971_v47 = vunpack.i.l.bf16 %v2970_v45  ;;  %v2972_v48 = vunpack.i.h.bf16 %v2970_v45 }
 0x149   : > { %475 = vxpose.xlu0.b32.end [8/8] (short) (narrow) %v459_v46, 32 }
 0x14a   : > { %555 = vmatpush.msra.mxu1 %v2971_v47 }
 0x14c   : > { %556 = vmatpush.msra.mxu1 %v2972_v48 }
 0x150   : > { %v2975_v49 = vpop.permute.xlu1 %2974 }
 0x151   : > { %v2976_v51 = vunpack.i.l.bf16 %v2975_v49  ;;  %v2977_v53 = vunpack.i.h.bf16 %v2975_v49 }
 0x153   : > { %557 = vmatpush.msra.mxu1 %v2976_v51 }
 0x155   : > { %558 = vmatpush.msra.mxu1 %v2977_v53 }
 0x157   : > { %559 = vmatpush.msra.mxu1 %v2981_v54 }
 0x158   : > { %v659_v56 = vpop.permute.xlu1 %658 }
 0x159   : > { %560 = vmatpush.msra.mxu1 %v2982_v55  ;;  %v662_v57 = vmul.f32 %v659_v56, %v3279_v26  ;;  %v663_v58 = vmul.f32 %v659_v56, %v3288_v32  ;;  %v664_v59 = vmul.f32 %v659_v56, %v3294_v38  ;;  %v665_v60 = vmul.f32 %v659_v56, %v3298_v44 }
 0x15a   : > { %v666_v61 = vmul.f32 %v659_v56, %v3302_v50  ;;  %v667_v62 = vmul.f32 %v659_v56, %v3314_v63  ;;  %v668_v0 = vmul.f32 %v659_v56, %v3327_v18  ;;  %v661_v23 = vmul.f32 %v659_v56, %v3270_v20 }
 0x15b   : > { %2815 = vmatmul.msk.f32.vlgmr.msra.gmra.mxu3 %vm322_vm0, %v662_v57 }
 0x163   : > { %2816 = vmatmul.msk.f32.gmra.mxu3 %vm322_vm0, %v663_v58 }
 0x16b   : > { %2817 = vmatmul.msk.f32.gmra.mxu3 %vm322_vm0, %v664_v59 }
 0x173   : > { %2818 = vmatmul.msk.f32.gmra.mxu3 %vm322_vm0, %v665_v60 }
 0x17b   : > { %2819 = vmatmul.msk.f32.gmra.mxu3 %vm322_vm0, %v666_v61 }
 0x183   : > { %2820 = vmatmul.msk.f32.gmra.mxu3 %vm322_vm0, %v667_v62 }
 0x18b   : > { %2821 = vmatmul.msk.f32.gmra.mxu3 %vm322_vm0, %v668_v0 }
 0x1b5   : > { %v484_v1 = vpop.trf.xlu0 }
 0x1b6   : > { %2802 = vmatmul.msk.f32.vlgmr.msra.gmra.mxu1 %vm532_vm10, %v484_v1 }
 0x1bd   : > { %v485_v2 = vpop.trf.xlu0 }
 0x1be   : > { %2803 = vmatmul.msk.f32.gmra.mxu1 %vm532_vm10, %v485_v2 }
 0x1c5   : > { %v486_v3 = vpop.trf.xlu0 }
 0x1c6   : > { %2804 = vmatmul.msk.f32.gmra.mxu1 %vm532_vm10, %v486_v3 }
 0x1cd   : > { %v487_v9 = vpop.trf.xlu0 }
 0x1ce   : > { %2805 = vmatmul.msk.f32.gmra.mxu1 %vm532_vm10, %v487_v9 }
 0x233   : > { %v562_v10 = vpop.f32.mrf.mxu1 }
 0x234   : > { %v574_v22 = vmul.f32 %v562_v10, %v3360_v42 }
 0x23b   : > { %v565_v11 = vpop.f32.mrf.mxu1 }
 0x23c   : > { %v575_v19 = vmul.f32 %v565_v11, %v3354_v41 }
 0x243   : > { %v568_v13 = vpop.f32.mrf.mxu1 }
 0x244   : > { %v576_v17 = vmul.f32 %v568_v13, %v3348_v40 }
 0x24b   : > { %v571_v14 = vpop.f32.mrf.mxu1 }
 0x24c   : > { %v577_v16 = vmul.f32 %v571_v14, %v3342_v39 }
 0x24e   : > { %628 = vmatpush.msrb.mxu0 %v577_v16  ;;  %2943 = vmatpush.msra.mxu2 %v577_v16 }
 0x250   : > { %629 = vmatpush.msrb.mxu0 %v576_v17  ;;  %2944 = vmatpush.msra.mxu2 %v576_v17 }
 0x252   : > { %630 = vmatpush.msrb.mxu0 %v575_v19  ;;  %2945 = vmatpush.msra.mxu2 %v575_v19 }
 0x254   : > { %631 = vmatpush.msrb.mxu0 %v574_v22  ;;  %2946 = vmatpush.msra.mxu2 %v574_v22 }
 0x255   : > { %2806 = vmatmul.msk.f32.vlgmr.msrb.gmra.mxu0 %vm322_vm0, %v3270_v20  ;;  %2807 = vmatmul.msk.f32.vlgmr.msra.gmra.mxu2 %vm322_vm0, %v3279_v26  ;;  %v713_v20 = vpop.f32.mrf.mxu3  ;;  %v857_v26 = vld [vmem:[%s4314_s3 + $0x18] sm:$0xff] }
 0x256   : > { %705 = vmatpush.msra.mxu0 %v3342_v39  ;;  %894 = vmatpush.msrb.mxu1 %v857_v26 }
 0x258   : > { %706 = vmatpush.msra.mxu0 %v3348_v40 }
 0x25a   : > { %707 = vmatpush.msra.mxu0 %v3354_v41 }
 0x25c   : > { %708 = vmatpush.msra.mxu0 %v3360_v42 }
 0x25d   : > { %2808 = vmatmul.msk.f32.gmra.mxu2 %vm322_vm0, %v3288_v32  ;;  %2814 = vmatmul.msk.f32.vlgmr.msra.gmra.mxu0 %vm322_vm0, %v661_v23  ;;  %v856_v32 = vld [vmem:[%s4314_s3 + $0x10] sm:$0xff] }
 0x25e   : > { %895 = vmatpush.msrb.mxu1 %v856_v32 }
 0x265   : > { %2809 = vmatmul.msk.f32.gmra.mxu2 %vm322_vm0, %v3294_v38  ;;  %v855_v38 = vld [vmem:[%s4314_s3 + $0x8] sm:$0xff] }
 0x266   : > { %896 = vmatpush.msrb.mxu1 %v855_v38 }
 0x26d   : > { %2810 = vmatmul.msk.f32.gmra.mxu2 %vm322_vm0, %v3298_v44  ;;  %v854_v44 = vld [vmem:[%s4314_s3] sm:$0xff] }
 0x26e   : > { %897 = vmatpush.msrb.mxu1 %v854_v44 }
 0x275   : > { %2811 = vmatmul.msk.f32.gmra.mxu2 %vm322_vm0, %v3302_v50  ;;  %v716_v50 = vpop.f32.mrf.mxu3 }
 0x276   : > { %v3419_v25 = vadd.f32 1e-06, %v716_v50 }
 0x278   : > { %v775_v10 = vand.u32 2147483648, %v3419_v25  ;;  %vm769_vm5 = vweird.f32 %v3419_v25  ;;  %v773_v13 = vand.u32 2147483647, %v3419_v25 }
 0x27a   : > { %v776_v19 = vor.u32 1.1754944e-38, %v775_v10  ;;  %vm774_vm8 = vcmp.eq.f32.partialorder %v773_v13, 8.507059e+37 }
 0x27d   : > { %2812 = vmatmul.msk.f32.gmra.mxu2 %vm322_vm0, %v3314_v63  ;;  %v719_v24 = vpop.f32.mrf.mxu3 }
 0x27e   : > { %v3422_v34 = vadd.f32 1e-06, %v719_v24 }
 0x280   : > { %v790_v50 = vand.u32 2147483648, %v3422_v34 }
 0x285   : > { %2813 = vmatmul.msk.f32.gmra.mxu2 %vm322_vm0, %v3327_v18  ;;  %v714_v18 = vadd.f32 1e-06, %v713_v20  ;;  %v722_v31 = vpop.f32.mrf.mxu3 }
 0x286   : > { %v3426_v47 = vadd.f32 1e-06, %v722_v31 }
 0x287   : > { %3019 = vrcp.f32 %v714_v18  ;;  %v760_v55 = vand.u32 2147483648, %v714_v18  ;;  %vm754_vm1 = vweird.f32 %v714_v18  ;;  %v758_v56 = vand.u32 2147483647, %v714_v18 }
 0x289   : > { %v761_v61 = vor.u32 1.1754944e-38, %v760_v55  ;;  %vm759_vm3 = vcmp.eq.f32.partialorder %v758_v56, 8.507059e+37 }
 0x28d   : > { %v3020_v28 = vpop.eup %3019  ;;  %v725_v49 = vpop.f32.mrf.mxu3 }
 0x28e   : > { %v750_v29 = vmul.f32 %v3020_v28, %v714_v18  ;;  %vm755_vm15 = vweird.f32 %v3020_v28  ;;  %v3431_v62 = vadd.f32 1e-06, %v725_v49 }
 0x28f   : > { %vm756_vm2 = vmor %vm754_vm1, %vm755_vm15  ;;  %vm799_vm15 = vweird.f32 %v3426_v47 }
 0x290   : > { %v751_v35 = vsub.f32 1.0, %v750_v29  ;;  %v818_v49 = vand.u32 2147483647, %v3431_v62 }
 0x292   : > { %v752_v41 = vmul.f32 %v3020_v28, %v751_v35 }
 0x294   : > { %v753_v51 = vadd.f32 %v3020_v28, %v752_v41 }
 0x295   : > { %v728_v11 = vpop.f32.mrf.mxu3 }
 0x296   : > { %v757_v58 = vsel %vm756_vm2, %v3020_v28, %v753_v51  ;;  %v3439_v23 = vadd.f32 1e-06, %v728_v11 }
 0x297   : > { %v762_v0 = vsel %vm759_vm3, %v761_v61, %v757_v58 }
 0x29d   : > { %v731_v18 = vpop.f32.mrf.mxu3 }
 0x29e   : > { %v3447_v28 = vadd.f32 1e-06, %v731_v18 }
 0x2a0   : > { %v850_v10 = vand.u32 2147483648, %v3447_v28  ;;  %v848_v11 = vand.u32 2147483647, %v3447_v28 }
 0x2d2   : > { %v633_v63 = vpop.f32.mrf.mxu0 }
 0x2d8   : > { %v636_v21 = vpop.f32.mrf.mxu2 }
 0x2d9   : > { %v763_v1 = vmul.f32 %v762_v0, %v636_v21 }
 0x2da   : > { %v710_v12 = vpop.f32.mrf.mxu0 }
 0x2db   : > { %v711_v15 = vadd.f32 1e-06, %v710_v12 }
 0x2dd   : > { %3021 = vrcp.f32 %v711_v15  ;;  %v745_v27 = vand.u32 2147483648, %v711_v15  ;;  %v743_v40 = vand.u32 2147483647, %v711_v15  ;;  %vm739_vm12 = vweird.f32 %v711_v15 }
 0x2de   : > { %3023 = vrcp.f32 %v3419_v25 }
 0x2df   : > { %3025 = vrcp.f32 %v3422_v34  ;;  %v746_v45 = vor.u32 1.1754944e-38, %v745_v27  ;;  %vm744_vm14 = vcmp.eq.f32.partialorder %v743_v40, 8.507059e+37 }
 0x2e0   : > { %3027 = vrcp.f32 %v3426_v47  ;;  %v639_v57 = vpop.f32.mrf.mxu2 }
 0x2e1   : > { %3029 = vrcp.f32 %v3431_v62 }
 0x2e2   : > { %3031 = vrcp.f32 %v3439_v23 }
 0x2e3   : > { %v3022_v30 = vpop.eup %3021  ;;  %3033 = vrcp.f32 %v3447_v28 }
 0x2e4   : > { %v735_v33 = vmul.f32 %v3022_v30, %v711_v15  ;;  %v3024_v37 = vpop.eup %3023  ;;  %vm740_vm11 = vweird.f32 %v3022_v30 }
 0x2e5   : > { %v765_v42 = vmul.f32 %v3024_v37, %v3419_v25  ;;  %vm741_vm13 = vmor %vm739_vm12, %vm740_vm11  ;;  %v3026_v54 = vpop.eup %3025  ;;  %vm770_vm4 = vweird.f32 %v3024_v37  ;;  %vm784_vm11 = vweird.f32 %v3422_v34  ;;  %v791_v25 = vor.u32 1.1754944e-38, %v790_v50 }
 0x2e6   : > { %v736_v36 = vsub.f32 1.0, %v735_v33  ;;  %v780_v60 = vmul.f32 %v3026_v54, %v3422_v34  ;;  %v3028_v9 = vpop.eup %3027  ;;  %vm771_vm6 = vmor %vm769_vm5, %vm770_vm4  ;;  %vm785_vm9 = vweird.f32 %v3026_v54  ;;  %vm814_vm4 = vweird.f32 %v3431_v62 }
 0x2e7   : > { %v766_v52 = vsub.f32 1.0, %v765_v42  ;;  %v795_v17 = vmul.f32 %v3028_v9, %v3426_v47  ;;  %v3030_v44 = vpop.eup %3029  ;;  %vm786_vm12 = vmor %vm784_vm11, %vm785_vm9  ;;  %vm829_vm9 = vweird.f32 %v3439_v23 }
 0x2e8   : > { %v737_v39 = vmul.f32 %v3022_v30, %v736_v36  ;;  %v781_v3 = vsub.f32 1.0, %v780_v60  ;;  %v642_v22 = vpop.f32.mrf.mxu2  ;;  %v810_v15 = vmul.f32 %v3030_v44, %v3431_v62  ;;  %v3032_v35 = vpop.eup %3031  ;;  %v805_v36 = vand.u32 2147483648, %v3426_v47 }
 0x2e9   : > { %v767_v59 = vmul.f32 %v3024_v37, %v766_v52  ;;  %v796_v38 = vsub.f32 1.0, %v795_v17  ;;  %vm815_vm3 = vweird.f32 %v3030_v44  ;;  %v833_v60 = vand.u32 2147483647, %v3439_v23 }
 0x2ea   : > { %v738_v43 = vadd.f32 %v3022_v30, %v737_v39  ;;  %v782_v16 = vmul.f32 %v3026_v54, %v781_v3  ;;  %v825_v39 = vmul.f32 %v3032_v35, %v3439_v23  ;;  %v806_v40 = vor.u32 1.1754944e-38, %v805_v36  ;;  %vm816_vm5 = vmor %vm814_vm4, %vm815_vm3 }
 0x2eb   : > { %v768_v2 = vadd.f32 %v3024_v37, %v767_v59  ;;  %v797_v12 = vmul.f32 %v3028_v9, %v796_v38  ;;  %v835_v59 = vand.u32 2147483648, %v3439_v23 }
 0x2ec   : > { %v742_v46 = vsel %vm741_vm13, %v3022_v30, %v738_v43  ;;  %v783_v32 = vadd.f32 %v3026_v54, %v782_v16  ;;  %v851_v16 = vor.u32 1.1754944e-38, %v850_v10 }
 0x2ed   : > { %v747_v48 = vsel %vm744_vm14, %v746_v45, %v742_v46  ;;  %v772_v14 = vsel %vm771_vm6, %v3024_v37, %v768_v2  ;;  %v798_v33 = vadd.f32 %v3028_v9, %v797_v12  ;;  %vm800_vm14 = vweird.f32 %v3028_v9  ;;  %v3034_v46 = vpop.eup %3033 }
 0x2ee   : > { %v748_v53 = vmul.f32 %v747_v48, %v633_v63  ;;  %v777_v20 = vsel %vm774_vm8, %v776_v19, %v772_v14  ;;  %v788_v63 = vand.u32 2147483647, %v3422_v34  ;;  %v787_v24 = vsel %vm786_vm12, %v3026_v54, %v783_v32  ;;  %vm801_vm1 = vmor %vm799_vm15, %vm800_vm14 }
 0x2ef   : > { %v778_v26 = vmul.f32 %v777_v20, %v639_v57  ;;  %v811_v34 = vsub.f32 1.0, %v810_v15  ;;  %v803_v37 = vand.u32 2147483647, %v3426_v47  ;;  %v802_v21 = vsel %vm801_vm1, %v3028_v9, %v798_v33 }
 0x2f0   : > { %2822 = vmatmul.msk.f32.vlgmr.msrb.gmra.mxu1 %vm322_vm0, %v748_v53  ;;  %vm789_vm13 = vcmp.eq.f32.partialorder %v788_v63, 8.507059e+37  ;;  %v645_v30 = vpop.f32.mrf.mxu2  ;;  %v826_v45 = vsub.f32 1.0, %v825_v39  ;;  %v820_v47 = vand.u32 2147483648, %v3431_v62  ;;  %v840_v53 = vmul.f32 %v3034_v46, %v3447_v28 }
 0x2f1   : > { %v792_v29 = vsel %vm789_vm13, %v791_v25, %v787_v24  ;;  %v812_v27 = vmul.f32 %v3030_v44, %v811_v34  ;;  %vm804_vm2 = vcmp.eq.f32.partialorder %v803_v37, 8.507059e+37  ;;  %vm819_vm6 = vcmp.eq.f32.partialorder %v818_v49, 8.507059e+37 }
 0x2f2   : > { %v793_v31 = vmul.f32 %v792_v29, %v642_v22  ;;  %v807_v41 = vsel %vm804_vm2, %v806_v40, %v802_v21  ;;  %v827_v52 = vmul.f32 %v3032_v35, %v826_v45  ;;  %v821_v54 = vor.u32 1.1754944e-38, %v820_v47 }
 0x2f3   : > { %v808_v42 = vmul.f32 %v807_v41, %v645_v30  ;;  %v813_v43 = vadd.f32 %v3030_v44, %v812_v27  ;;  %vm830_vm8 = vweird.f32 %v3032_v35  ;;  %v841_v58 = vsub.f32 1.0, %v840_v53 }
 0x2f4   : > { %v828_v57 = vadd.f32 %v3032_v35, %v827_v52  ;;  %vm831_vm11 = vmor %vm829_vm9, %vm830_vm8  ;;  %vm834_vm12 = vcmp.eq.f32.partialorder %v833_v60, 8.507059e+37  ;;  %vm845_vm13 = vweird.f32 %v3034_v46  ;;  %vm844_vm14 = vweird.f32 %v3447_v28 }
 0x2f5   : > { %v817_v51 = vsel %vm816_vm5, %v3030_v44, %v813_v43  ;;  %v842_v0 = vmul.f32 %v3034_v46, %v841_v58  ;;  %vm846_vm15 = vmor %vm844_vm14, %vm845_vm13  ;;  %vm849_vm1 = vcmp.eq.f32.partialorder %v848_v11, 8.507059e+37  ;;  %v3155_v30 = vmov 32.0  }
 0x2f6   : > { %v822_v55 = vsel %vm819_vm6, %v821_v54, %v817_v51  ;;  %v832_v62 = vsel %vm831_vm11, %v3032_v35, %v828_v57  ;;  %3035 = vrcp.f32 %v3155_v30 }
 0x2f7   : > { %v843_v9 = vadd.f32 %v3034_v46, %v842_v0 }
 0x2f8   : > { %2823 = vmatmul.msk.f32.gmra.mxu1 %vm322_vm0, %v763_v1  ;;  %v648_v48 = vpop.f32.mrf.mxu2  ;;  %v836_v1 = vor.u32 1.1754944e-38, %v835_v59 }
 0x2f9   : > { %v823_v56 = vmul.f32 %v822_v55, %v648_v48  ;;  %v847_v13 = vsel %vm846_vm15, %v3034_v46, %v843_v9 }
 0x2fa   : > { %v837_v2 = vsel %vm834_vm12, %v836_v1, %v832_v62  ;;  %v852_v17 = vsel %vm849_vm1, %v851_v16, %v847_v13 }
 0x300   : > { %2824 = vmatmul.msk.f32.gmra.mxu1 %vm322_vm0, %v778_v26  ;;  %v651_v61 = vpop.f32.mrf.mxu2 }
 0x301   : > { %v838_v3 = vmul.f32 %v837_v2, %v651_v61 }
 0x308   : > { %2825 = vmatmul.msk.f32.gmra.mxu1 %vm322_vm0, %v793_v31  ;;  %v654_v14 = vpop.f32.mrf.mxu2  ;;  %v3036_v31 = vpop.eup %3035 }
 0x309   : > { %v853_v19 = vmul.f32 %v852_v17, %v654_v14  ;;  %v949_v33 = vmul.f32 32.0, %v3036_v31  ;;  %vm953_vm2 = vweird.f32 %v3036_v31 }
 0x30b   : > { %v950_v34 = vsub.f32 1.0, %v949_v33 }
 0x30d   : > { %v951_v35 = vmul.f32 %v3036_v31, %v950_v34 }
 0x30f   : > { %v952_v36 = vadd.f32 %v3036_v31, %v951_v35 }
 0x310   : > { %2826 = vmatmul.msk.f32.gmra.mxu1 %vm322_vm0, %v808_v42 }
 0x311   : > { %v3477_v37 = vsel %vm953_vm2, %v3036_v31, %v952_v36 }
 0x318   : > { %2827 = vmatmul.msk.f32.gmra.mxu1 %vm322_vm0, %v823_v56 }
 0x320   : > { %2828 = vmatmul.msk.f32.gmra.mxu1 %vm322_vm0, %v838_v3 }
 0x328   : > { %2829 = vmatmul.msk.f32.gmra.mxu1 %vm322_vm0, %v853_v19 }
 0x36d   : > { %v899_v22 = vpop.f32.mrf.mxu1 }
 0x36e   : > { %v924_v23 = vsel %vm322_vm0, %v899_v22, 0.0 }
 0x36f   : > { %925 = vadd.xlane.f32.xlu2 %v924_v23 }
 0x375   : > { %v902_v20 = vpop.f32.mrf.mxu1 }
 0x376   : > { %v927_v26 = vsel %vm322_vm0, %v902_v20, 0.0 }
 0x377   : > { %928 = vadd.xlane.f32.xlu1 %v927_v26 }
 0x37d   : > { %v905_v32 = vpop.f32.mrf.mxu1 }
 0x37e   : > { %v930_v38 = vsel %vm322_vm0, %v905_v32, 0.0 }
 0x37f   : > { %931 = vadd.xlane.f32.xlu2 %v930_v38  ;;  %v1127_v38 = vld [vmem:[%s4315_s4 + $0x10] sm:$0xff] }
 0x385   : > { %v908_v44 = vpop.f32.mrf.mxu1 }
 0x386   : > { %v933_v50 = vsel %vm322_vm0, %v908_v44, 0.0 }
 0x387   : > { %934 = vadd.xlane.f32.xlu2 %v933_v50  ;;  %v1132_v50 = vld [vmem:[%s4316_s5 + $0x18] sm:$0xff] }
 0x388   : > { %1169 = vmatpush.msrb.mxu0 %v1132_v50  ;;  %v3592_v50 = vld [vmem:[%s3229_s18 + $0x30] sm:$0xff] }
 0x38d   : > { %v911_v63 = vpop.f32.mrf.mxu1 }
 0x38e   : > { %v936_v18 = vsel %vm322_vm0, %v911_v63, 0.0 }
 0x38f   : > { %937 = vadd.xlane.f32.xlu1 %v936_v18  ;;  %v1131_v18 = vld [vmem:[%s4316_s5 + $0x10] sm:$0xff] }
 0x390   : > { %1170 = vmatpush.msrb.mxu0 %v1131_v18 }
 0x395   : > { %v914_v24 = vpop.f32.mrf.mxu1 }
 0x396   : > { %v939_v12 = vsel %vm322_vm0, %v914_v24, 0.0 }
 0x397   : > { %940 = vadd.xlane.f32.xlu2 %v939_v12  ;;  %v1129_v12 = vld [vmem:[%s4316_s5] sm:$0xff] }
 0x39d   : > { %v917_v15 = vpop.f32.mrf.mxu1 }
 0x39e   : > { %v942_v25 = vsel %vm322_vm0, %v917_v15, 0.0 }
 0x39f   : > { %943 = vadd.xlane.f32.xlu2 %v942_v25 }
 0x3a5   : > { %v920_v28 = vpop.f32.mrf.mxu1 }
 0x3a6   : > { %v945_v29 = vsel %vm322_vm0, %v920_v28, 0.0 }
 0x3a7   : > { %946 = vadd.xlane.f32.xlu2 %v945_v29 }
 0x3e2   : > { %v926_v21 = vpop.xlane.xlu2 %925 }
 0x3e3   : > { %v955_v27 = vmul.f32 %v3477_v37, %v926_v21  ;;  %v3565_v21 = vld [vmem:[%s4318_s7] sm:$0xf] }
 0x3e5   : > { %v3480_v39 = vsub.f32 %v899_v22, %v955_v27 }
 0x3e7   : > { %v971_v40 = vmul.f32 %v3480_v39, %v3480_v39 }
 0x3e9   : > { %v979_v41 = vsel %vm322_vm0, %v971_v40, 0.0 }
 0x3ea   : > { %v929_v42 = vpop.xlane.xlu1 %928  ;;  %980 = vadd.xlane.f32.xlu1 %v979_v41 }
 0x3eb   : > { %v956_v43 = vmul.f32 %v3477_v37, %v929_v42 }
 0x3ed   : > { %v3486_v45 = vsub.f32 %v902_v20, %v956_v43  ;;  %v3568_v43 = vperm.slane %v3565_v21, 0 }
 0x3ef   : > { %v972_v46 = vmul.f32 %v3486_v45, %v3486_v45 }
 0x3f1   : > { %v982_v48 = vsel %vm322_vm0, %v972_v46, 0.0 }
 0x3f2   : > { %v932_v47 = vpop.xlane.xlu2 %931  ;;  %983 = vadd.xlane.f32.xlu1 %v982_v48 }
 0x3f3   : > { %v957_v49 = vmul.f32 %v3477_v37, %v932_v47  ;;  %v3572_v47 = vperm.slane %v3565_v21, 1 }
 0x3f5   : > { %v3492_v51 = vsub.f32 %v905_v32, %v957_v49  ;;  %v1128_v32 = vld [vmem:[%s4315_s4 + $0x18] sm:$0xff] }
 0x3f6   : > { %1210 = vmatpush.msrb.mxu2 %v1128_v32 }
 0x3f7   : > { %v973_v52 = vmul.f32 %v3492_v51, %v3492_v51 }
 0x3f8   : > { %1211 = vmatpush.msrb.mxu2 %v1127_v38 }
 0x3f9   : > { %v985_v53 = vsel %vm322_vm0, %v973_v52, 0.0 }
 0x3fa   : > { %v935_v54 = vpop.xlane.xlu2 %934  ;;  %986 = vadd.xlane.f32.xlu1 %v985_v53 }
 0x3fb   : > { %v958_v55 = vmul.f32 %v3477_v37, %v935_v54 }
 0x3fd   : > { %v3498_v56 = vsub.f32 %v908_v44, %v958_v55  ;;  %v1126_v44 = vld [vmem:[%s4315_s4 + $0x8] sm:$0xff] }
 0x3fe   : > { %1212 = vmatpush.msrb.mxu2 %v1126_v44 }
 0x3ff   : > { %v974_v57 = vmul.f32 %v3498_v56, %v3498_v56 }
 0x401   : > { %v988_v58 = vsel %vm322_vm0, %v974_v57, 0.0 }
 0x402   : > { %v938_v59 = vpop.xlane.xlu1 %937  ;;  %989 = vadd.xlane.f32.xlu2 %v988_v58 }
 0x403   : > { %v959_v60 = vmul.f32 %v3477_v37, %v938_v59 }
 0x405   : > { %v3504_v61 = vsub.f32 %v911_v63, %v959_v60  ;;  %v1125_v63 = vld [vmem:[%s4315_s4] sm:$0xff] }
 0x406   : > { %1213 = vmatpush.msrb.mxu2 %v1125_v63 }
 0x407   : > { %v975_v62 = vmul.f32 %v3504_v61, %v3504_v61  ;;  %2838 = vmatmul.msk.f32.vlgmr.msrb.gmra.mxu2 %vm322_vm0, %v3232_v4 }
 0x409   : > { %v991_v0 = vsel %vm322_vm0, %v975_v62, 0.0 }
 0x40a   : > { %992 = vadd.xlane.f32.xlu1 %v991_v0  ;;  %v941_v1 = vpop.xlane.xlu2 %940 }
 0x40b   : > { %v960_v2 = vmul.f32 %v3477_v37, %v941_v1 }
 0x40d   : > { %v3510_v3 = vsub.f32 %v914_v24, %v960_v2  ;;  %v1130_v24 = vld [vmem:[%s4316_s5 + $0x8] sm:$0xff] }
 0x40e   : > { %1171 = vmatpush.msrb.mxu0 %v1130_v24 }
 0x40f   : > { %v976_v9 = vmul.f32 %v3510_v3, %v3510_v3  ;;  %2839 = vmatmul.msk.f32.gmra.mxu2 %vm322_vm0, %v3237_v5 }
 0x410   : > { %1172 = vmatpush.msrb.mxu0 %v1129_v12 }
 0x411   : > { %v994_v10 = vsel %vm322_vm0, %v976_v9, 0.0  ;;  %v3582_v9 = vld [vmem:[%s3229_s18 + $0x28] sm:$0xff] }
 0x412   : > { %v944_v11 = vpop.xlane.xlu2 %943  ;;  %995 = vadd.xlane.f32.xlu2 %v994_v10 }
 0x413   : > { %v961_v13 = vmul.f32 %v3477_v37, %v944_v11 }
 0x415   : > { %v3516_v14 = vsub.f32 %v917_v15, %v961_v13 }
 0x417   : > { %v977_v16 = vmul.f32 %v3516_v14, %v3516_v14  ;;  %2840 = vmatmul.msk.f32.gmra.mxu2 %vm322_vm0, %v3242_v6 }
 0x419   : > { %v997_v17 = vsel %vm322_vm0, %v977_v16, 0.0 }
 0x41a   : > { %998 = vadd.xlane.f32.xlu0 %v997_v17  ;;  %v947_v19 = vpop.xlane.xlu2 %946 }
 0x41b   : > { %v962_v22 = vmul.f32 %v3477_v37, %v947_v19 }
 0x41d   : > { %v3522_v23 = vsub.f32 %v920_v28, %v962_v22 }
 0x41f   : > { %v978_v20 = vmul.f32 %v3522_v23, %v3522_v23  ;;  %2841 = vmatmul.msk.f32.gmra.mxu2 %vm322_vm0, %v3247_v7 }
 0x421   : > { %v1000_v26 = vsel %vm322_vm0, %v978_v20, 0.0 }
 0x422   : > { %1001 = vadd.xlane.f32.xlu1 %v1000_v26 }
 0x427   : > { %2842 = vmatmul.msk.f32.gmra.mxu2 %vm322_vm0, %v3252_v8 }
 0x42f   : > { %2843 = vmatmul.msk.f32.gmra.mxu2 %vm322_vm0, %v3582_v9 }
 0x437   : > { %2844 = vmatmul.msk.f32.gmra.mxu2 %vm322_vm0, %v3592_v50 }
 0x45d   : > { %v981_v15 = vpop.xlane.xlu1 %980 }
 0x45e   : > { %v1003_v4 = vmul.f32 %v981_v15, %v3477_v37 }
 0x460   : > { %v1011_v25 = vadd.f32 1e-05, %v1003_v4 }
 0x462   : > { %3037 = vrsqrt.f32 %v1011_v25  ;;  %vm1025_vm4 = vweird.f32 %v1011_v25 }
 0x465   : > { %v984_v28 = vpop.xlane.xlu1 %983 }
 0x466   : > { %v1004_v29 = vmul.f32 %v984_v28, %v3477_v37 }
 0x468   : > { %v3038_v30 = vpop.eup %3037  ;;  %v1012_v31 = vadd.f32 1e-05, %v1004_v29 }
 0x469   : > { %v1020_v33 = vmul.f32 %v3038_v30, %v1011_v25  ;;  %vm1026_vm3 = vweird.f32 %v3038_v30 }
 0x46a   : > { %3039 = vrsqrt.f32 %v1012_v31  ;;  %vm1027_vm5 = vmor %vm1025_vm4, %vm1026_vm3  ;;  %vm1035_vm8 = vweird.f32 %v1012_v31 }
 0x46b   : > { %v1021_v34 = vmul.f32 %v3038_v30, %v1020_v33 }
 0x46d   : > { %v1022_v35 = vmul.f32 0.5, %v1021_v34  ;;  %v987_v36 = vpop.xlane.xlu1 %986  ;;  %v3602_v34 = vld [vmem:[%s3229_s18 + $0x38] sm:$0xff] }
 0x46e   : > { %v1005_v5 = vmul.f32 %v987_v36, %v3477_v37  ;;  %2845 = vmatmul.msk.f32.gmra.mxu2 %vm322_vm0, %v3602_v34 }
 0x46f   : > { %v1023_v6 = vsub.f32 1.5, %v1022_v35 }
 0x470   : > { %v3040_v27 = vpop.eup %3039  ;;  %v1013_v40 = vadd.f32 1e-05, %v1005_v5 }
 0x471   : > { %v1024_v41 = vmul.f32 %v3038_v30, %v1023_v6  ;;  %v1030_v42 = vmul.f32 %v3040_v27, %v1012_v31  ;;  %vm1036_vm6 = vweird.f32 %v3040_v27 }
 0x472   : > { %3041 = vrsqrt.f32 %v1013_v40  ;;  %vm1037_vm9 = vmor %vm1035_vm8, %vm1036_vm6  ;;  %vm1045_vm12 = vweird.f32 %v1013_v40 }
 0x473   : > { %v1028_v7 = vsel %vm1027_vm5, %v3038_v30, %v1024_v41  ;;  %v1031_v46 = vmul.f32 %v3040_v27, %v1030_v42  ;;  %v1254_v42 = vld [vmem:[%s4317_s6 + $0x38] sm:$0xff] }
 0x474   : > { %v1099_v48 = vmul.f32 %v1028_v7, %v3480_v39  ;;  %v1253_v7 = vld [vmem:[%s4317_s6 + $0x30] sm:$0xff]  ;;  %1287 = vmatpush.msrb.mxu3 %v1254_v42 }
 0x475   : > { %v1032_v49 = vmul.f32 0.5, %v1031_v46  ;;  %v990_v52 = vpop.xlane.xlu2 %989 }
 0x476   : > { %v1108_v53 = vmul.f32 %v3568_v43, %v1099_v48  ;;  %v1006_v54 = vmul.f32 %v990_v52, %v3477_v37  ;;  %v1252_v52 = vld [vmem:[%s4317_s6 + $0x28] sm:$0xff]  ;;  %1288 = vmatpush.msrb.mxu3 %v1253_v7 }
 0x477   : > { %v1033_v55 = vsub.f32 1.5, %v1032_v49 }
 0x478   : > { %v3042_v57 = vpop.eup %3041  ;;  %v1014_v58 = vadd.f32 1e-05, %v1006_v54  ;;  %v1117_v59 = vadd.f32 %v3572_v47, %v1108_v53  ;;  %1289 = vmatpush.msrb.mxu3 %v1252_v52 }
 0x479   : > { %v1034_v39 = vmul.f32 %v3040_v27, %v1033_v55  ;;  %v1040_v60 = vmul.f32 %v3042_v57, %v1013_v40  ;;  %vm1046_vm11 = vweird.f32 %v3042_v57 }
 0x47a   : > { %3043 = vrsqrt.f32 %v1014_v58  ;;  %2830 = vmatmul.msk.f32.vlgmr.msrb.gmra.mxu0 %vm322_vm0, %v1117_v59  ;;  %vm1047_vm13 = vmor %vm1045_vm12, %vm1046_vm11  ;;  %vm1055_vm15 = vweird.f32 %v1014_v58 }
 0x47b   : > { %v1038_v62 = vsel %vm1037_vm9, %v3040_v27, %v1034_v39  ;;  %v1041_v8 = vmul.f32 %v3042_v57, %v1040_v60 }
 0x47c   : > { %v1100_v0 = vmul.f32 %v1038_v62, %v3486_v45  ;;  %v1250_v62 = vld [vmem:[%s4317_s6 + $0x18] sm:$0xff] }
 0x47d   : > { %v1042_v1 = vmul.f32 0.5, %v1041_v8  ;;  %v993_v2 = vpop.xlane.xlu1 %992 }
 0x47e   : > { %v1007_v10 = vmul.f32 %v993_v2, %v3477_v37  ;;  %v1109_v11 = vmul.f32 %v3568_v43, %v1100_v0 }
 0x47f   : > { %v1043_v13 = vsub.f32 1.5, %v1042_v1 }
 0x480   : > { %v3044_v16 = vpop.eup %3043  ;;  %v1015_v17 = vadd.f32 1e-05, %v1007_v10  ;;  %v1118_v19 = vadd.f32 %v3572_v47, %v1109_v11 }
 0x481   : > { %v1044_v22 = vmul.f32 %v3042_v57, %v1043_v13  ;;  %v1050_v45 = vmul.f32 %v3044_v16, %v1014_v58  ;;  %vm1056_vm14 = vweird.f32 %v3044_v16  ;;  %v1251_v58 = vld [vmem:[%s4317_s6 + $0x20] sm:$0xff] }
 0x482   : > { %3045 = vrsqrt.f32 %v1015_v17  ;;  %2831 = vmatmul.msk.f32.gmra.mxu0 %vm322_vm0, %v1118_v19  ;;  %vm1057_vm1 = vmor %vm1055_vm15, %vm1056_vm14  ;;  %vm1065_vm3 = vweird.f32 %v1015_v17  ;;  %1290 = vmatpush.msrb.mxu3 %v1251_v58 }
 0x483   : > { %v1048_v20 = vsel %vm1047_vm13, %v3042_v57, %v1044_v22  ;;  %v1051_v26 = vmul.f32 %v3044_v16, %v1050_v45 }
 0x484   : > { %v1101_v32 = vmul.f32 %v1048_v20, %v3492_v51  ;;  %1291 = vmatpush.msrb.mxu3 %v1250_v62 }
 0x485   : > { %v1052_v38 = vmul.f32 0.5, %v1051_v26  ;;  %v996_v44 = vpop.xlane.xlu2 %995 }
 0x486   : > { %v1008_v63 = vmul.f32 %v996_v44, %v3477_v37  ;;  %v1110_v18 = vmul.f32 %v3568_v43, %v1101_v32 }
 0x487   : > { %v1053_v24 = vsub.f32 1.5, %v1052_v38 }
 0x488   : > { %v3046_v12 = vpop.eup %3045  ;;  %v1016_v15 = vadd.f32 1e-05, %v1008_v63  ;;  %v1119_v4 = vadd.f32 %v3572_v47, %v1110_v18 }
 0x489   : > { %v1054_v25 = vmul.f32 %v3044_v16, %v1053_v24  ;;  %v1060_v51 = vmul.f32 %v3046_v12, %v1015_v17  ;;  %vm1066_vm2 = vweird.f32 %v3046_v12 }
 0x48a   : > { %3047 = vrsqrt.f32 %v1016_v15  ;;  %2832 = vmatmul.msk.f32.gmra.mxu0 %vm322_vm0, %v1119_v4  ;;  %vm1067_vm4 = vmor %vm1065_vm3, %vm1066_vm2  ;;  %vm1075_vm6 = vweird.f32 %v1016_v15 }
 0x48b   : > { %v1058_v28 = vsel %vm1057_vm1, %v3044_v16, %v1054_v25  ;;  %v1061_v29 = vmul.f32 %v3046_v12, %v1060_v51  ;;  %v1248_v25 = vld [vmem:[%s4317_s6 + $0x8] sm:$0xff] }
 0x48c   : > { %v1102_v30 = vmul.f32 %v1058_v28, %v3498_v56  ;;  %v3666_v51 = vld [vmem:[%s4312_s1 + $0x8] sm:$0xff]  ;;  %v3672_v28 = vld [vmem:[%s4312_s1] sm:$0xff] }
 0x48d   : > { %v1062_v31 = vmul.f32 0.5, %v1061_v29  ;;  %v999_v33 = vpop.xlane.xlu0 %998  ;;  %v1215_v29 = vpop.f32.mrf.mxu2 }
 0x48e   : > { %v1009_v35 = vmul.f32 %v999_v33, %v3477_v37  ;;  %v1111_v36 = vmul.f32 %v3568_v43, %v1102_v30 }
 0x48f   : > { %v1063_v5 = vsub.f32 1.5, %v1062_v31 }
 0x490   : > { %v3048_v6 = vpop.eup %3047  ;;  %v1017_v27 = vadd.f32 1e-05, %v1009_v35  ;;  %v1120_v40 = vadd.f32 %v3572_v47, %v1111_v36 }
 0x491   : > { %v1064_v41 = vmul.f32 %v3046_v12, %v1063_v5  ;;  %v1070_v56 = vmul.f32 %v3048_v6, %v1016_v15  ;;  %vm1076_vm5 = vweird.f32 %v3048_v6 }
 0x492   : > { %3049 = vrsqrt.f32 %v1017_v27  ;;  %2833 = vmatmul.msk.f32.gmra.mxu0 %vm322_vm0, %v1120_v40  ;;  %vm1077_vm8 = vmor %vm1075_vm6, %vm1076_vm5  ;;  %vm1085_vm11 = vweird.f32 %v1017_v27 }
 0x493   : > { %v1068_v46 = vsel %vm1067_vm4, %v3046_v12, %v1064_v41  ;;  %v1071_v48 = vmul.f32 %v3048_v6, %v1070_v56 }
 0x494   : > { %v1103_v49 = vmul.f32 %v1068_v46, %v3504_v61 }
 0x495   : > { %v1072_v53 = vmul.f32 0.5, %v1071_v48  ;;  %v1002_v54 = vpop.xlane.xlu1 %1001  ;;  %v1218_v30 = vpop.f32.mrf.mxu2 }
 0x496   : > { %v1010_v55 = vmul.f32 %v1002_v54, %v3477_v37  ;;  %v1112_v57 = vmul.f32 %v3568_v43, %v1103_v49 }
 0x497   : > { %v1073_v59 = vsub.f32 1.5, %v1072_v53 }
 0x498   : > { %v3050_v39 = vpop.eup %3049  ;;  %v1018_v61 = vadd.f32 1e-05, %v1010_v55  ;;  %v1121_v60 = vadd.f32 %v3572_v47, %v1112_v57 }
 0x499   : > { %v1074_v8 = vmul.f32 %v3048_v6, %v1073_v59  ;;  %v1080_v0 = vmul.f32 %v3050_v39, %v1017_v27  ;;  %vm1086_vm9 = vweird.f32 %v3050_v39 }
 0x49a   : > { %3051 = vrsqrt.f32 %v1018_v61  ;;  %2834 = vmatmul.msk.f32.gmra.mxu0 %vm322_vm0, %v1121_v60  ;;  %vm1087_vm12 = vmor %vm1085_vm11, %vm1086_vm9  ;;  %vm1095_vm14 = vweird.f32 %v1018_v61 }
 0x49b   : > { %v1078_v1 = vsel %vm1077_vm8, %v3048_v6, %v1074_v8  ;;  %v1081_v2 = vmul.f32 %v3050_v39, %v1080_v0 }
 0x49c   : > { %v1104_v10 = vmul.f32 %v1078_v1, %v3510_v3 }
 0x49d   : > { %v1082_v11 = vmul.f32 0.5, %v1081_v2  ;;  %v1221_v36 = vpop.f32.mrf.mxu2 }
 0x49e   : > { %v1113_v13 = vmul.f32 %v3568_v43, %v1104_v10 }
 0x49f   : > { %v1083_v16 = vsub.f32 1.5, %v1082_v11 }
 0x4a0   : > { %v3052_v17 = vpop.eup %3051  ;;  %v1122_v19 = vadd.f32 %v3572_v47, %v1113_v13 }
 0x4a1   : > { %v1084_v22 = vmul.f32 %v3050_v39, %v1083_v16  ;;  %v1090_v45 = vmul.f32 %v3052_v17, %v1018_v61  ;;  %vm1096_vm13 = vweird.f32 %v3052_v17 }
 0x4a2   : > { %2835 = vmatmul.msk.f32.gmra.mxu0 %vm322_vm0, %v1122_v19  ;;  %vm1097_vm15 = vmor %vm1095_vm14, %vm1096_vm13 }
 0x4a3   : > { %v1088_v20 = vsel %vm1087_vm12, %v3050_v39, %v1084_v22  ;;  %v1091_v26 = vmul.f32 %v3052_v17, %v1090_v45 }
 0x4a4   : > { %v1105_v32 = vmul.f32 %v1088_v20, %v3516_v14  ;;  %v1249_v14 = vld [vmem:[%s4317_s6 + $0x10] sm:$0xff] }
 0x4a5   : > { %v1092_v38 = vmul.f32 0.5, %v1091_v26  ;;  %1292 = vmatpush.msrb.mxu3 %v1249_v14  ;;  %v1224_v40 = vpop.f32.mrf.mxu2 }
 0x4a6   : > { %v1114_v3 = vmul.f32 %v3568_v43, %v1105_v32 }
 0x4a7   : > { %v1093_v44 = vsub.f32 1.5, %v1092_v38  ;;  %1293 = vmatpush.msrb.mxu3 %v1248_v25 }
 0x4a8   : > { %v1123_v63 = vadd.f32 %v3572_v47, %v1114_v3 }
 0x4a9   : > { %v1094_v18 = vmul.f32 %v3052_v17, %v1093_v44 }
 0x4aa   : > { %2836 = vmatmul.msk.f32.gmra.mxu0 %vm322_vm0, %v1123_v63 }
 0x4ab   : > { %v1098_v24 = vsel %vm1097_vm15, %v3052_v17, %v1094_v18 }
 0x4ac   : > { %v1106_v12 = vmul.f32 %v1098_v24, %v3522_v23  ;;  %v1247_v23 = vld [vmem:[%s4317_s6] sm:$0xff] }
 0x4ad   : > { %1294 = vmatpush.msrb.mxu3 %v1247_v23  ;;  %v1227_v46 = vpop.f32.mrf.mxu2 }
 0x4ae   : > { %v1115_v15 = vmul.f32 %v3568_v43, %v1106_v12  ;;  %v3654_v43 = vld [vmem:[%s4312_s1 + $0x18] sm:$0xff] }
 0x4af   : > { %1907 = vmatpush.msra.mxu3 %v3654_v43 }
 0x4b0   : > { %v1124_v4 = vadd.f32 %v3572_v47, %v1115_v15  ;;  %v3660_v47 = vld [vmem:[%s4312_s1 + $0x10] sm:$0xff] }
 0x4b1   : > { %1908 = vmatpush.msra.mxu3 %v3660_v47 }
 0x4b2   : > { %2837 = vmatmul.msk.f32.gmra.mxu0 %vm322_vm0, %v1124_v4 }
 0x4b3   : > { %1909 = vmatpush.msra.mxu3 %v3666_v51 }
 0x4b5   : > { %1910 = vmatpush.msra.mxu3 %v3672_v28  ;;  %v1230_v54 = vpop.f32.mrf.mxu2 }
 0x4bd   : > { %v1233_v39 = vpop.f32.mrf.mxu2 }
 0x4f1   : > { %v1236_v8 = vpop.f32.mrf.mxu2 }
 0x4f7   : > { %v1174_v31 = vpop.f32.mrf.mxu0 }
 0x4f8   : > { %v1216_v33 = vadd.f32 %v1215_v29, %v1174_v31 }
 0x4fa   : > { %v1239_v35 = vmax.f32 %v1216_v33, 0.0 }
 0x4fc   : > { %2846 = vmatmul.msk.f32.vlgmr.msrb.gmra.mxu3 %vm532_vm10, %v1239_v35 }
 0x4ff   : > { %v1177_v5 = vpop.f32.mrf.mxu0 }
 0x500   : > { %v1219_v6 = vadd.f32 %v1218_v30, %v1177_v5 }
 0x502   : > { %v1240_v27 = vmax.f32 %v1219_v6, 0.0 }
 0x504   : > { %2847 = vmatmul.msk.f32.gmra.mxu3 %vm532_vm10, %v1240_v27 }
 0x507   : > { %v1180_v41 = vpop.f32.mrf.mxu0 }
 0x508   : > { %v1222_v56 = vadd.f32 %v1221_v36, %v1180_v41 }
 0x50a   : > { %v1241_v42 = vmax.f32 %v1222_v56, 0.0 }
 0x50c   : > { %2848 = vmatmul.msk.f32.gmra.mxu3 %vm532_vm10, %v1241_v42 }
 0x50f   : > { %v1183_v7 = vpop.f32.mrf.mxu0 }
 0x510   : > { %v1225_v48 = vadd.f32 %v1224_v40, %v1183_v7 }
 0x512   : > { %v1242_v49 = vmax.f32 %v1225_v48, 0.0 }
 0x514   : > { %2849 = vmatmul.msk.f32.gmra.mxu3 %vm532_vm10, %v1242_v49 }
 0x517   : > { %v1186_v52 = vpop.f32.mrf.mxu0 }
 0x518   : > { %v1228_v53 = vadd.f32 %v1227_v46, %v1186_v52 }
 0x51a   : > { %v1243_v55 = vmax.f32 %v1228_v53, 0.0 }
 0x51c   : > { %2850 = vmatmul.msk.f32.gmra.mxu3 %vm532_vm10, %v1243_v55 }
 0x51f   : > { %v1189_v57 = vpop.f32.mrf.mxu0 }
 0x520   : > { %v1231_v58 = vadd.f32 %v1230_v54, %v1189_v57 }
 0x522   : > { %v1244_v59 = vmax.f32 %v1231_v58, 0.0 }
 0x524   : > { %2851 = vmatmul.msk.f32.gmra.mxu3 %vm532_vm10, %v1244_v59 }
 0x527   : > { %v1192_v61 = vpop.f32.mrf.mxu0 }
 0x528   : > { %v1234_v60 = vadd.f32 %v1233_v39, %v1192_v61 }
 0x52a   : > { %v1245_v62 = vmax.f32 %v1234_v60, 0.0 }
 0x52c   : > { %2852 = vmatmul.msk.f32.gmra.mxu3 %vm532_vm10, %v1245_v62 }
 0x52f   : > { %v1195_v0 = vpop.f32.mrf.mxu0 }
 0x530   : > { %v1237_v1 = vadd.f32 %v1236_v8, %v1195_v0 }
 0x532   : > { %v1246_v2 = vmax.f32 %v1237_v1, 0.0 }
 0x534   : > { %2853 = vmatmul.msk.f32.gmra.mxu3 %vm532_vm10, %v1246_v2 }
 0x57f   : > { %v1296_v10 = vpop.f32.mrf.mxu3 }
 0x580   : > { %v1320_v11 = vsel %vm322_vm0, %v1296_v10, 0.0 }
 0x581   : > { %1321 = vadd.xlane.f32.xlu2 %v1320_v11  ;;  %v2857_v11 = vld [vmem:[%s4313_s2 + $0x38] sm:$0xff] }
 0x582   : > { %1563 = vmatpush.msra.mxu1 %v2857_v11 }
 0x587   : > { %v1299_v13 = vpop.f32.mrf.mxu3 }
 0x588   : > { %v1323_v16 = vsel %vm322_vm0, %v1299_v13, 0.0 }
 0x589   : > { %1324 = vadd.xlane.f32.xlu1 %v1323_v16  ;;  %v2855_v16 = vld [vmem:[%s4313_s2 + $0x28] sm:$0xff] }
 0x58f   : > { %v1302_v17 = vpop.f32.mrf.mxu3 }
 0x590   : > { %v1326_v19 = vsel %vm322_vm0, %v1302_v17, 0.0 }
 0x591   : > { %1327 = vadd.xlane.f32.xlu2 %v1326_v19 }
 0x597   : > { %v1305_v22 = vpop.f32.mrf.mxu3 }
 0x598   : > { %v1329_v45 = vsel %vm322_vm0, %v1305_v22, 0.0 }
 0x599   : > { %1330 = vadd.xlane.f32.xlu1 %v1329_v45 }
 0x59f   : > { %v1308_v20 = vpop.f32.mrf.mxu3 }
 0x5a0   : > { %v1332_v26 = vsel %vm322_vm0, %v1308_v20, 0.0 }
 0x5a1   : > { %1333 = vadd.xlane.f32.xlu2 %v1332_v26 }
 0x5a7   : > { %v1311_v32 = vpop.f32.mrf.mxu3 }
 0x5a8   : > { %v1335_v38 = vsel %vm322_vm0, %v1311_v32, 0.0 }
 0x5a9   : > { %1336 = vadd.xlane.f32.xlu1 %v1335_v38 }
 0x5af   : > { %v1314_v3 = vpop.f32.mrf.mxu3 }
 0x5b0   : > { %v1338_v44 = vsel %vm322_vm0, %v1314_v3, 0.0 }
 0x5b1   : > { %1339 = vadd.xlane.f32.xlu1 %v1338_v44 }
 0x5b7   : > { %v1317_v63 = vpop.f32.mrf.mxu3 }
 0x5b8   : > { %v1341_v18 = vsel %vm322_vm0, %v1317_v63, 0.0 }
 0x5b9   : > { %1342 = vadd.xlane.f32.xlu1 %v1341_v18 }
 0x5f4   : > { %v1322_v24 = vpop.xlane.xlu2 %1321 }
 0x5f5   : > { %v1344_v12 = vmul.f32 %v1322_v24, %v3477_v37 }
 0x5f7   : > { %v3692_v15 = vsub.f32 %v1296_v10, %v1344_v12 }
 0x5f9   : > { %v1360_v4 = vmul.f32 %v3692_v15, %v3692_v15 }
 0x5fb   : > { %v1368_v14 = vsel %vm322_vm0, %v1360_v4, 0.0 }
 0x5fc   : > { %v1325_v25 = vpop.xlane.xlu1 %1324  ;;  %1369 = vadd.xlane.f32.xlu2 %v1368_v14 }
 0x5fd   : > { %v1345_v23 = vmul.f32 %v1325_v25, %v3477_v37 }
 0x5ff   : > { %v3698_v29 = vsub.f32 %v1299_v13, %v1345_v23  ;;  %v2856_v13 = vld [vmem:[%s4313_s2 + $0x30] sm:$0xff] }
 0x600   : > { %1564 = vmatpush.msra.mxu1 %v2856_v13 }
 0x601   : > { %v1361_v30 = vmul.f32 %v3698_v29, %v3698_v29 }
 0x602   : > { %1565 = vmatpush.msra.mxu1 %v2855_v16 }
 0x603   : > { %v1371_v31 = vsel %vm322_vm0, %v1361_v30, 0.0  ;;  %v3755_v30 = vperm.slane %v3565_v21, 2 }
 0x604   : > { %1372 = vadd.xlane.f32.xlu2 %v1371_v31  ;;  %v1328_v33 = vpop.xlane.xlu2 %1327 }
 0x605   : > { %v1346_v35 = vmul.f32 %v1328_v33, %v3477_v37 }
 0x607   : > { %v3704_v36 = vsub.f32 %v1302_v17, %v1346_v35  ;;  %v2854_v17 = vld [vmem:[%s4313_s2 + $0x20] sm:$0xff]  ;;  %v3758_v35 = vperm.slane %v3565_v21, 3 }
 0x608   : > { %1566 = vmatpush.msra.mxu1 %v2854_v17  ;;  %v3140_v21 = vld [vmem:[%s3229_s18] sm:$0xff] }
 0x609   : > { %v1362_v5 = vmul.f32 %v3704_v36, %v3704_v36 }
 0x60b   : > { %v1374_v6 = vsel %vm322_vm0, %v1362_v5, 0.0 }
 0x60c   : > { %v1331_v27 = vpop.xlane.xlu1 %1330  ;;  %1375 = vadd.xlane.f32.xlu2 %v1374_v6 }
 0x60d   : > { %v1347_v40 = vmul.f32 %v1331_v27, %v3477_v37 }
 0x60f   : > { %v3710_v41 = vsub.f32 %v1305_v22, %v1347_v40 }
 0x611   : > { %v1363_v56 = vmul.f32 %v3710_v41, %v3710_v41 }
 0x613   : > { %v1377_v42 = vsel %vm322_vm0, %v1363_v56, 0.0 }
 0x614   : > { %1378 = vadd.xlane.f32.xlu1 %v1377_v42  ;;  %v1334_v7 = vpop.xlane.xlu2 %1333 }
 0x615   : > { %v1348_v46 = vmul.f32 %v1334_v7, %v3477_v37 }
 0x617   : > { %v3716_v48 = vsub.f32 %v1308_v20, %v1348_v46 }
 0x619   : > { %v1364_v49 = vmul.f32 %v3716_v48, %v3716_v48 }
 0x61b   : > { %v1380_v52 = vsel %vm322_vm0, %v1364_v49, 0.0 }
 0x61c   : > { %v1337_v53 = vpop.xlane.xlu1 %1336  ;;  %1381 = vadd.xlane.f32.xlu2 %v1380_v52 }
 0x61d   : > { %v1349_v54 = vmul.f32 %v1337_v53, %v3477_v37 }
 0x61f   : > { %v3722_v55 = vsub.f32 %v1311_v32, %v1349_v54 }
 0x621   : > { %v1365_v57 = vmul.f32 %v3722_v55, %v3722_v55 }
 0x623   : > { %v1383_v58 = vsel %vm322_vm0, %v1365_v57, 0.0 }
 0x624   : > { %v1340_v59 = vpop.xlane.xlu1 %1339  ;;  %1384 = vadd.xlane.f32.xlu1 %v1383_v58 }
 0x625   : > { %v1350_v39 = vmul.f32 %v1340_v59, %v3477_v37 }
 0x627   : > { %v3728_v61 = vsub.f32 %v1314_v3, %v1350_v39 }
 0x629   : > { %v1366_v60 = vmul.f32 %v3728_v61, %v3728_v61 }
 0x62b   : > { %v1386_v62 = vsel %vm322_vm0, %v1366_v60, 0.0 }
 0x62c   : > { %v1343_v8 = vpop.xlane.xlu1 %1342  ;;  %1387 = vadd.xlane.f32.xlu2 %v1386_v62 }
 0x62d   : > { %v1351_v0 = vmul.f32 %v1343_v8, %v3477_v37 }
 0x62f   : > { %v3734_v1 = vsub.f32 %v1317_v63, %v1351_v0 }
 0x631   : > { %v1367_v2 = vmul.f32 %v3734_v1, %v3734_v1 }
 0x633   : > { %v1389_v10 = vsel %vm322_vm0, %v1367_v2, 0.0 }
 0x634   : > { %1390 = vadd.xlane.f32.xlu1 %v1389_v10 }
 0x66f   : > { %v1370_v19 = vpop.xlane.xlu2 %1369 }
 0x670   : > { %v1392_v22 = vmul.f32 %v1370_v19, %v3477_v37 }
 0x672   : > { %v1400_v45 = vadd.f32 1e-05, %v1392_v22 }
 0x674   : > { %3053 = vrsqrt.f32 %v1400_v45  ;;  %vm1414_vm2 = vweird.f32 %v1400_v45 }
 0x677   : > { %v1373_v20 = vpop.xlane.xlu2 %1372 }
 0x678   : > { %v1393_v26 = vmul.f32 %v1373_v20, %v3477_v37 }
 0x67a   : > { %v3054_v32 = vpop.eup %3053  ;;  %v1401_v38 = vadd.f32 1e-05, %v1393_v26 }
 0x67b   : > { %v1409_v3 = vmul.f32 %v3054_v32, %v1400_v45  ;;  %vm1415_vm1 = vweird.f32 %v3054_v32 }
 0x67c   : > { %3055 = vrsqrt.f32 %v1401_v38  ;;  %vm1416_vm3 = vmor %vm1414_vm2, %vm1415_vm1  ;;  %vm1424_vm5 = vweird.f32 %v1401_v38 }
 0x67d   : > { %v1410_v44 = vmul.f32 %v3054_v32, %v1409_v3 }
 0x67f   : > { %v1411_v63 = vmul.f32 0.5, %v1410_v44  ;;  %v1376_v18 = vpop.xlane.xlu2 %1375 }
 0x680   : > { %v1394_v24 = vmul.f32 %v1376_v18, %v3477_v37 }
 0x681   : > { %v1412_v12 = vsub.f32 1.5, %v1411_v63 }
 0x682   : > { %v3056_v4 = vpop.eup %3055  ;;  %v1402_v14 = vadd.f32 1e-05, %v1394_v24 }
 0x683   : > { %v1413_v25 = vmul.f32 %v3054_v32, %v1412_v12  ;;  %v1419_v23 = vmul.f32 %v3056_v4, %v1401_v38  ;;  %vm1425_vm4 = vweird.f32 %v3056_v4 }
 0x684   : > { %3057 = vrsqrt.f32 %v1402_v14  ;;  %vm1426_vm6 = vmor %vm1424_vm5, %vm1425_vm4  ;;  %vm1434_vm9 = vweird.f32 %v1402_v14 }
 0x685   : > { %v1417_v31 = vsel %vm1416_vm3, %v3054_v32, %v1413_v25  ;;  %v1420_v33 = vmul.f32 %v3056_v4, %v1419_v23 }
 0x686   : > { %v1488_v5 = vmul.f32 %v1417_v31, %v3692_v15 }
 0x687   : > { %v1421_v6 = vmul.f32 0.5, %v1420_v33  ;;  %v1379_v27 = vpop.xlane.xlu1 %1378 }
 0x688   : > { %v1497_v40 = vmul.f32 %v3755_v30, %v1488_v5  ;;  %v1395_v56 = vmul.f32 %v1379_v27, %v3477_v37 }
 0x689   : > { %v1422_v42 = vsub.f32 1.5, %v1421_v6 }
 0x68a   : > { %v3058_v7 = vpop.eup %3057  ;;  %v1506_v46 = vadd.f32 %v3758_v35, %v1497_v40  ;;  %v1403_v49 = vadd.f32 1e-05, %v1395_v56 }
 0x68b   : > { %v1423_v52 = vmul.f32 %v3056_v4, %v1422_v42  ;;  %v1429_v53 = vmul.f32 %v3058_v7, %v1402_v14  ;;  %vm1435_vm8 = vweird.f32 %v3058_v7 }
 0x68c   : > { %3059 = vrsqrt.f32 %v1403_v49  ;;  %v3765_v54 = vadd.f32 %v3140_v21, %v1506_v46  ;;  %vm1436_vm11 = vmor %vm1434_vm9, %vm1435_vm8  ;;  %vm1444_vm13 = vweird.f32 %v1403_v49 }
 0x68d   : > { %v1427_v15 = vsel %vm1426_vm6, %v3056_v4, %v1423_v52  ;;  %v1430_v57 = vmul.f32 %v3058_v7, %v1429_v53 }
 0x68e   : > { %v1489_v58 = vmul.f32 %v1427_v15, %v3698_v29  ;;  %2858 = vmatmul.msk.f32.vlgmr.msra.gmra.mxu1 %vm322_vm0, %v3765_v54  ;;  %v3141_v29 = vld [vmem:[%s3229_s18 + $0x8] sm:$0xff] }
 0x68f   : > { %v1431_v59 = vmul.f32 0.5, %v1430_v57  ;;  %v1382_v39 = vpop.xlane.xlu2 %1381 }
 0x690   : > { %v1396_v60 = vmul.f32 %v1382_v39, %v3477_v37  ;;  %v1498_v62 = vmul.f32 %v3755_v30, %v1489_v58 }
 0x691   : > { %v1432_v8 = vsub.f32 1.5, %v1431_v59 }
 0x692   : > { %v3060_v0 = vpop.eup %3059  ;;  %v1404_v2 = vadd.f32 1e-05, %v1396_v60  ;;  %v1507_v10 = vadd.f32 %v3758_v35, %v1498_v62 }
 0x693   : > { %v1433_v11 = vmul.f32 %v3058_v7, %v1432_v8  ;;  %v1439_v13 = vmul.f32 %v3060_v0, %v1403_v49  ;;  %vm1445_vm12 = vweird.f32 %v3060_v0 }
 0x694   : > { %3061 = vrsqrt.f32 %v1404_v2  ;;  %v3774_v16 = vadd.f32 %v3141_v29, %v1507_v10  ;;  %vm1446_vm14 = vmor %vm1444_vm13, %vm1445_vm12  ;;  %vm1454_vm1 = vweird.f32 %v1404_v2 }
 0x695   : > { %v1437_v17 = vsel %vm1436_vm11, %v3058_v7, %v1433_v11  ;;  %v1440_v19 = vmul.f32 %v3060_v0, %v1439_v13 }
 0x696   : > { %v1490_v22 = vmul.f32 %v1437_v17, %v3704_v36  ;;  %2859 = vmatmul.msk.f32.gmra.mxu1 %vm322_vm0, %v3774_v16  ;;  %v3142_v36 = vld [vmem:[%s3229_s18 + $0x10] sm:$0xff] }
 0x697   : > { %v1441_v45 = vmul.f32 0.5, %v1440_v19  ;;  %v1385_v20 = vpop.xlane.xlu1 %1384 }
 0x698   : > { %v1397_v26 = vmul.f32 %v1385_v20, %v3477_v37  ;;  %v1499_v32 = vmul.f32 %v3755_v30, %v1490_v22 }
 0x699   : > { %v1442_v38 = vsub.f32 1.5, %v1441_v45 }
 0x69a   : > { %v3062_v3 = vpop.eup %3061  ;;  %v1405_v44 = vadd.f32 1e-05, %v1397_v26  ;;  %v1508_v63 = vadd.f32 %v3758_v35, %v1499_v32 }
 0x69b   : > { %v1443_v18 = vmul.f32 %v3060_v0, %v1442_v38  ;;  %v1449_v24 = vmul.f32 %v3062_v3, %v1404_v2  ;;  %vm1455_vm15 = vweird.f32 %v3062_v3 }
 0x69c   : > { %3063 = vrsqrt.f32 %v1405_v44  ;;  %v3783_v12 = vadd.f32 %v3142_v36, %v1508_v63  ;;  %vm1456_vm2 = vmor %vm1454_vm1, %vm1455_vm15  ;;  %vm1464_vm4 = vweird.f32 %v1405_v44 }
 0x69d   : > { %v1447_v4 = vsel %vm1446_vm14, %v3060_v0, %v1443_v18  ;;  %v1450_v14 = vmul.f32 %v3062_v3, %v1449_v24 }
 0x69e   : > { %v1491_v25 = vmul.f32 %v1447_v4, %v3710_v41  ;;  %2860 = vmatmul.msk.f32.gmra.mxu1 %vm322_vm0, %v3783_v12  ;;  %v3143_v41 = vld [vmem:[%s3229_s18 + $0x18] sm:$0xff] }
 0x69f   : > { %v1451_v23 = vmul.f32 0.5, %v1450_v14  ;;  %v1388_v31 = vpop.xlane.xlu2 %1387 }
 0x6a0   : > { %v1398_v33 = vmul.f32 %v1388_v31, %v3477_v37  ;;  %v1500_v5 = vmul.f32 %v3755_v30, %v1491_v25 }
 0x6a1   : > { %v1452_v6 = vsub.f32 1.5, %v1451_v23 }
 0x6a2   : > { %v3064_v27 = vpop.eup %3063  ;;  %v1406_v40 = vadd.f32 1e-05, %v1398_v33  ;;  %v1509_v56 = vadd.f32 %v3758_v35, %v1500_v5 }
 0x6a3   : > { %v1453_v42 = vmul.f32 %v3062_v3, %v1452_v6  ;;  %v1459_v7 = vmul.f32 %v3064_v27, %v1405_v44  ;;  %vm1465_vm3 = vweird.f32 %v3064_v27 }
 0x6a4   : > { %3065 = vrsqrt.f32 %v1406_v40  ;;  %v3792_v46 = vadd.f32 %v3143_v41, %v1509_v56  ;;  %vm1466_vm5 = vmor %vm1464_vm4, %vm1465_vm3  ;;  %vm1474_vm8 = vweird.f32 %v1406_v40 }
 0x6a5   : > { %v1457_v49 = vsel %vm1456_vm2, %v3062_v3, %v1453_v42  ;;  %v1460_v52 = vmul.f32 %v3064_v27, %v1459_v7 }
 0x6a6   : > { %v1492_v53 = vmul.f32 %v1457_v49, %v3716_v48  ;;  %2861 = vmatmul.msk.f32.gmra.mxu1 %vm322_vm0, %v3792_v46  ;;  %v3144_v48 = vld [vmem:[%s3229_s18 + $0x20] sm:$0xff] }
 0x6a7   : > { %v1461_v21 = vmul.f32 0.5, %v1460_v52  ;;  %v1391_v15 = vpop.xlane.xlu1 %1390 }
 0x6a8   : > { %v1399_v57 = vmul.f32 %v1391_v15, %v3477_v37  ;;  %v1501_v58 = vmul.f32 %v3755_v30, %v1492_v53 }
 0x6a9   : > { %v1462_v59 = vsub.f32 1.5, %v1461_v21 }
 0x6aa   : > { %v3066_v39 = vpop.eup %3065  ;;  %v1407_v60 = vadd.f32 1e-05, %v1399_v57  ;;  %v1510_v62 = vadd.f32 %v3758_v35, %v1501_v58 }
 0x6ab   : > { %v1463_v8 = vmul.f32 %v3064_v27, %v1462_v59  ;;  %v1469_v0 = vmul.f32 %v3066_v39, %v1406_v40  ;;  %vm1475_vm6 = vweird.f32 %v3066_v39 }
 0x6ac   : > { %3067 = vrsqrt.f32 %v1407_v60  ;;  %v3801_v2 = vadd.f32 %v3144_v48, %v1510_v62  ;;  %vm1476_vm9 = vmor %vm1474_vm8, %vm1475_vm6  ;;  %vm1484_vm12 = vweird.f32 %v1407_v60 }
 0x6ad   : > { %v1467_v10 = vsel %vm1466_vm5, %v3064_v27, %v1463_v8  ;;  %v1470_v11 = vmul.f32 %v3066_v39, %v1469_v0 }
 0x6ae   : > { %v1493_v13 = vmul.f32 %v1467_v10, %v3722_v55  ;;  %2862 = vmatmul.msk.f32.gmra.mxu1 %vm322_vm0, %v3801_v2 }
 0x6af   : > { %v1471_v29 = vmul.f32 0.5, %v1470_v11 }
 0x6b0   : > { %v1502_v17 = vmul.f32 %v3755_v30, %v1493_v13 }
 0x6b1   : > { %v1472_v19 = vsub.f32 1.5, %v1471_v29 }
 0x6b2   : > { %v3068_v22 = vpop.eup %3067  ;;  %v1511_v45 = vadd.f32 %v3758_v35, %v1502_v17 }
 0x6b3   : > { %v1473_v20 = vmul.f32 %v3066_v39, %v1472_v19  ;;  %v1479_v26 = vmul.f32 %v3068_v22, %v1407_v60  ;;  %vm1485_vm11 = vweird.f32 %v3068_v22 }
 0x6b4   : > { %v3809_v32 = vadd.f32 %v3582_v9, %v1511_v45  ;;  %vm1486_vm13 = vmor %vm1484_vm12, %vm1485_vm11 }
 0x6b5   : > { %v1477_v38 = vsel %vm1476_vm9, %v3066_v39, %v1473_v20  ;;  %v1480_v55 = vmul.f32 %v3068_v22, %v1479_v26 }
 0x6b6   : > { %v1494_v3 = vmul.f32 %v1477_v38, %v3728_v61  ;;  %2863 = vmatmul.msk.f32.gmra.mxu1 %vm322_vm0, %v3809_v32 }
 0x6b7   : > { %v1481_v44 = vmul.f32 0.5, %v1480_v55 }
 0x6b8   : > { %v1503_v63 = vmul.f32 %v3755_v30, %v1494_v3 }
 0x6b9   : > { %v1482_v18 = vsub.f32 1.5, %v1481_v44 }
 0x6ba   : > { %v1512_v24 = vadd.f32 %v3758_v35, %v1503_v63 }
 0x6bb   : > { %v1483_v36 = vmul.f32 %v3068_v22, %v1482_v18 }
 0x6bc   : > { %v3817_v9 = vadd.f32 %v3592_v50, %v1512_v24 }
 0x6bd   : > { %v1487_v4 = vsel %vm1486_vm13, %v3068_v22, %v1483_v36 }
 0x6be   : > { %v1495_v14 = vmul.f32 %v1487_v4, %v3734_v1  ;;  %2864 = vmatmul.msk.f32.gmra.mxu1 %vm322_vm0, %v3817_v9 }
 0x6c0   : > { %v1504_v61 = vmul.f32 %v3755_v30, %v1495_v14 }
 0x6c2   : > { %v1513_v25 = vadd.f32 %v3758_v35, %v1504_v61 }
 0x6c4   : > { %v3825_v23 = vadd.f32 %v3602_v34, %v1513_v25 }
 0x6c6   : > { %2865 = vmatmul.msk.f32.gmra.mxu1 %vm322_vm0, %v3825_v23 }
 0x70b   : > { %v3829_v31 = vpop.f32.mrf.mxu1 }
 0x70c   : > { %v1608_v50 = vmin.f32 %v3829_v31, 0.0  ;;  %v1600_v35 = vadd.f32 1.0, %v3829_v31  ;;  %vm1592_vm14 = vcmp.gt.f32.partialorder %v3829_v31, 0.0 }
 0x70e   : > { %v1616_v33 = vmul.f32 1.442695, %v1608_v50 }
 0x710   : > { %3069 = vpow2.f32 %v1616_v33 }
 0x713   : > { %v3832_v1 = vpop.f32.mrf.mxu1 }
 0x714   : > { %v1609_v5 = vmin.f32 %v3832_v1, 0.0  ;;  %v2998_v30 = vpack.i.bf16 %v3829_v31, %v3832_v1  ;;  %v1601_v42 = vadd.f32 1.0, %v3832_v1  ;;  %vm1593_vm15 = vcmp.gt.f32.partialorder %v3832_v1, 0.0 }
 0x716   : > { %v3070_v34 = vpop.eup %3069  ;;  %v1618_v6 = vmul.f32 1.442695, %v1609_v5 }
 0x717   : > { %v3839_v27 = vsel %vm1592_vm14, %v1600_v35, %v3070_v34 }
 0x718   : > { %3071 = vpow2.f32 %v1618_v6  ;;  %1648 = vrot.lane.b32.xlu2 %v3839_v27, %s3153_s19  ;;  %v1781_v44 = vsel %vm578_vm7, %v3839_v27, 0.0 }
 0x71b   : > { %v3843_v40 = vpop.f32.mrf.mxu1 }
 0x71c   : > { %v1610_v56 = vmin.f32 %v3843_v40, 0.0  ;;  %v1602_v21 = vadd.f32 1.0, %v3843_v40  ;;  %vm1594_vm1 = vcmp.gt.f32.partialorder %v3843_v40, 0.0 }
 0x71e   : > { %v3072_v7 = vpop.eup %3071  ;;  %v1620_v41 = vmul.f32 1.442695, %v1610_v56 }
 0x71f   : > { %v3848_v49 = vsel %vm1593_vm15, %v1601_v42, %v3072_v7 }
 0x720   : > { %3073 = vpow2.f32 %v1620_v41  ;;  %1650 = vrot.lane.b32.xlu1 %v3848_v49, %s3153_s19  ;;  %v1782_v55 = vsel %vm578_vm7, %v3848_v49, 0.0 }
 0x721   : > { %v1783_v24 = vadd.f32 %v1782_v55, %v1781_v44 }
 0x723   : > { %v3852_v52 = vpop.f32.mrf.mxu1 }
 0x724   : > { %v1611_v53 = vmin.f32 %v3852_v52, 0.0  ;;  %v1603_v60 = vadd.f32 1.0, %v3852_v52  ;;  %vm1595_vm2 = vcmp.gt.f32.partialorder %v3852_v52, 0.0 }
 0x726   : > { %v3074_v15 = vpop.eup %3073  ;;  %v1622_v57 = vmul.f32 1.442695, %v1611_v53 }
 0x727   : > { %v3857_v58 = vsel %vm1594_vm1, %v1602_v21, %v3074_v15  ;;  %v2993_v21 = vpack.i.bf16 %v3843_v40, %v3852_v52 }
 0x728   : > { %3075 = vpow2.f32 %v1622_v57  ;;  %1652 = vrot.lane.b32.xlu2 %v3857_v58, %s3153_s19  ;;  %v1784_v63 = vsel %vm578_vm7, %v3857_v58, 0.0 }
 0x729   : > { %v1785_v50 = vadd.f32 %v1784_v63, %v1783_v24 }
 0x72b   : > { %v1580_v59 = vpop.f32.mrf.mxu1 }
 0x72c   : > { %v1612_v39 = vmin.f32 %v1580_v59, 0.0  ;;  %v1604_v11 = vadd.f32 1.0, %v1580_v59  ;;  %vm1596_vm3 = vcmp.gt.f32.partialorder %v1580_v59, 0.0 }
 0x72e   : > { %v3076_v62 = vpop.eup %3075  ;;  %v1624_v8 = vmul.f32 1.442695, %v1612_v39 }
 0x72f   : > { %v3863_v0 = vsel %vm1595_vm2, %v1603_v60, %v3076_v62 }
 0x730   : > { %3077 = vpow2.f32 %v1624_v8  ;;  %1654 = vrot.lane.b32.xlu1 %v3863_v0, %s3153_s19  ;;  %v1786_v14 = vsel %vm578_vm7, %v3863_v0, 0.0 }
 0x731   : > { %v1787_v35 = vadd.f32 %v1786_v14, %v1785_v50 }
 0x733   : > { %v1583_v48 = vpop.f32.mrf.mxu1 }
 0x734   : > { %v1613_v10 = vmin.f32 %v1583_v48, 0.0  ;;  %v1605_v45 = vadd.f32 1.0, %v1583_v48  ;;  %vm1597_vm4 = vcmp.gt.f32.partialorder %v1583_v48, 0.0  ;;  %v2988_v53 = vpack.i.bf16 %v1580_v59, %v1583_v48 }
 0x736   : > { %v3078_v13 = vpop.eup %3077  ;;  %v1626_v29 = vmul.f32 1.442695, %v1613_v10 }
 0x737   : > { %v3867_v17 = vsel %vm1596_vm3, %v1604_v11, %v3078_v13 }
 0x738   : > { %3079 = vpow2.f32 %v1626_v29  ;;  %1656 = vrot.lane.b32.xlu2 %v3867_v17, %s3153_s19  ;;  %v1788_v5 = vsel %vm578_vm7, %v3867_v17, 0.0 }
 0x739   : > { %v1789_v6 = vadd.f32 %v1788_v5, %v1787_v35 }
 0x73b   : > { %v1586_v19 = vpop.f32.mrf.mxu1 }
 0x73c   : > { %v1614_v22 = vmin.f32 %v1586_v19, 0.0  ;;  %v1606_v36 = vadd.f32 1.0, %v1586_v19  ;;  %vm1598_vm5 = vcmp.gt.f32.partialorder %v1586_v19, 0.0 }
 0x73e   : > { %v3080_v20 = vpop.eup %3079  ;;  %v1628_v26 = vmul.f32 1.442695, %v1614_v22 }
 0x73f   : > { %v3871_v38 = vsel %vm1597_vm4, %v1605_v45, %v3080_v20 }
 0x740   : > { %3081 = vpow2.f32 %v1628_v26  ;;  %1658 = vrot.lane.b32.xlu1 %v3871_v38, %s3153_s19  ;;  %v1790_v34 = vsel %vm578_vm7, %v3871_v38, 0.0 }
 0x741   : > { %v1791_v42 = vadd.f32 %v1790_v34, %v1789_v6 }
 0x743   : > { %v1589_v3 = vpop.f32.mrf.mxu1 }
 0x744   : > { %v1615_v18 = vmin.f32 %v1589_v3, 0.0  ;;  %v2983_v25 = vpack.i.bf16 %v1586_v19, %v1589_v3  ;;  %v1607_v7 = vadd.f32 1.0, %v1589_v3  ;;  %vm1599_vm6 = vcmp.gt.f32.partialorder %v1589_v3, 0.0 }
 0x746   : > { %v3082_v4 = vpop.eup %3081  ;;  %v1630_v61 = vmul.f32 1.442695, %v1615_v18 }
 0x747   : > { %v3883_v33 = vsel %vm1598_vm5, %v1606_v36, %v3082_v4 }
 0x748   : > { %3083 = vpow2.f32 %v1630_v61  ;;  %1660 = vrot.lane.b32.xlu2 %v3883_v33, %s3153_s19  ;;  %2984 = vrot.lane.b32.xlu1 %v2983_v25, %s3154_s20  ;;  %v1792_v56 = vsel %vm578_vm7, %v3883_v33, 0.0 }
 0x749   : > { %v1793_v15 = vadd.f32 %v1792_v56, %v1791_v42 }
 0x74e   : > { %v3084_v41 = vpop.eup %3083 }
 0x74f   : > { %v3896_v57 = vsel %vm1599_vm6, %v1607_v7, %v3084_v41 }
 0x750   : > { %2989 = vrot.lane.b32.xlu2 %v2988_v53, %s3154_s20  ;;  %2994 = vrot.lane.b32.xlu1 %v2993_v21, %s3154_s20  ;;  %v1794_v39 = vsel %vm578_vm7, %v3896_v57, 0.0 }
 0x751   : > { %1662 = vrot.lane.b32.xlu0 %v3896_v57, %s3153_s19  ;;  %v1795_v60 = vadd.f32 %v1794_v39, %v1793_v15 }
 0x753   : > { %v1796_v62 = vrot.slane %v1795_v60, 4 }
 0x755   : > { %v1797_v59 = vadd.f32 %v1796_v62, %v1795_v60 }
 0x757   : > { %v1798_v8 = vrot.slane %v1797_v59, 2 }
 0x758   : > { %2999 = vrot.lane.b32.xlu2 %v2998_v30, %s3154_s20 }
 0x759   : > { %v1799_v40 = vadd.f32 %v1798_v8, %v1797_v59 }
 0x75b   : > { %v1800_v52 = vrot.slane %v1799_v40, 1 }
 0x75d   : > { %v1801_v48 = vadd.f32 %v1800_v52, %v1799_v40 }
 0x75f   : > { %1860 = vrot.lane.b32.xlu0 %v1801_v48, %s3153_s19 }
 0x772   : > { %v1649_v10 = vpop.permute.xlu2 %1648 }
 0x782   : > { %v1653_v13 = vpop.permute.xlu2 %1652 }
 0x785   : > { %1672 = vxpose.xlu1.b32.start [1/8] (short) (narrow) %v1649_v10, 32 }
 0x792   : > { %v1651_v11 = vpop.permute.xlu1 %1650  ;;  %v1657_v19 = vpop.permute.xlu2 %1656 }
 0x793   : > { %1673 = vxpose.xlu1.b32.cont [2/8] (short) (narrow) %v1651_v11, 32 }
 0x79b   : > { %1674 = vxpose.xlu1.b32.cont [3/8] (short) (narrow) %v1653_v13, 32 }
 0x7a2   : > { %v1655_v29 = vpop.permute.xlu1 %1654  ;;  %v1661_v22 = vpop.permute.xlu2 %1660 }
 0x7a3   : > { %1675 = vxpose.xlu1.b32.cont [4/8] (short) (narrow) %v1655_v29, 32 }
 0x7aa   : > { %v2990_v31 = vpop.permute.xlu2 %2989 }
 0x7ab   : > { %1676 = vxpose.xlu1.b32.cont [5/8] (short) (narrow) %v1657_v19, 32  ;;  %v2991_v26 = vunpack.i.l.bf16 %v2990_v31  ;;  %v2992_v55 = vunpack.i.h.bf16 %v2990_v31 }
 0x7b2   : > { %v1659_v45 = vpop.permute.xlu1 %1658  ;;  %v3000_v18 = vpop.permute.xlu2 %2999 }
 0x7b3   : > { %1677 = vxpose.xlu1.b32.cont [6/8] (short) (narrow) %v1659_v45, 32  ;;  %v3001_v36 = vunpack.i.l.bf16 %v3000_v18  ;;  %v3002_v4 = vunpack.i.h.bf16 %v3000_v18 }
 0x7ba   : > { %v2985_v1 = vpop.permute.xlu1 %2984 }
 0x7bb   : > { %v2986_v30 = vunpack.i.l.bf16 %v2985_v1  ;;  %1678 = vxpose.xlu1.b32.cont [7/8] (short) (narrow) %v1661_v22, 32  ;;  %v2987_v20 = vunpack.i.h.bf16 %v2985_v1 }
 0x7bd   : > { %1756 = vmatpush.msra.mxu0 %v2986_v30 }
 0x7bf   : > { %1757 = vmatpush.msra.mxu0 %v2987_v20 }
 0x7c1   : > { %1758 = vmatpush.msra.mxu0 %v2991_v26 }
 0x7c2   : > { %v2995_v3 = vpop.permute.xlu1 %2994 }
 0x7c3   : > { %v2996_v44 = vunpack.i.l.bf16 %v2995_v3  ;;  %v1663_v63 = vpop.permute.xlu0 %1662  ;;  %1759 = vmatpush.msra.mxu0 %v2992_v55  ;;  %v2997_v24 = vunpack.i.h.bf16 %v2995_v3 }
 0x7c4   : > { %1679 = vxpose.xlu1.b32.end [8/8] (short) (narrow) %v1663_v63, 32 }
 0x7c5   : > { %1760 = vmatpush.msra.mxu0 %v2996_v44 }
 0x7c7   : > { %1761 = vmatpush.msra.mxu0 %v2997_v24 }
 0x7c9   : > { %1762 = vmatpush.msra.mxu0 %v3001_v36 }
 0x7cb   : > { %1763 = vmatpush.msra.mxu0 %v3002_v4 }
 0x7d1   : > { %v1861_v14 = vpop.permute.xlu0 %1860 }
 0x7d2   : > { %v1863_v61 = vmul.f32 %v1861_v14, %v3839_v27  ;;  %v1864_v25 = vmul.f32 %v1861_v14, %v3848_v49  ;;  %v1865_v50 = vmul.f32 %v1861_v14, %v3857_v58  ;;  %v1866_v5 = vmul.f32 %v1861_v14, %v3863_v0 }
 0x7d3   : > { %v1867_v35 = vmul.f32 %v1861_v14, %v3867_v17  ;;  %v1868_v34 = vmul.f32 %v1861_v14, %v3871_v38  ;;  %v1869_v6 = vmul.f32 %v1861_v14, %v3883_v33  ;;  %v1870_v56 = vmul.f32 %v1861_v14, %v3896_v57 }
 0x7d4   : > { %2878 = vmatmul.msk.f32.vlgmr.msra.gmra.mxu3 %vm322_vm0, %v1863_v61 }
 0x7dc   : > { %2879 = vmatmul.msk.f32.gmra.mxu3 %vm322_vm0, %v1864_v25 }
 0x7e4   : > { %2880 = vmatmul.msk.f32.gmra.mxu3 %vm322_vm0, %v1865_v50 }
 0x7ec   : > { %2881 = vmatmul.msk.f32.gmra.mxu3 %vm322_vm0, %v1866_v5 }
 0x7f4   : > { %2882 = vmatmul.msk.f32.gmra.mxu3 %vm322_vm0, %v1867_v35 }
 0x7fc   : > { %2883 = vmatmul.msk.f32.gmra.mxu3 %vm322_vm0, %v1868_v34 }
 0x804   : > { %2884 = vmatmul.msk.f32.gmra.mxu3 %vm322_vm0, %v1869_v6 }
 0x80c   : > { %2885 = vmatmul.msk.f32.gmra.mxu3 %vm322_vm0, %v1870_v56 }
 0x830   : > { %v1688_v42 = vpop.trf.xlu1 }
 0x831   : > { %2866 = vmatmul.msk.f32.vlgmr.msra.gmra.mxu0 %vm532_vm10, %v1688_v42 }
 0x838   : > { %v1689_v7 = vpop.trf.xlu1 }
 0x839   : > { %2867 = vmatmul.msk.f32.gmra.mxu0 %vm532_vm10, %v1689_v7 }
 0x840   : > { %v1690_v41 = vpop.trf.xlu1 }
 0x841   : > { %2868 = vmatmul.msk.f32.gmra.mxu0 %vm532_vm10, %v1690_v41 }
 0x848   : > { %v1691_v53 = vpop.trf.xlu1 }
 0x849   : > { %2869 = vmatmul.msk.f32.gmra.mxu0 %vm532_vm10, %v1691_v53 }
 0x8ae   : > { %v1765_v21 = vpop.f32.mrf.mxu0 }
 0x8af   : > { %v1777_v40 = vmul.f32 %v3672_v28, %v1765_v21  ;;  %v2899_v28 = vld [vmem:[%s4315_s4 + $0x20] sm:$0xff] }
 0x8b6   : > { %v1768_v15 = vpop.f32.mrf.mxu0 }
 0x8b7   : > { %v1778_v8 = vmul.f32 %v3666_v51, %v1768_v15  ;;  %v2900_v51 = vld [vmem:[%s4315_s4 + $0x28] sm:$0xff] }
 0x8be   : > { %v1771_v39 = vpop.f32.mrf.mxu0 }
 0x8bf   : > { %v1779_v59 = vmul.f32 %v3660_v47, %v1771_v39  ;;  %v2901_v47 = vld [vmem:[%s4315_s4 + $0x30] sm:$0xff] }
 0x8c6   : > { %v1774_v60 = vpop.f32.mrf.mxu0 }
 0x8c7   : > { %v1780_v62 = vmul.f32 %v3654_v43, %v1774_v60  ;;  %v2902_v43 = vld [vmem:[%s4315_s4 + $0x38] sm:$0xff] }
 0x8c9   : > { %1830 = vmatpush.msra.mxu2 %v1780_v62 }
 0x8cb   : > { %1831 = vmatpush.msra.mxu2 %v1779_v59 }
 0x8cd   : > { %1832 = vmatpush.msra.mxu2 %v1778_v8 }
 0x8cf   : > { %1833 = vmatpush.msra.mxu2 %v1777_v40 }
 0x8d0   : > { %2870 = vmatmul.msk.f32.vlgmr.msra.gmra.mxu2 %vm322_vm0, %v3839_v27  ;;  %v1912_v27 = vpop.f32.mrf.mxu3 }
 0x8d1   : > { %2409 = vmatpush.msrb.mxu2 %v2902_v43 }
 0x8d3   : > { %2410 = vmatpush.msrb.mxu2 %v2901_v47 }
 0x8d5   : > { %2411 = vmatpush.msrb.mxu2 %v2900_v51 }
 0x8d7   : > { %2412 = vmatpush.msrb.mxu2 %v2899_v28 }
 0x8d8   : > { %2871 = vmatmul.msk.f32.gmra.mxu2 %vm322_vm0, %v3848_v49  ;;  %v2889_v49 = vld [vmem:[%s4314_s3 + $0x38] sm:$0xff] }
 0x8d9   : > { %2097 = vmatpush.msrb.mxu0 %v2889_v49 }
 0x8e0   : > { %2872 = vmatmul.msk.f32.gmra.mxu2 %vm322_vm0, %v3857_v58  ;;  %v2888_v58 = vld [vmem:[%s4314_s3 + $0x30] sm:$0xff] }
 0x8e1   : > { %2098 = vmatpush.msrb.mxu0 %v2888_v58 }
 0x8e8   : > { %2873 = vmatmul.msk.f32.gmra.mxu2 %vm322_vm0, %v3863_v0  ;;  %v1915_v0 = vpop.f32.mrf.mxu3 }
 0x8e9   : > { %v1916_v52 = vadd.f32 1e-06, %v1915_v0 }
 0x8eb   : > { %v1962_v34 = vand.u32 2147483648, %v1916_v52  ;;  %vm1956_vm13 = vweird.f32 %v1916_v52  ;;  %v1960_v6 = vand.u32 2147483647, %v1916_v52 }
 0x8ed   : > { %v1963_v41 = vor.u32 1.1754944e-38, %v1962_v34  ;;  %vm1961_vm15 = vcmp.eq.f32.partialorder %v1960_v6, 8.507059e+37 }
 0x8f0   : > { %2874 = vmatmul.msk.f32.gmra.mxu2 %vm322_vm0, %v3867_v17  ;;  %v2887_v17 = vld [vmem:[%s4314_s3 + $0x28] sm:$0xff] }
 0x8f1   : > { %2099 = vmatpush.msrb.mxu0 %v2887_v17 }
 0x8f8   : > { %2875 = vmatmul.msk.f32.gmra.mxu2 %vm322_vm0, %v3871_v38  ;;  %v1913_v38 = vadd.f32 1e-06, %v1912_v27 }
 0x8fa   : > { %3085 = vrcp.f32 %v1913_v38  ;;  %v1947_v55 = vand.u32 2147483648, %v1913_v38  ;;  %vm1941_vm8 = vweird.f32 %v1913_v38  ;;  %v1945_v3 = vand.u32 2147483647, %v1913_v38 }
 0x8fb   : > { %3087 = vrcp.f32 %v1916_v52 }
 0x8fc   : > { %v1948_v24 = vor.u32 1.1754944e-38, %v1947_v55  ;;  %vm1946_vm11 = vcmp.eq.f32.partialorder %v1945_v3, 8.507059e+37 }
 0x900   : > { %2876 = vmatmul.msk.f32.gmra.mxu2 %vm322_vm0, %v3883_v33  ;;  %v2886_v33 = vld [vmem:[%s4314_s3 + $0x20] sm:$0xff]  ;;  %v3086_v48 = vpop.eup %3085 }
 0x901   : > { %2100 = vmatpush.msrb.mxu0 %v2886_v33  ;;  %v1937_v11 = vmul.f32 %v3086_v48, %v1913_v38  ;;  %v3088_v19 = vpop.eup %3087  ;;  %vm1942_vm7 = vweird.f32 %v3086_v48 }
 0x902   : > { %v1952_v45 = vmul.f32 %v3088_v19, %v1916_v52  ;;  %vm1943_vm9 = vmor %vm1941_vm8, %vm1942_vm7  ;;  %vm1957_vm12 = vweird.f32 %v3088_v19 }
 0x903   : > { %v1938_v29 = vsub.f32 1.0, %v1937_v11  ;;  %vm1958_vm14 = vmor %vm1956_vm13, %vm1957_vm12 }
 0x904   : > { %v1953_v20 = vsub.f32 1.0, %v1952_v45 }
 0x905   : > { %v1939_v22 = vmul.f32 %v3086_v48, %v1938_v29 }
 0x906   : > { %v1954_v63 = vmul.f32 %v3088_v19, %v1953_v20 }
 0x907   : > { %v1940_v30 = vadd.f32 %v3086_v48, %v1939_v22 }
 0x908   : > { %2877 = vmatmul.msk.f32.gmra.mxu2 %vm322_vm0, %v3896_v57  ;;  %v1918_v57 = vpop.f32.mrf.mxu3  ;;  %v1955_v50 = vadd.f32 %v3088_v19, %v1954_v63 }
 0x909   : > { %v1919_v13 = vadd.f32 1e-06, %v1918_v57  ;;  %v1944_v44 = vsel %vm1943_vm9, %v3086_v48, %v1940_v30 }
 0x90a   : > { %v1949_v14 = vsel %vm1946_vm11, %v1948_v24, %v1944_v44  ;;  %v1959_v56 = vsel %vm1958_vm14, %v3088_v19, %v1955_v50 }
 0x90b   : > { %3089 = vrcp.f32 %v1919_v13  ;;  %v1964_v15 = vsel %vm1961_vm15, %v1963_v41, %v1959_v56  ;;  %v1977_v8 = vand.u32 2147483648, %v1919_v13  ;;  %vm1971_vm2 = vweird.f32 %v1919_v13 }
 0x90c   : > { %v1975_v43 = vand.u32 2147483647, %v1919_v13 }
 0x90d   : > { %v1978_v27 = vor.u32 1.1754944e-38, %v1977_v8 }
 0x90e   : > { %vm1976_vm4 = vcmp.eq.f32.partialorder %v1975_v43, 8.507059e+37 }
 0x910   : > { %2915 = vmatmul.msk.f32.vlgmr.msrb.gmra.mxu2 %vm322_vm0, %v3765_v54  ;;  %v1921_v10 = vpop.f32.mrf.mxu3 }
 0x911   : > { %v3989_v1 = vadd.f32 1e-06, %v1921_v10  ;;  %v3090_v26 = vpop.eup %3089 }
 0x912   : > { %v1967_v18 = vmul.f32 %v3090_v26, %v1919_v13  ;;  %vm1972_vm1 = vweird.f32 %v3090_v26 }
 0x913   : > { %3091 = vrcp.f32 %v3989_v1  ;;  %vm1973_vm3 = vmor %vm1971_vm2, %vm1972_vm1  ;;  %v1992_v52 = vand.u32 2147483648, %v3989_v1  ;;  %vm1986_vm6 = vweird.f32 %v3989_v1  ;;  %v1990_v48 = vand.u32 2147483647, %v3989_v1 }
 0x914   : > { %v1968_v5 = vsub.f32 1.0, %v1967_v18 }
 0x915   : > { %v1993_v19 = vor.u32 1.1754944e-38, %v1992_v52  ;;  %vm1991_vm8 = vcmp.eq.f32.partialorder %v1990_v48, 8.507059e+37 }
 0x916   : > { %v1969_v42 = vmul.f32 %v3090_v26, %v1968_v5 }
 0x918   : > { %2916 = vmatmul.msk.f32.gmra.mxu2 %vm322_vm0, %v3774_v16  ;;  %v1924_v31 = vpop.f32.mrf.mxu3  ;;  %v1970_v60 = vadd.f32 %v3090_v26, %v1969_v42 }
 0x919   : > { %v3992_v36 = vadd.f32 1e-06, %v1924_v31  ;;  %v3092_v35 = vpop.eup %3091 }
 0x91a   : > { %v1982_v7 = vmul.f32 %v3092_v35, %v3989_v1  ;;  %v1974_v47 = vsel %vm1973_vm3, %v3090_v26, %v1970_v60  ;;  %vm1987_vm5 = vweird.f32 %v3092_v35 }
 0x91b   : > { %3093 = vrcp.f32 %v3992_v36  ;;  %v1979_v0 = vsel %vm1976_vm4, %v1978_v27, %v1974_v47  ;;  %vm1988_vm7 = vmor %vm1986_vm6, %vm1987_vm5  ;;  %v2007_v1 = vand.u32 2147483648, %v3992_v36  ;;  %vm2001_vm11 = vweird.f32 %v3992_v36 }
 0x91c   : > { %v1983_v62 = vsub.f32 1.0, %v1982_v7  ;;  %v2005_v3 = vand.u32 2147483647, %v3992_v36 }
 0x91d   : > { %v2008_v24 = vor.u32 1.1754944e-38, %v2007_v1 }
 0x91e   : > { %v1984_v51 = vmul.f32 %v3092_v35, %v1983_v62  ;;  %vm2006_vm13 = vcmp.eq.f32.partialorder %v2005_v3, 8.507059e+37 }
 0x920   : > { %2917 = vmatmul.msk.f32.gmra.mxu2 %vm322_vm0, %v3783_v12  ;;  %v1927_v61 = vpop.f32.mrf.mxu3  ;;  %v1985_v38 = vadd.f32 %v3092_v35, %v1984_v51 }
 0x921   : > { %v3997_v53 = vadd.f32 1e-06, %v1927_v61  ;;  %v3094_v59 = vpop.eup %3093 }
 0x922   : > { %v1997_v28 = vmul.f32 %v3094_v59, %v3992_v36  ;;  %v1989_v11 = vsel %vm1988_vm7, %v3092_v35, %v1985_v38  ;;  %vm2002_vm9 = vweird.f32 %v3094_v59 }
 0x923   : > { %3095 = vrcp.f32 %v3997_v53  ;;  %v1994_v31 = vsel %vm1991_vm8, %v1993_v19, %v1989_v11  ;;  %vm2003_vm12 = vmor %vm2001_vm11, %vm2002_vm9  ;;  %v2022_v35 = vand.u32 2147483648, %v3997_v53  ;;  %vm2016_vm15 = vweird.f32 %v3997_v53 }
 0x924   : > { %v1998_v33 = vsub.f32 1.0, %v1997_v28  ;;  %v2020_v36 = vand.u32 2147483647, %v3997_v53 }
 0x925   : > { %v2023_v42 = vor.u32 1.1754944e-38, %v2022_v35 }
 0x926   : > { %v1999_v13 = vmul.f32 %v3094_v59, %v1998_v33  ;;  %vm2021_vm2 = vcmp.eq.f32.partialorder %v2020_v36, 8.507059e+37 }
 0x928   : > { %2918 = vmatmul.msk.f32.gmra.mxu2 %vm322_vm0, %v3792_v46  ;;  %v1930_v40 = vpop.f32.mrf.mxu3  ;;  %v2000_v20 = vadd.f32 %v3094_v59, %v1999_v13 }
 0x929   : > { %v4002_v49 = vadd.f32 1e-06, %v1930_v40  ;;  %v3096_v57 = vpop.eup %3095 }
 0x92a   : > { %v2012_v29 = vmul.f32 %v3096_v57, %v3997_v53  ;;  %v2004_v44 = vsel %vm2003_vm12, %v3094_v59, %v2000_v20  ;;  %vm2017_vm14 = vweird.f32 %v3096_v57 }
 0x92b   : > { %3097 = vrcp.f32 %v4002_v49  ;;  %vm2018_vm1 = vmor %vm2016_vm15, %vm2017_vm14  ;;  %v2037_v60 = vand.u32 2147483648, %v4002_v49  ;;  %vm2031_vm4 = vweird.f32 %v4002_v49  ;;  %v2035_v53 = vand.u32 2147483647, %v4002_v49 }
 0x92c   : > { %v2013_v26 = vsub.f32 1.0, %v2012_v29 }
 0x92d   : > { %v2038_v8 = vor.u32 1.1754944e-38, %v2037_v60  ;;  %vm2036_vm6 = vcmp.eq.f32.partialorder %v2035_v53, 8.507059e+37 }
 0x92e   : > { %v2014_v63 = vmul.f32 %v3096_v57, %v2013_v26 }
 0x930   : > { %2919 = vmatmul.msk.f32.gmra.mxu2 %vm322_vm0, %v3801_v2  ;;  %v1933_v10 = vpop.f32.mrf.mxu3 }
 0x931   : > { %v4010_v22 = vadd.f32 1e-06, %v1933_v10  ;;  %v3098_v55 = vpop.eup %3097 }
 0x932   : > { %v2027_v18 = vmul.f32 %v3098_v55, %v4002_v49  ;;  %vm2032_vm3 = vweird.f32 %v3098_v55 }
 0x933   : > { %3099 = vrcp.f32 %v4010_v22  ;;  %vm2033_vm5 = vmor %vm2031_vm4, %vm2032_vm3  ;;  %v2052_v28 = vand.u32 2147483648, %v4010_v22  ;;  %vm2046_vm8 = vweird.f32 %v4010_v22  ;;  %v2050_v27 = vand.u32 2147483647, %v4010_v22 }
 0x934   : > { %v2028_v50 = vsub.f32 1.0, %v2027_v18 }
 0x935   : > { %vm2051_vm11 = vcmp.eq.f32.partialorder %v2050_v27, 8.507059e+37 }
 0x936   : > { %v2029_v6 = vmul.f32 %v3098_v55, %v2028_v50 }
 0x938   : > { %2920 = vmatmul.msk.f32.gmra.mxu2 %vm322_vm0, %v3809_v32 }
 0x939   : > { %v3100_v5 = vpop.eup %3099 }
 0x93a   : > { %v2042_v56 = vmul.f32 %v3100_v5, %v4010_v22  ;;  %vm2047_vm7 = vweird.f32 %v3100_v5 }
 0x93b   : > { %vm2048_vm9 = vmor %vm2046_vm8, %vm2047_vm7 }
 0x940   : > { %2921 = vmatmul.msk.f32.gmra.mxu2 %vm322_vm0, %v3817_v9 }
 0x948   : > { %2922 = vmatmul.msk.f32.gmra.mxu2 %vm322_vm0, %v3825_v23 }
 0x953   : > { %v1835_v4 = vpop.f32.mrf.mxu2 }
 0x954   : > { %v1950_v25 = vmul.f32 %v1949_v14, %v1835_v4  ;;  %v2009_v14 = vsel %vm2006_vm13, %v2008_v24, %v2004_v44 }
 0x956   : > { %2890 = vmatmul.msk.f32.vlgmr.msrb.gmra.mxu0 %vm322_vm0, %v1950_v25  ;;  %v2015_v25 = vadd.f32 %v3096_v57, %v2014_v63 }
 0x958   : > { %v2019_v34 = vsel %vm2018_vm1, %v3096_v57, %v2015_v25 }
 0x959   : > { %v2024_v41 = vsel %vm2021_vm2, %v2023_v42, %v2019_v34 }
 0x95b   : > { %v1838_v21 = vpop.f32.mrf.mxu2 }
 0x95c   : > { %v1965_v39 = vmul.f32 %v1964_v15, %v1838_v21  ;;  %v2030_v15 = vadd.f32 %v3098_v55, %v2029_v6 }
 0x95e   : > { %2891 = vmatmul.msk.f32.gmra.mxu0 %vm322_vm0, %v1965_v39  ;;  %v2043_v39 = vsub.f32 1.0, %v2042_v56  ;;  %v2034_v62 = vsel %vm2033_vm5, %v3098_v55, %v2030_v15 }
 0x95f   : > { %v2039_v43 = vsel %vm2036_vm6, %v2038_v8, %v2034_v62 }
 0x960   : > { %v2044_v59 = vmul.f32 %v3100_v5, %v2043_v39 }
 0x962   : > { %v2045_v51 = vadd.f32 %v3100_v5, %v2044_v59 }
 0x963   : > { %v1841_v58 = vpop.f32.mrf.mxu2 }
 0x964   : > { %v1980_v17 = vmul.f32 %v1979_v0, %v1841_v58  ;;  %v2049_v49 = vsel %vm2048_vm9, %v3100_v5, %v2045_v51  ;;  %v2053_v58 = vor.u32 1.1754944e-38, %v2052_v28 }
 0x966   : > { %2892 = vmatmul.msk.f32.gmra.mxu0 %vm322_vm0, %v1980_v17  ;;  %v2054_v17 = vsel %vm2051_vm11, %v2053_v58, %v2049_v49 }
 0x96b   : > { %v1844_v45 = vpop.f32.mrf.mxu2 }
 0x96c   : > { %v1995_v30 = vmul.f32 %v1994_v31, %v1844_v45 }
 0x96e   : > { %2893 = vmatmul.msk.f32.gmra.mxu0 %vm322_vm0, %v1995_v30 }
 0x973   : > { %v1847_v4 = vpop.f32.mrf.mxu2 }
 0x974   : > { %v2010_v61 = vmul.f32 %v2009_v14, %v1847_v4 }
 0x976   : > { %2894 = vmatmul.msk.f32.gmra.mxu0 %vm322_vm0, %v2010_v61 }
 0x97b   : > { %v1850_v7 = vpop.f32.mrf.mxu2 }
 0x97c   : > { %v2025_v21 = vmul.f32 %v2024_v41, %v1850_v7 }
 0x97e   : > { %2895 = vmatmul.msk.f32.gmra.mxu0 %vm322_vm0, %v2025_v21 }
 0x983   : > { %v1853_v40 = vpop.f32.mrf.mxu2 }
 0x984   : > { %v2040_v47 = vmul.f32 %v2039_v43, %v1853_v40 }
 0x986   : > { %2896 = vmatmul.msk.f32.gmra.mxu0 %vm322_vm0, %v2040_v47 }
 0x98b   : > { %v1856_v0 = vpop.f32.mrf.mxu2 }
 0x98c   : > { %v2055_v38 = vmul.f32 %v2054_v17, %v1856_v0 }
 0x98e   : > { %2897 = vmatmul.msk.f32.gmra.mxu0 %vm322_vm0, %v2055_v38 }
 0x9d3   : > { %v2102_v33 = vpop.f32.mrf.mxu0 }
 0x9d4   : > { %v2128_v57 = vsel %vm322_vm0, %v2102_v33, 0.0 }
 0x9d5   : > { %2129 = vadd.xlane.f32.xlu2 %v2128_v57  ;;  %v2906_v57 = vld [vmem:[%s4316_s5 + $0x38] sm:$0xff] }
 0x9d6   : > { %2368 = vmatpush.msrb.mxu1 %v2906_v57 }
 0x9db   : > { %v2105_v52 = vpop.f32.mrf.mxu0 }
 0x9dc   : > { %v2131_v48 = vsel %vm322_vm0, %v2105_v52, 0.0 }
 0x9dd   : > { %2132 = vadd.xlane.f32.xlu0 %v2131_v48  ;;  %v2904_v48 = vld [vmem:[%s4316_s5 + $0x28] sm:$0xff] }
 0x9e3   : > { %v2108_v10 = vpop.f32.mrf.mxu0 }
 0x9e4   : > { %v2134_v11 = vsel %vm322_vm0, %v2108_v10, 0.0 }
 0x9e5   : > { %2135 = vadd.xlane.f32.xlu2 %v2134_v11 }
 0x9eb   : > { %v2111_v13 = vpop.f32.mrf.mxu0 }
 0x9ec   : > { %v2137_v29 = vsel %vm322_vm0, %v2111_v13, 0.0 }
 0x9ed   : > { %2138 = vadd.xlane.f32.xlu0 %v2137_v29 }
 0x9f3   : > { %v2114_v19 = vpop.f32.mrf.mxu0 }
 0x9f4   : > { %v2140_v22 = vsel %vm322_vm0, %v2114_v19, 0.0 }
 0x9f5   : > { %2141 = vadd.xlane.f32.xlu2 %v2140_v22 }
 0x9fb   : > { %v2117_v45 = vpop.f32.mrf.mxu0 }
 0x9fc   : > { %v2143_v31 = vsel %vm322_vm0, %v2117_v45, 0.0 }
 0x9fd   : > { %2144 = vadd.xlane.f32.xlu0 %v2143_v31 }
 0xa03   : > { %v2120_v30 = vpop.f32.mrf.mxu0 }
 0xa04   : > { %v2146_v20 = vsel %vm322_vm0, %v2120_v30, 0.0 }
 0xa05   : > { %2147 = vadd.xlane.f32.xlu0 %v2146_v20 }
 0xa0b   : > { %v2123_v26 = vpop.f32.mrf.mxu0 }
 0xa0c   : > { %v2149_v55 = vsel %vm322_vm0, %v2123_v26, 0.0 }
 0xa0d   : > { %2150 = vadd.xlane.f32.xlu0 %v2149_v55 }
 0xa48   : > { %v2130_v1 = vpop.xlane.xlu2 %2129 }
 0xa49   : > { %v2152_v3 = vmul.f32 %v2130_v1, %v3477_v37 }
 0xa4b   : > { %v4041_v44 = vsub.f32 %v2102_v33, %v2152_v3  ;;  %v4106_v3 = vld [vmem:[%s4318_s7 + $0x4] sm:$0xf] }
 0xa4d   : > { %v2168_v63 = vmul.f32 %v4041_v44, %v4041_v44 }
 0xa4f   : > { %v2176_v18 = vsel %vm322_vm0, %v2168_v63, 0.0 }
 0xa50   : > { %v2133_v24 = vpop.xlane.xlu0 %2132  ;;  %2177 = vadd.xlane.f32.xlu2 %v2176_v18 }
 0xa51   : > { %v2153_v4 = vmul.f32 %v2133_v24, %v3477_v37 }
 0xa53   : > { %v4047_v14 = vsub.f32 %v2105_v52, %v2153_v4  ;;  %v2905_v52 = vld [vmem:[%s4316_s5 + $0x30] sm:$0xff] }
 0xa54   : > { %2369 = vmatpush.msrb.mxu1 %v2905_v52 }
 0xa55   : > { %v2169_v61 = vmul.f32 %v4047_v14, %v4047_v14 }
 0xa56   : > { %2370 = vmatpush.msrb.mxu1 %v2904_v48 }
 0xa57   : > { %v2179_v25 = vsel %vm322_vm0, %v2169_v61, 0.0 }
 0xa58   : > { %v2136_v50 = vpop.xlane.xlu2 %2135  ;;  %2180 = vadd.xlane.f32.xlu2 %v2179_v25  ;;  %v4109_v25 = vperm.slane %v4106_v3, 0 }
 0xa59   : > { %v2154_v5 = vmul.f32 %v2136_v50, %v3477_v37 }
 0xa5b   : > { %v4053_v35 = vsub.f32 %v2108_v10, %v2154_v5  ;;  %v2903_v10 = vld [vmem:[%s4316_s5 + $0x20] sm:$0xff] }
 0xa5c   : > { %2371 = vmatpush.msrb.mxu1 %v2903_v10 }
 0xa5d   : > { %v2170_v36 = vmul.f32 %v4053_v35, %v4053_v35 }
 0xa5f   : > { %v2182_v34 = vsel %vm322_vm0, %v2170_v36, 0.0 }
 0xa60   : > { %v2139_v6 = vpop.xlane.xlu0 %2138  ;;  %2183 = vadd.xlane.f32.xlu2 %v2182_v34  ;;  %v4113_v34 = vperm.slane %v4106_v3, 1 }
 0xa61   : > { %v2155_v56 = vmul.f32 %v2139_v6, %v3477_v37 }
 0xa63   : > { %v4059_v42 = vsub.f32 %v2111_v13, %v2155_v56 }
 0xa65   : > { %v2171_v7 = vmul.f32 %v4059_v42, %v4059_v42 }
 0xa67   : > { %v2185_v41 = vsel %vm322_vm0, %v2171_v7, 0.0 }
 0xa68   : > { %v2142_v21 = vpop.xlane.xlu2 %2141  ;;  %2186 = vadd.xlane.f32.xlu0 %v2185_v41 }
 0xa69   : > { %v2156_v15 = vmul.f32 %v2142_v21, %v3477_v37 }
 0xa6b   : > { %v4065_v39 = vsub.f32 %v2114_v19, %v2156_v15 }
 0xa6d   : > { %v2172_v60 = vmul.f32 %v4065_v39, %v4065_v39 }
 0xa6f   : > { %v2188_v53 = vsel %vm322_vm0, %v2172_v60, 0.0 }
 0xa70   : > { %2189 = vadd.xlane.f32.xlu2 %v2188_v53  ;;  %v2145_v62 = vpop.xlane.xlu0 %2144 }
 0xa71   : > { %v2157_v59 = vmul.f32 %v2145_v62, %v3477_v37 }
 0xa73   : > { %v4071_v8 = vsub.f32 %v2117_v45, %v2157_v59 }
 0xa75   : > { %v2173_v40 = vmul.f32 %v4071_v8, %v4071_v8 }
 0xa77   : > { %v2191_v43 = vsel %vm322_vm0, %v2173_v40, 0.0 }
 0xa78   : > { %v2148_v47 = vpop.xlane.xlu0 %2147  ;;  %2192 = vadd.xlane.f32.xlu0 %v2191_v43 }
 0xa79   : > { %v2158_v51 = vmul.f32 %v2148_v47, %v3477_v37 }
 0xa7b   : > { %v4077_v28 = vsub.f32 %v2120_v30, %v2158_v51 }
 0xa7d   : > { %v2174_v27 = vmul.f32 %v4077_v28, %v4077_v28 }
 0xa7f   : > { %v2194_v49 = vsel %vm322_vm0, %v2174_v27, 0.0 }
 0xa80   : > { %2195 = vadd.xlane.f32.xlu2 %v2194_v49  ;;  %v2151_v58 = vpop.xlane.xlu0 %2150 }
 0xa81   : > { %v2159_v0 = vmul.f32 %v2151_v58, %v3477_v37 }
 0xa83   : > { %v4083_v17 = vsub.f32 %v2123_v26, %v2159_v0 }
 0xa85   : > { %v2175_v38 = vmul.f32 %v4083_v17, %v4083_v17 }
 0xa87   : > { %v2197_v33 = vsel %vm322_vm0, %v2175_v38, 0.0 }
 0xa88   : > { %2198 = vadd.xlane.f32.xlu0 %v2197_v33 }
 0xac3   : > { %v2178_v11 = vpop.xlane.xlu2 %2177 }
 0xac4   : > { %v2200_v13 = vmul.f32 %v2178_v11, %v3477_v37 }
 0xac6   : > { %v2208_v29 = vadd.f32 1e-05, %v2200_v13 }
 0xac8   : > { %3101 = vrsqrt.f32 %v2208_v29  ;;  %vm2222_vm13 = vweird.f32 %v2208_v29 }
 0xacb   : > { %v2181_v19 = vpop.xlane.xlu2 %2180 }
 0xacc   : > { %v2201_v22 = vmul.f32 %v2181_v19, %v3477_v37 }
 0xace   : > { %v3102_v45 = vpop.eup %3101  ;;  %v2209_v31 = vadd.f32 1e-05, %v2201_v22 }
 0xacf   : > { %v2217_v30 = vmul.f32 %v3102_v45, %v2208_v29  ;;  %vm2223_vm12 = vweird.f32 %v3102_v45 }
 0xad0   : > { %3103 = vrsqrt.f32 %v2209_v31  ;;  %vm2224_vm14 = vmor %vm2222_vm13, %vm2223_vm12  ;;  %vm2232_vm1 = vweird.f32 %v2209_v31 }
 0xad1   : > { %v2218_v20 = vmul.f32 %v3102_v45, %v2217_v30 }
 0xad3   : > { %v2219_v26 = vmul.f32 0.5, %v2218_v20  ;;  %v2184_v55 = vpop.xlane.xlu2 %2183 }
 0xad4   : > { %v2202_v1 = vmul.f32 %v2184_v55, %v3477_v37 }
 0xad5   : > { %v2220_v63 = vsub.f32 1.5, %v2219_v26 }
 0xad6   : > { %v3104_v18 = vpop.eup %3103  ;;  %v2210_v24 = vadd.f32 1e-05, %v2202_v1 }
 0xad7   : > { %v2221_v4 = vmul.f32 %v3102_v45, %v2220_v63  ;;  %v2227_v61 = vmul.f32 %v3104_v18, %v2209_v31  ;;  %vm2233_vm15 = vweird.f32 %v3104_v18 }
 0xad8   : > { %3105 = vrsqrt.f32 %v2210_v24  ;;  %vm2234_vm2 = vmor %vm2232_vm1, %vm2233_vm15  ;;  %vm2242_vm4 = vweird.f32 %v2210_v24 }
 0xad9   : > { %v2225_v50 = vsel %vm2224_vm14, %v3102_v45, %v2221_v4  ;;  %v2228_v5 = vmul.f32 %v3104_v18, %v2227_v61 }
 0xada   : > { %v2296_v36 = vmul.f32 %v2225_v50, %v4041_v44 }
 0xadb   : > { %v2229_v6 = vmul.f32 0.5, %v2228_v5  ;;  %v2187_v56 = vpop.xlane.xlu0 %2186 }
 0xadc   : > { %v2305_v7 = vmul.f32 %v4109_v25, %v2296_v36  ;;  %v2203_v41 = vmul.f32 %v2187_v56, %v3477_v37 }
 0xadd   : > { %v2230_v21 = vsub.f32 1.5, %v2229_v6 }
 0xade   : > { %v3106_v15 = vpop.eup %3105  ;;  %v2211_v60 = vadd.f32 1e-05, %v2203_v41  ;;  %v2314_v53 = vadd.f32 %v4113_v34, %v2305_v7  ;;  %v2929_v7 = vld [vmem:[%s4317_s6 + $0x70] sm:$0xff] }
 0xadf   : > { %v2231_v62 = vmul.f32 %v3104_v18, %v2230_v21  ;;  %v2237_v59 = vmul.f32 %v3106_v15, %v2210_v24  ;;  %vm2243_vm3 = vweird.f32 %v3106_v15 }
 0xae0   : > { %3107 = vrsqrt.f32 %v2211_v60  ;;  %2907 = vmatmul.msk.f32.vlgmr.msrb.gmra.mxu1 %vm322_vm0, %v2314_v53  ;;  %vm2244_vm5 = vmor %vm2242_vm4, %vm2243_vm3  ;;  %vm2252_vm7 = vweird.f32 %v2211_v60 }
 0xae1   : > { %v2235_v44 = vsel %vm2234_vm2, %v3104_v18, %v2231_v62  ;;  %v2238_v40 = vmul.f32 %v3106_v15, %v2237_v59 }
 0xae2   : > { %v2297_v43 = vmul.f32 %v2235_v44, %v4047_v14 }
 0xae3   : > { %v2239_v47 = vmul.f32 0.5, %v2238_v40  ;;  %v2190_v51 = vpop.xlane.xlu2 %2189  ;;  %v2927_v40 = vld [vmem:[%s4317_s6 + $0x60] sm:$0xff] }
 0xae4   : > { %v2204_v27 = vmul.f32 %v2190_v51, %v3477_v37  ;;  %v2306_v49 = vmul.f32 %v4109_v25, %v2297_v43 }
 0xae5   : > { %v2240_v58 = vsub.f32 1.5, %v2239_v47 }
 0xae6   : > { %v3108_v0 = vpop.eup %3107  ;;  %v2212_v38 = vadd.f32 1e-05, %v2204_v27  ;;  %v2315_v33 = vadd.f32 %v4113_v34, %v2306_v49  ;;  %v2926_v27 = vld [vmem:[%s4317_s6 + $0x58] sm:$0xff] }
 0xae7   : > { %v2241_v57 = vmul.f32 %v3106_v15, %v2240_v58  ;;  %v2247_v52 = vmul.f32 %v3108_v0, %v2211_v60  ;;  %vm2253_vm6 = vweird.f32 %v3108_v0  ;;  %v2928_v60 = vld [vmem:[%s4317_s6 + $0x68] sm:$0xff] }
 0xae8   : > { %3109 = vrsqrt.f32 %v2212_v38  ;;  %2908 = vmatmul.msk.f32.gmra.mxu1 %vm322_vm0, %v2315_v33  ;;  %vm2254_vm8 = vmor %vm2252_vm7, %vm2253_vm6  ;;  %vm2262_vm11 = vweird.f32 %v2212_v38 }
 0xae9   : > { %v2245_v14 = vsel %vm2244_vm5, %v3106_v15, %v2241_v57  ;;  %v2248_v48 = vmul.f32 %v3108_v0, %v2247_v52 }
 0xaea   : > { %v2298_v10 = vmul.f32 %v2245_v14, %v4053_v35 }
 0xaeb   : > { %v2249_v11 = vmul.f32 0.5, %v2248_v48  ;;  %v2193_v13 = vpop.xlane.xlu0 %2192 }
 0xaec   : > { %v2205_v29 = vmul.f32 %v2193_v13, %v3477_v37  ;;  %v2307_v19 = vmul.f32 %v4109_v25, %v2298_v10 }
 0xaed   : > { %v2250_v22 = vsub.f32 1.5, %v2249_v11 }
 0xaee   : > { %v3110_v45 = vpop.eup %3109  ;;  %v2213_v31 = vadd.f32 1e-05, %v2205_v29  ;;  %v2316_v30 = vadd.f32 %v4113_v34, %v2307_v19 }
 0xaef   : > { %v2251_v20 = vmul.f32 %v3108_v0, %v2250_v22  ;;  %v2257_v26 = vmul.f32 %v3110_v45, %v2212_v38  ;;  %vm2263_vm9 = vweird.f32 %v3110_v45 }
 0xaf0   : > { %3111 = vrsqrt.f32 %v2213_v31  ;;  %2909 = vmatmul.msk.f32.gmra.mxu1 %vm322_vm0, %v2316_v30  ;;  %vm2264_vm12 = vmor %vm2262_vm11, %vm2263_vm9  ;;  %vm2272_vm14 = vweird.f32 %v2213_v31 }
 0xaf1   : > { %v2255_v35 = vsel %vm2254_vm8, %v3108_v0, %v2251_v20  ;;  %v2258_v55 = vmul.f32 %v3110_v45, %v2257_v26 }
 0xaf2   : > { %v2299_v1 = vmul.f32 %v2255_v35, %v4059_v42  ;;  %v2930_v42 = vld [vmem:[%s4317_s6 + $0x78] sm:$0xff] }
 0xaf3   : > { %v2259_v63 = vmul.f32 0.5, %v2258_v55  ;;  %v2196_v18 = vpop.xlane.xlu2 %2195  ;;  %2487 = vmatpush.msrb.mxu3 %v2930_v42 }
 0xaf4   : > { %v2206_v24 = vmul.f32 %v2196_v18, %v3477_v37  ;;  %v2308_v4 = vmul.f32 %v4109_v25, %v2299_v1 }
 0xaf5   : > { %v2260_v61 = vsub.f32 1.5, %v2259_v63  ;;  %2488 = vmatpush.msrb.mxu3 %v2929_v7  ;;  %v2924_v63 = vld [vmem:[%s4317_s6 + $0x48] sm:$0xff] }
 0xaf6   : > { %v3112_v50 = vpop.eup %3111  ;;  %v2214_v5 = vadd.f32 1e-05, %v2206_v24  ;;  %v2317_v36 = vadd.f32 %v4113_v34, %v2308_v4 }
 0xaf7   : > { %v2261_v6 = vmul.f32 %v3110_v45, %v2260_v61  ;;  %v2267_v56 = vmul.f32 %v3112_v50, %v2213_v31  ;;  %vm2273_vm13 = vweird.f32 %v3112_v50  ;;  %2489 = vmatpush.msrb.mxu3 %v2928_v60 }
 0xaf8   : > { %3113 = vrsqrt.f32 %v2214_v5  ;;  %2910 = vmatmul.msk.f32.gmra.mxu1 %vm322_vm0, %v2317_v36  ;;  %vm2274_vm15 = vmor %vm2272_vm14, %vm2273_vm13  ;;  %vm2282_vm2 = vweird.f32 %v2214_v5 }
 0xaf9   : > { %v2265_v41 = vsel %vm2264_vm12, %v3110_v45, %v2261_v6  ;;  %v2268_v21 = vmul.f32 %v3112_v50, %v2267_v56  ;;  %2490 = vmatpush.msrb.mxu3 %v2927_v40 }
 0xafa   : > { %v2300_v15 = vmul.f32 %v2265_v41, %v4065_v39 }
 0xafb   : > { %v2269_v53 = vmul.f32 0.5, %v2268_v21  ;;  %v2199_v62 = vpop.xlane.xlu0 %2198  ;;  %2491 = vmatpush.msrb.mxu3 %v2926_v27 }
 0xafc   : > { %v2207_v59 = vmul.f32 %v2199_v62, %v3477_v37  ;;  %v2309_v44 = vmul.f32 %v4109_v25, %v2300_v15 }
 0xafd   : > { %v2270_v43 = vsub.f32 1.5, %v2269_v53 }
 0xafe   : > { %v3114_v47 = vpop.eup %3113  ;;  %v2215_v39 = vadd.f32 1e-05, %v2207_v59  ;;  %v2318_v51 = vadd.f32 %v4113_v34, %v2309_v44 }
 0xaff   : > { %v2271_v49 = vmul.f32 %v3112_v50, %v2270_v43  ;;  %v2277_v58 = vmul.f32 %v3114_v47, %v2214_v5  ;;  %vm2283_vm1 = vweird.f32 %v3114_v47 }
 0xb00   : > { %3115 = vrsqrt.f32 %v2215_v39  ;;  %2911 = vmatmul.msk.f32.gmra.mxu1 %vm322_vm0, %v2318_v51  ;;  %vm2284_vm3 = vmor %vm2282_vm2, %vm2283_vm1  ;;  %vm2292_vm5 = vweird.f32 %v2215_v39 }
 0xb01   : > { %v2275_v0 = vsel %vm2274_vm15, %v3112_v50, %v2271_v49  ;;  %v2278_v38 = vmul.f32 %v3114_v47, %v2277_v58 }
 0xb02   : > { %v2301_v33 = vmul.f32 %v2275_v0, %v4071_v8 }
 0xb03   : > { %v2279_v57 = vmul.f32 0.5, %v2278_v38 }
 0xb04   : > { %v2310_v52 = vmul.f32 %v4109_v25, %v2301_v33 }
 0xb05   : > { %v2280_v14 = vsub.f32 1.5, %v2279_v57 }
 0xb06   : > { %v3116_v48 = vpop.eup %3115  ;;  %v2319_v10 = vadd.f32 %v4113_v34, %v2310_v52 }
 0xb07   : > { %v2281_v11 = vmul.f32 %v3114_v47, %v2280_v14  ;;  %v2287_v13 = vmul.f32 %v3116_v48, %v2215_v39  ;;  %vm2293_vm4 = vweird.f32 %v3116_v48 }
 0xb08   : > { %2912 = vmatmul.msk.f32.gmra.mxu1 %vm322_vm0, %v2319_v10  ;;  %vm2294_vm6 = vmor %vm2292_vm5, %vm2293_vm4 }
 0xb09   : > { %v2285_v29 = vsel %vm2284_vm3, %v3114_v47, %v2281_v11  ;;  %v2288_v19 = vmul.f32 %v3116_v48, %v2287_v13 }
 0xb0a   : > { %v2302_v22 = vmul.f32 %v2285_v29, %v4077_v28  ;;  %v2925_v28 = vld [vmem:[%s4317_s6 + $0x50] sm:$0xff] }
 0xb0b   : > { %v2289_v45 = vmul.f32 0.5, %v2288_v19  ;;  %2492 = vmatpush.msrb.mxu3 %v2925_v28 }
 0xb0c   : > { %v2311_v8 = vmul.f32 %v4109_v25, %v2302_v22 }
 0xb0d   : > { %v2290_v31 = vsub.f32 1.5, %v2289_v45  ;;  %2493 = vmatpush.msrb.mxu3 %v2924_v63 }
 0xb0e   : > { %v2320_v30 = vadd.f32 %v4113_v34, %v2311_v8 }
 0xb0f   : > { %v2291_v20 = vmul.f32 %v3116_v48, %v2290_v31 }
 0xb10   : > { %2913 = vmatmul.msk.f32.gmra.mxu1 %vm322_vm0, %v2320_v30 }
 0xb11   : > { %v2295_v26 = vsel %vm2294_vm6, %v3116_v48, %v2291_v20 }
 0xb12   : > { %v2303_v35 = vmul.f32 %v2295_v26, %v4083_v17  ;;  %v2923_v17 = vld [vmem:[%s4317_s6 + $0x40] sm:$0xff] }
 0xb13   : > { %2494 = vmatpush.msrb.mxu3 %v2923_v17 }
 0xb14   : > { %v2312_v55 = vmul.f32 %v4109_v25, %v2303_v35  ;;  %v2414_v25 = vpop.f32.mrf.mxu2 }
 0xb16   : > { %v2321_v1 = vadd.f32 %v4113_v34, %v2312_v55 }
 0xb18   : > { %2914 = vmatmul.msk.f32.gmra.mxu1 %vm322_vm0, %v2321_v1 }
 0xb1c   : > { %v2417_v18 = vpop.f32.mrf.mxu2 }
 0xb24   : > { %v2420_v61 = vpop.f32.mrf.mxu2 }
 0xb2c   : > { %v2423_v6 = vpop.f32.mrf.mxu2 }
 0xb34   : > { %v2426_v15 = vpop.f32.mrf.mxu2 }
 0xb3c   : > { %v2429_v44 = vpop.f32.mrf.mxu2 }
 0xb44   : > { %v2432_v39 = vpop.f32.mrf.mxu2 }
 0xb4c   : > { %v2435_v58 = vpop.f32.mrf.mxu2 }
 0xb5d   : > { %v2373_v34 = vpop.f32.mrf.mxu1 }
 0xb5e   : > { %v2415_v24 = vadd.f32 %v2414_v25, %v2373_v34 }
 0xb60   : > { %v2438_v4 = vmax.f32 %v2415_v24, 0.0 }
 0xb62   : > { %2931 = vmatmul.msk.f32.vlgmr.msrb.gmra.mxu3 %vm532_vm10, %v2438_v4 }
 0xb65   : > { %v2376_v50 = vpop.f32.mrf.mxu1 }
 0xb66   : > { %v2418_v5 = vadd.f32 %v2417_v18, %v2376_v50 }
 0xb68   : > { %v2439_v36 = vmax.f32 %v2418_v5, 0.0 }
 0xb6a   : > { %2932 = vmatmul.msk.f32.gmra.mxu3 %vm532_vm10, %v2439_v36 }
 0xb6d   : > { %v2379_v56 = vpop.f32.mrf.mxu1 }
 0xb6e   : > { %v2421_v42 = vadd.f32 %v2420_v61, %v2379_v56 }
 0xb70   : > { %v2440_v7 = vmax.f32 %v2421_v42, 0.0 }
 0xb72   : > { %2933 = vmatmul.msk.f32.gmra.mxu3 %vm532_vm10, %v2440_v7 }
 0xb75   : > { %v2382_v41 = vpop.f32.mrf.mxu1 }
 0xb76   : > { %v2424_v21 = vadd.f32 %v2423_v6, %v2382_v41 }
 0xb78   : > { %v2441_v60 = vmax.f32 %v2424_v21, 0.0 }
 0xb7a   : > { %2934 = vmatmul.msk.f32.gmra.mxu3 %vm532_vm10, %v2441_v60 }
 0xb7d   : > { %v2385_v53 = vpop.f32.mrf.mxu1 }
 0xb7e   : > { %v2427_v62 = vadd.f32 %v2426_v15, %v2385_v53 }
 0xb80   : > { %v2442_v59 = vmax.f32 %v2427_v62, 0.0 }
 0xb82   : > { %2935 = vmatmul.msk.f32.gmra.mxu3 %vm532_vm10, %v2442_v59 }
 0xb85   : > { %v2388_v40 = vpop.f32.mrf.mxu1 }
 0xb86   : > { %v2430_v43 = vadd.f32 %v2429_v44, %v2388_v40 }
 0xb88   : > { %v2443_v47 = vmax.f32 %v2430_v43, 0.0 }
 0xb8a   : > { %2936 = vmatmul.msk.f32.gmra.mxu3 %vm532_vm10, %v2443_v47 }
 0xb8d   : > { %v2391_v51 = vpop.f32.mrf.mxu1 }
 0xb8e   : > { %v2433_v27 = vadd.f32 %v2432_v39, %v2391_v51 }
 0xb90   : > { %v2444_v49 = vmax.f32 %v2433_v27, 0.0 }
 0xb92   : > { %2937 = vmatmul.msk.f32.gmra.mxu3 %vm532_vm10, %v2444_v49 }
 0xb95   : > { %v2394_v0 = vpop.f32.mrf.mxu1 }
 0xb96   : > { %v2436_v38 = vadd.f32 %v2435_v58, %v2394_v0 }
 0xb98   : > { %v2445_v33 = vmax.f32 %v2436_v38, 0.0 }
 0xb9a   : > { %2938 = vmatmul.msk.f32.gmra.mxu3 %vm532_vm10, %v2445_v33 }
 0xbe5   : > { %v2496_v57 = vpop.f32.mrf.mxu3 }
 0xbe6   : > { %v2520_v52 = vsel %vm322_vm0, %v2496_v57, 0.0 }
 0xbe7   : > { %2521 = vadd.xlane.f32.xlu2 %v2520_v52 }
 0xbed   : > { %v2499_v14 = vpop.f32.mrf.mxu3 }
 0xbee   : > { %v2523_v48 = vsel %vm322_vm0, %v2499_v14, 0.0 }
 0xbef   : > { %2524 = vadd.xlane.f32.xlu1 %v2523_v48 }
 0xbf5   : > { %v2502_v10 = vpop.f32.mrf.mxu3 }
 0xbf6   : > { %v2526_v11 = vsel %vm322_vm0, %v2502_v10, 0.0 }
 0xbf7   : > { %2527 = vadd.xlane.f32.xlu0 %v2526_v11 }
 0xbfd   : > { %v2505_v13 = vpop.f32.mrf.mxu3 }
 0xbfe   : > { %v2529_v29 = vsel %vm322_vm0, %v2505_v13, 0.0 }
 0xbff   : > { %2530 = vadd.xlane.f32.xlu2 %v2529_v29 }
 0xc05   : > { %v2508_v19 = vpop.f32.mrf.mxu3 }
 0xc06   : > { %v2532_v22 = vsel %vm322_vm0, %v2508_v19, 0.0 }
 0xc07   : > { %2533 = vadd.xlane.f32.xlu0 %v2532_v22 }
 0xc0d   : > { %v2511_v45 = vpop.f32.mrf.mxu3 }
 0xc0e   : > { %v2535_v8 = vsel %vm322_vm0, %v2511_v45, 0.0 }
 0xc0f   : > { %2536 = vadd.xlane.f32.xlu2 %v2535_v8 }
 0xc15   : > { %v2514_v31 = vpop.f32.mrf.mxu3 }
 0xc16   : > { %v2538_v30 = vsel %vm322_vm0, %v2514_v31, 0.0 }
 0xc17   : > { %2539 = vadd.xlane.f32.xlu0 %v2538_v30 }
 0xc1d   : > { %v2517_v20 = vpop.f32.mrf.mxu3 }
 0xc1e   : > { %v2541_v26 = vsel %vm322_vm0, %v2517_v20, 0.0 }
 0xc1f   : > { %2542 = vadd.xlane.f32.xlu2 %v2541_v26 }
 0xc5a   : > { %v2522_v35 = vpop.xlane.xlu2 %2521 }
 0xc5b   : > { %v2544_v55 = vmul.f32 %v2522_v35, %v3477_v37 }
 0xc5d   : > { %v4192_v1 = vsub.f32 %v2496_v57, %v2544_v55 }
 0xc5f   : > { %v2560_v28 = vmul.f32 %v4192_v1, %v4192_v1 }
 0xc61   : > { %v2568_v63 = vsel %vm322_vm0, %v2560_v28, 0.0 }
 0xc62   : > { %v2525_v17 = vpop.xlane.xlu1 %2524  ;;  %2569 = vadd.xlane.f32.xlu0 %v2568_v63  ;;  %v4243_v63 = vperm.slane %v4106_v3, 2 }
 0xc63   : > { %v2545_v25 = vmul.f32 %v2525_v17, %v3477_v37 }
 0xc65   : > { %v4198_v18 = vsub.f32 %v2499_v14, %v2545_v25 }
 0xc67   : > { %v2561_v34 = vmul.f32 %v4198_v18, %v4198_v18 }
 0xc69   : > { %v2571_v24 = vsel %vm322_vm0, %v2561_v34, 0.0  ;;  %v4246_v34 = vperm.slane %v4106_v3, 3 }
 0xc6a   : > { %2572 = vadd.xlane.f32.xlu2 %v2571_v24  ;;  %v2528_v4 = vpop.xlane.xlu0 %2527 }
 0xc6b   : > { %v2546_v61 = vmul.f32 %v2528_v4, %v3477_v37 }
 0xc6d   : > { %v4204_v50 = vsub.f32 %v2502_v10, %v2546_v61 }
 0xc6f   : > { %v2562_v5 = vmul.f32 %v4204_v50, %v4204_v50 }
 0xc71   : > { %v2574_v36 = vsel %vm322_vm0, %v2562_v5, 0.0 }
 0xc72   : > { %v2531_v6 = vpop.xlane.xlu2 %2530  ;;  %2575 = vadd.xlane.f32.xlu0 %v2574_v36 }
 0xc73   : > { %v2547_v56 = vmul.f32 %v2531_v6, %v3477_v37 }
 0xc75   : > { %v4210_v42 = vsub.f32 %v2505_v13, %v2547_v56 }
 0xc77   : > { %v2563_v7 = vmul.f32 %v4210_v42, %v4210_v42 }
 0xc79   : > { %v2577_v41 = vsel %vm322_vm0, %v2563_v7, 0.0 }
 0xc7a   : > { %2578 = vadd.xlane.f32.xlu2 %v2577_v41  ;;  %v2534_v21 = vpop.xlane.xlu0 %2533 }
 0xc7b   : > { %v2548_v15 = vmul.f32 %v2534_v21, %v3477_v37 }
 0xc7d   : > { %v4216_v60 = vsub.f32 %v2508_v19, %v2548_v15 }
 0xc7f   : > { %v2564_v53 = vmul.f32 %v4216_v60, %v4216_v60 }
 0xc81   : > { %v2580_v62 = vsel %vm322_vm0, %v2564_v53, 0.0 }
 0xc82   : > { %v2537_v59 = vpop.xlane.xlu2 %2536  ;;  %2581 = vadd.xlane.f32.xlu0 %v2580_v62 }
 0xc83   : > { %v2549_v44 = vmul.f32 %v2537_v59, %v3477_v37 }
 0xc85   : > { %v4222_v40 = vsub.f32 %v2511_v45, %v2549_v44 }
 0xc87   : > { %v2565_v43 = vmul.f32 %v4222_v40, %v4222_v40 }
 0xc89   : > { %v2583_v47 = vsel %vm322_vm0, %v2565_v43, 0.0 }
 0xc8a   : > { %2584 = vadd.xlane.f32.xlu2 %v2583_v47  ;;  %v2540_v39 = vpop.xlane.xlu0 %2539 }
 0xc8b   : > { %v2550_v51 = vmul.f32 %v2540_v39, %v3477_v37 }
 0xc8d   : > { %v4228_v27 = vsub.f32 %v2514_v31, %v2550_v51 }
 0xc8f   : > { %v2566_v49 = vmul.f32 %v4228_v27, %v4228_v27 }
 0xc91   : > { %v2586_v58 = vsel %vm322_vm0, %v2566_v49, 0.0 }
 0xc92   : > { %v2543_v0 = vpop.xlane.xlu2 %2542  ;;  %2587 = vadd.xlane.f32.xlu0 %v2586_v58 }
 0xc93   : > { %v2551_v38 = vmul.f32 %v2543_v0, %v3477_v37 }
 0xc95   : > { %v4234_v33 = vsub.f32 %v2517_v20, %v2551_v38 }
 0xc97   : > { %v2567_v57 = vmul.f32 %v4234_v33, %v4234_v33 }
 0xc99   : > { %v2589_v52 = vsel %vm322_vm0, %v2567_v57, 0.0 }
 0xc9a   : > { %2590 = vadd.xlane.f32.xlu2 %v2589_v52 }
 0xcd5   : > { %v2570_v14 = vpop.xlane.xlu0 %2569 }
 0xcd6   : > { %v2592_v48 = vmul.f32 %v2570_v14, %v3477_v37 }
 0xcd8   : > { %v2600_v10 = vadd.f32 1e-05, %v2592_v48 }
 0xcda   : > { %3117 = vrsqrt.f32 %v2600_v10  ;;  %vm2614_vm7 = vweird.f32 %v2600_v10 }
 0xcdd   : > { %v2573_v11 = vpop.xlane.xlu2 %2572 }
 0xcde   : > { %v2593_v13 = vmul.f32 %v2573_v11, %v3477_v37 }
 0xce0   : > { %v3118_v29 = vpop.eup %3117  ;;  %v2601_v19 = vadd.f32 1e-05, %v2593_v13 }
 0xce1   : > { %v2609_v22 = vmul.f32 %v3118_v29, %v2600_v10  ;;  %vm2615_vm10 = vweird.f32 %v3118_v29 }
 0xce2   : > { %3119 = vrsqrt.f32 %v2601_v19  ;;  %vm2616_vm8 = vmor %vm2614_vm7, %vm2615_vm10  ;;  %vm2624_vm11 = vweird.f32 %v2601_v19 }
 0xce3   : > { %v2610_v45 = vmul.f32 %v3118_v29, %v2609_v22 }
 0xce5   : > { %v2611_v8 = vmul.f32 0.5, %v2610_v45  ;;  %v2576_v31 = vpop.xlane.xlu0 %2575 }
 0xce6   : > { %v2594_v30 = vmul.f32 %v2576_v31, %v3477_v37 }
 0xce7   : > { %v2612_v20 = vsub.f32 1.5, %v2611_v8 }
 0xce8   : > { %v3120_v26 = vpop.eup %3119  ;;  %v2602_v35 = vadd.f32 1e-05, %v2594_v30 }
 0xce9   : > { %v2613_v55 = vmul.f32 %v3118_v29, %v2612_v20  ;;  %v2619_v28 = vmul.f32 %v3120_v26, %v2601_v19  ;;  %vm2625_vm9 = vweird.f32 %v3120_v26 }
 0xcea   : > { %3121 = vrsqrt.f32 %v2602_v35  ;;  %vm2626_vm12 = vmor %vm2624_vm11, %vm2625_vm9  ;;  %vm2634_vm14 = vweird.f32 %v2602_v35 }
 0xceb   : > { %v2617_v17 = vsel %vm2616_vm8, %v3118_v29, %v2613_v55  ;;  %v2620_v25 = vmul.f32 %v3120_v26, %v2619_v28 }
 0xcec   : > { %v2688_v24 = vmul.f32 %v2617_v17, %v4192_v1 }
 0xced   : > { %v2621_v4 = vmul.f32 0.5, %v2620_v25  ;;  %v2579_v61 = vpop.xlane.xlu2 %2578 }
 0xcee   : > { %v2697_v5 = vmul.f32 %v4243_v63, %v2688_v24  ;;  %v2595_v36 = vmul.f32 %v2579_v61, %v3477_v37 }
 0xcef   : > { %v2622_v6 = vsub.f32 1.5, %v2621_v4 }
 0xcf0   : > { %v3122_v56 = vpop.eup %3121  ;;  %v2706_v7 = vadd.f32 %v4246_v34, %v2697_v5  ;;  %v2603_v41 = vadd.f32 1e-05, %v2595_v36 }
 0xcf1   : > { %v2623_v3 = vmul.f32 %v3120_v26, %v2622_v6  ;;  %v2629_v1 = vmul.f32 %v3122_v56, %v2602_v35  ;;  %vm2635_vm13 = vweird.f32 %v3122_v56 }
 0xcf2   : > { %v2714_v21 = vadd.f32 %v2706_v7, %v3765_v54  ;;  %3123 = vrsqrt.f32 %v2603_v41  ;;  %vm2636_vm15 = vmor %vm2634_vm14, %vm2635_vm13  ;;  %vm2644_vm2 = vweird.f32 %v2603_v41 }
 0xcf3   : > { %v2627_v15 = vsel %vm2626_vm12, %v3120_v26, %v2623_v3  ;;  %v2630_v53 = vmul.f32 %v3122_v56, %v2629_v1 }
 0xcf4   : > { %2722 = vst.msk [vmem:[%s4257_s26] sm:$0xff] %vm322_vm0, %v2714_v21  ;;  %v2689_v62 = vmul.f32 %v2627_v15, %v4198_v18 }
 0xcf5   : > { %v2631_v59 = vmul.f32 0.5, %v2630_v53  ;;  %v2582_v44 = vpop.xlane.xlu0 %2581 }
 0xcf6   : > { %v2698_v43 = vmul.f32 %v4243_v63, %v2689_v62  ;;  %v2596_v47 = vmul.f32 %v2582_v44, %v3477_v37 }
 0xcf7   : > { %v2632_v39 = vsub.f32 1.5, %v2631_v59 }
 0xcf8   : > { %v3124_v51 = vpop.eup %3123  ;;  %v2707_v54 = vadd.f32 %v4246_v34, %v2698_v43  ;;  %v2604_v49 = vadd.f32 1e-05, %v2596_v47 }
 0xcf9   : > { %v2633_v58 = vmul.f32 %v3122_v56, %v2632_v39  ;;  %v2639_v0 = vmul.f32 %v3124_v51, %v2603_v41  ;;  %vm2645_vm1 = vweird.f32 %v3124_v51 }
 0xcfa   : > { %v2715_v38 = vadd.f32 %v2707_v54, %v3774_v16  ;;  %3125 = vrsqrt.f32 %v2604_v49  ;;  %vm2646_vm3 = vmor %vm2644_vm2, %vm2645_vm1  ;;  %vm2654_vm5 = vweird.f32 %v2604_v49 }
 0xcfb   : > { %v2637_v18 = vsel %vm2636_vm15, %v3122_v56, %v2633_v58  ;;  %v2640_v57 = vmul.f32 %v3124_v51, %v2639_v0 }
 0xcfc   : > { %2723 = vst.msk [vmem:[%s4257_s26 + $0x8] sm:$0xff] %vm322_vm0, %v2715_v38  ;;  %v2690_v52 = vmul.f32 %v2637_v18, %v4204_v50 }
 0xcfd   : > { %v2641_v14 = vmul.f32 0.5, %v2640_v57  ;;  %v2585_v48 = vpop.xlane.xlu2 %2584 }
 0xcfe   : > { %v2699_v10 = vmul.f32 %v4243_v63, %v2690_v52  ;;  %v2597_v11 = vmul.f32 %v2585_v48, %v3477_v37 }
 0xcff   : > { %v2642_v13 = vsub.f32 1.5, %v2641_v14 }
 0xd00   : > { %v3126_v29 = vpop.eup %3125  ;;  %v2708_v16 = vadd.f32 %v4246_v34, %v2699_v10  ;;  %v2605_v19 = vadd.f32 1e-05, %v2597_v11 }
 0xd01   : > { %v2643_v22 = vmul.f32 %v3124_v51, %v2642_v13  ;;  %v2649_v45 = vmul.f32 %v3126_v29, %v2604_v49  ;;  %vm2655_vm4 = vweird.f32 %v3126_v29 }
 0xd02   : > { %v2716_v8 = vadd.f32 %v2708_v16, %v3783_v12  ;;  %3127 = vrsqrt.f32 %v2605_v19  ;;  %vm2656_vm6 = vmor %vm2654_vm5, %vm2655_vm4  ;;  %vm2664_vm7 = vweird.f32 %v2605_v19 }
 0xd03   : > { %v2647_v50 = vsel %vm2646_vm3, %v3124_v51, %v2643_v22  ;;  %v2650_v31 = vmul.f32 %v3126_v29, %v2649_v45 }
 0xd04   : > { %2724 = vst.msk [vmem:[%s4257_s26 + $0x10] sm:$0xff] %vm322_vm0, %v2716_v8  ;;  %v2691_v30 = vmul.f32 %v2647_v50, %v4210_v42 }
 0xd05   : > { %v2651_v20 = vmul.f32 0.5, %v2650_v31  ;;  %v2588_v26 = vpop.xlane.xlu0 %2587 }
 0xd06   : > { %v2700_v35 = vmul.f32 %v4243_v63, %v2691_v30  ;;  %v2598_v55 = vmul.f32 %v2588_v26, %v3477_v37 }
 0xd07   : > { %v2652_v28 = vsub.f32 1.5, %v2651_v20 }
 0xd08   : > { %v3128_v17 = vpop.eup %3127  ;;  %v2709_v12 = vadd.f32 %v4246_v34, %v2700_v35  ;;  %v2606_v25 = vadd.f32 1e-05, %v2598_v55 }
 0xd09   : > { %v2653_v24 = vmul.f32 %v3126_v29, %v2652_v28  ;;  %v2659_v4 = vmul.f32 %v3128_v17, %v2605_v19  ;;  %vm2665_vm10 = vweird.f32 %v3128_v17 }
 0xd0a   : > { %v2717_v61 = vadd.f32 %v2709_v12, %v3792_v46  ;;  %3129 = vrsqrt.f32 %v2606_v25  ;;  %vm2666_vm8 = vmor %vm2664_vm7, %vm2665_vm10  ;;  %vm2674_vm11 = vweird.f32 %v2606_v25 }
 0xd0b   : > { %v2657_v42 = vsel %vm2656_vm6, %v3126_v29, %v2653_v24  ;;  %v2660_v5 = vmul.f32 %v3128_v17, %v2659_v4 }
 0xd0c   : > { %2725 = vst.msk [vmem:[%s4257_s26 + $0x18] sm:$0xff] %vm322_vm0, %v2717_v61  ;;  %v2692_v36 = vmul.f32 %v2657_v42, %v4216_v60 }
 0xd0d   : > { %v2661_v6 = vmul.f32 0.5, %v2660_v5  ;;  %v2591_v56 = vpop.xlane.xlu2 %2590 }
 0xd0e   : > { %v2701_v7 = vmul.f32 %v4243_v63, %v2692_v36  ;;  %v2599_v41 = vmul.f32 %v2591_v56, %v3477_v37 }
 0xd0f   : > { %v2662_v3 = vsub.f32 1.5, %v2661_v6 }
 0xd10   : > { %v3130_v1 = vpop.eup %3129  ;;  %v2710_v46 = vadd.f32 %v4246_v34, %v2701_v7  ;;  %v2607_v21 = vadd.f32 1e-05, %v2599_v41 }
 0xd11   : > { %v2663_v15 = vmul.f32 %v3128_v17, %v2662_v3  ;;  %v2669_v53 = vmul.f32 %v3130_v1, %v2606_v25  ;;  %vm2675_vm9 = vweird.f32 %v3130_v1 }
 0xd12   : > { %v2718_v62 = vadd.f32 %v2710_v46, %v3801_v2  ;;  %3131 = vrsqrt.f32 %v2607_v21  ;;  %vm2676_vm12 = vmor %vm2674_vm11, %vm2675_vm9  ;;  %vm2684_vm14 = vweird.f32 %v2607_v21 }
 0xd13   : > { %v2667_v60 = vsel %vm2666_vm8, %v3128_v17, %v2663_v15  ;;  %v2670_v59 = vmul.f32 %v3130_v1, %v2669_v53 }
 0xd14   : > { %2726 = vst.msk [vmem:[%s4257_s26 + $0x20] sm:$0xff] %vm322_vm0, %v2718_v62  ;;  %v2693_v37 = vmul.f32 %v2667_v60, %v4222_v40 }
 0xd15   : > { %v2671_v44 = vmul.f32 0.5, %v2670_v59 }
 0xd16   : > { %v2702_v43 = vmul.f32 %v4243_v63, %v2693_v37 }
 0xd17   : > { %v2672_v47 = vsub.f32 1.5, %v2671_v44 }
 0xd18   : > { %v3132_v39 = vpop.eup %3131  ;;  %v2711_v51 = vadd.f32 %v4246_v34, %v2702_v43 }
 0xd19   : > { %v2673_v54 = vmul.f32 %v3130_v1, %v2672_v47  ;;  %v2679_v2 = vmul.f32 %v3132_v39, %v2607_v21  ;;  %vm2685_vm13 = vweird.f32 %v3132_v39 }
 0xd1a   : > { %v2719_v49 = vadd.f32 %v2711_v51, %v3809_v32  ;;  %vm2686_vm15 = vmor %vm2684_vm14, %vm2685_vm13 }
 0xd1b   : > { %v2677_v58 = vsel %vm2676_vm12, %v3130_v1, %v2673_v54  ;;  %v2680_v0 = vmul.f32 %v3132_v39, %v2679_v2 }
 0xd1c   : > { %2727 = vst.msk [vmem:[%s4257_s26 + $0x28] sm:$0xff] %vm322_vm0, %v2719_v49  ;;  %v2694_v40 = vmul.f32 %v2677_v58, %v4228_v27 }
 0xd1d   : > { %v2681_v38 = vmul.f32 0.5, %v2680_v0 }
 0xd1e   : > { %v2703_v18 = vmul.f32 %v4243_v63, %v2694_v40 }
 0xd1f   : > { %v2682_v57 = vsub.f32 1.5, %v2681_v38 }
 0xd20   : > { %v2712_v52 = vadd.f32 %v4246_v34, %v2703_v18 }
 0xd21   : > { %v2683_v14 = vmul.f32 %v3132_v39, %v2682_v57 }
 0xd22   : > { %v2720_v32 = vadd.f32 %v2712_v52, %v3817_v9 }
 0xd23   : > { %v2687_v48 = vsel %vm2686_vm15, %v3132_v39, %v2683_v14 }
 0xd24   : > { %2728 = vst.msk [vmem:[%s4257_s26 + $0x30] sm:$0xff] %vm322_vm0, %v2720_v32  ;;  %v2695_v10 = vmul.f32 %v2687_v48, %v4234_v33 }
 0xd26   : > { %v2704_v27 = vmul.f32 %v4243_v63, %v2695_v10 }
 0xd28   : > { %v2713_v11 = vadd.f32 %v4246_v34, %v2704_v27 }
 0xd2a   : > { %v2721_v13 = vadd.f32 %v2713_v11, %v3825_v23 }
 0xd2c   : > { %2729 = vst.msk [vmem:[%s4257_s26 + $0x38] sm:$0xff] %vm322_vm0, %v2721_v13 }
 0xd2d PF: > { %s18_s27 = sadd.s32 1, %s3151_s27  }
 0xd2e   : > { %p15_p4 = scmp.ge.s32.totalorder %s18_s27, 4  }
 0xd30   :  { %17 = sbr.rel (!%p15_p4) target bundleno = 1 (0x1), region = 88 }

</bundles_post_ra>
